<compile_context>
chip_gen: v6e
topology: v6e:2x2x1
jax: 0.10.0
libtpu: 0.0.40
codegen_flags: <defaults>
</compile_context>

<pallas_src>
import functools

import jax
import jax.numpy as jnp
import numpy as np
from jax.experimental import pallas as pl
from jax.experimental.pallas import tpu as pltpu


# ----------------------------------------------------------------------------
# Pallas kernel: one EncodingBlock forward for the FULL batch (grid step = block).
# ----------------------------------------------------------------------------
def _encoder_layer_kernel(
    emb_ref,     # (2, B, N, E)        both embeddings (row, col), passed once
    cost_ref,    # (1, B, N, N)        cost matrix, already oriented for this block
    wqkv_ref,    # (1, 3*H, E, d)      per-head [Wq | Wk | Wv]
    wcomb_ref,   # (1, H*d, E)         head-combine weight
    mix_ref,     # (1, 5*G*ms, N, N)   mixed-score MLP params, pre-expanded (G = H*B)
    wff1_ref,    # (1, E, F)
    wff2_ref,    # (1, F, E)
    vec_ref,     # (1, 8, F)           rows: bcomb, g1, bt1, bff1, bff2, g2, bt2, pad
    out_ref,     # (1, B, N, E)
    *,
    head_num,
    qkv_dim,
    ms_hidden_dim,
    inv_sqrt_qkv,
    eps,
):
    _, B, N, E = emb_ref.shape
    H, d, ms = head_num, qkv_dim, ms_hidden_dim
    BN = B * N
    G = H * B
    Gm = G * ms

    g = pl.program_id(0)
    x3 = emb_ref[g]          # (B, N, E)   this block's query-side embedding
    y3 = emb_ref[1 - g]      # (B, N, E)   the other block's embedding (key/value side)
    cost = cost_ref[0]       # (B, N, N)   pre-oriented wrapper-side

    x2 = x3.reshape(BN, E)
    y2 = y3.reshape(BN, E)

    # --- per-head Q/K/V projections: one H-batched dot_general each (heads stay off lanes) ---
    w = wqkv_ref[0]                                   # (3H, E, d)
    xh = jnp.broadcast_to(x2[None], (H, BN, E))
    yh = jnp.broadcast_to(y2[None], (H, BN, E))
    q = jnp.einsum('hme,hed->hmd', xh, w[0:H], preferred_element_type=jnp.float32)
    k = jnp.einsum('hme,hed->hmd', yh, w[H:2 * H], preferred_element_type=jnp.float32)
    v = jnp.einsum('hme,hed->hmd', yh, w[2 * H:3 * H], preferred_element_type=jnp.float32)
    # (H, B*N, d) and (G, N, d) share the same row-major layout -> free reshape.
    q3 = q.reshape(G, N, d)
    k3 = k.reshape(G, N, d)
    v3 = v.reshape(G, N, d)

    # --- scaled dot scores: one G-batched dot_general ---
    scores = jnp.einsum('gnd,gmd->gnm', q3, k3,
                        preferred_element_type=jnp.float32) * inv_sqrt_qkv   # (G, N, N)
    cost_g = jnp.broadcast_to(cost[None], (H, B, N, N)).reshape(G, N, N)

    # --- mixed-score 2-layer MLP, fully vectorized (weights pre-expanded wrapper-side) ---
    m = mix_ref[0]                                    # (5*G*ms, N, N)
    wd = m[0 * Gm:1 * Gm].reshape(G, ms, N, N)        # mix1 weight on dot score
    wc = m[1 * Gm:2 * Gm].reshape(G, ms, N, N)        # mix1 weight on cost
    b1 = m[2 * Gm:3 * Gm].reshape(G, ms, N, N)        # mix1 bias
    w2 = m[3 * Gm:4 * Gm].reshape(G, ms, N, N)        # mix2 weight
    b2s = m[4 * Gm:5 * Gm].reshape(G, ms, N, N)       # mix2 bias / ms (ms-sum restores it)
    hidden = jnp.maximum(scores[:, None] * wd + cost_g[:, None] * wc + b1, 0.0)
    mixed = jnp.sum(hidden * w2 + b2s, axis=1)        # (G, N, N)

    # --- softmax over columns, attention, head combine ---
    mixed = mixed - jnp.max(mixed, axis=-1, keepdims=True)
    e = jnp.exp(mixed)
    attn = e * pl.reciprocal(jnp.sum(e, axis=-1, keepdims=True), approx=True)
    ctx = jnp.einsum('gnm,gmd->gnd', attn, v3, preferred_element_type=jnp.float32)   # (G, N, d)

    wcomb_g = jnp.broadcast_to(wcomb_ref[0].reshape(H, 1, d, E),
                               (H, B, d, E)).reshape(G, d, E)
    mh_g = jnp.einsum('gnd,gde->gne', ctx, wcomb_g,
                      preferred_element_type=jnp.float32)                             # (G, N, E)

    vec = vec_ref[0]                                  # (8, F)
    mh = jnp.sum(mh_g.reshape(H, B, N, E), axis=0) + vec[0:1, 0:E]                    # (B, N, E)

    # --- add & instance norm (stats over N; one-pass mean / E[x^2]) ---
    def inorm(z, gamma, beta):
        mean = jnp.mean(z, axis=1, keepdims=True)                       # (B, 1, E)
        var = jnp.mean(z * z, axis=1, keepdims=True) - mean * mean      # biased (torch convention)
        return (z - mean) * jax.lax.rsqrt(var + eps) * gamma + beta

    out1 = inorm(x3 + mh, vec[1:2, 0:E], vec[2:3, 0:E])                 # (B, N, E)

    # --- feed forward (batch folded into M) ---
    h1 = jnp.maximum(
        jnp.dot(out1.reshape(BN, E), wff1_ref[0],
                preferred_element_type=jnp.float32) + vec[3:4, :], 0.0)               # (BN, F)
    ff = jnp.dot(h1, wff2_ref[0], preferred_element_type=jnp.float32) + vec[4:5, 0:E]

    out3 = inorm(out1 + ff.reshape(B, N, E), vec[5:6, 0:E], vec[6:7, 0:E])
    out_ref[0] = out3.astype(out_ref.dtype)


# ----------------------------------------------------------------------------
# One-time parameter packing (per-layer): per-head QKV slab, bias/scale slab,
# mixed-score slab (head dim on a leading axis), stacked over {row, col} blocks.
# ----------------------------------------------------------------------------
def prepare_layer_params(row_params, col_params, *, head_num, qkv_dim, ms_hidden_dim, n):
    H, d, ms, N = head_num, qkv_dim, ms_hidden_dim, n

    def one(p):
        E = p["wq"].shape[0]
        F = p["wff1"].shape[1]

        def heads(w):  # (E, H*d) -> (H, E, d)
            return jnp.transpose(w.reshape(E, H, d), (1, 0, 2))

        wqkv = jnp.concatenate([heads(p["wq"]), heads(p["wk"]), heads(p["wv"])], axis=0)

        vec = jnp.zeros((8, F), jnp.float32)
        vec = vec.at[0, :E].set(p["bcomb"][0])
        vec = vec.at[1, :E].set(p["g1"][0])
        vec = vec.at[2, :E].set(p["bt1"][0])
        vec = vec.at[3, :].set(p["bff1"][0])
        vec = vec.at[4, :E].set(p["bff2"][0])
        vec = vec.at[5, :E].set(p["g2"][0])
        vec = vec.at[6, :E].set(p["bt2"][0])

        m1w = p["m1w"].reshape(H, 2, ms)
        m1b = p["m1b"].reshape(H, ms)
        m2w = p["m2w"].reshape(H, ms)
        m2b = p["m2b"].reshape(H)

        def exp_hm(a):  # (H, ms) -> (H, ms, N, N)
            return jnp.broadcast_to(a[:, :, None, None], (H, ms, N, N))

        mix = jnp.stack([
            exp_hm(m1w[:, 0, :]),
            exp_hm(m1w[:, 1, :]),
            exp_hm(m1b),
            exp_hm(m2w),
            exp_hm(jnp.broadcast_to((m2b / ms)[:, None], (H, ms))),
        ])                                                       # (5, H, ms, N, N)

        return dict(wqkv=wqkv, wcomb=p["wcomb"], vec=vec, mix=mix,
                    wff1=p["wff1"], wff2=p["wff2"])

    r, c = one(row_params), one(col_params)
    return {k: jnp.stack([r[k], c[k]]) for k in r}


# ----------------------------------------------------------------------------
# Wrapper: one pallas_call runs both encoding blocks (grid=(2,), "parallel").
# Batch B can grow freely (all shapes scale; VMEM working set is tiny).
# ----------------------------------------------------------------------------
def encoder_layer(row_emb, col_emb, cost_mat, layer_params, *, head_num, qkv_dim,
                  ms_hidden_dim, sqrt_qkv_dim, eps=1e-5):
    B, R, E = row_emb.shape
    C = col_emb.shape[1]
    if R != C:
        # TODO(synk): support R != C via padding + masked softmax / masked instance-norm stats.
        raise NotImplementedError("fused EncoderLayer kernel assumes row_cnt == col_cnt")
    N = R
    H, d, ms = head_num, qkv_dim, ms_hidden_dim
    Hd = H * d
    G = H * B
    F = layer_params["wff1"].shape[-1]

    emb_stack = jnp.stack([row_emb, col_emb])                               # (2, B, N, E)
    cost_pair = jnp.stack([cost_mat, jnp.transpose(cost_mat, (0, 2, 1))])   # (2, B, N, N)

    # Tile the mixed-score slab over batch (XLA-side, fused, tiny) so the kernel stays rank<=4.
    mix = layer_params["mix"]                                               # (2, 5, H, ms, N, N)
    mix_g = jnp.broadcast_to(mix[:, :, :, None],
                             (2, 5, H, B, ms, N, N)).reshape(2, 5 * G * ms, N, N)

    kernel = functools.partial(
        _encoder_layer_kernel, head_num=H, qkv_dim=d, ms_hidden_dim=ms,
        inv_sqrt_qkv=1.0 / sqrt_qkv_dim, eps=eps)

    in_specs = [
        pl.BlockSpec((2, B, N, E), lambda g: (0, 0, 0, 0)),           # emb stack (once)
        pl.BlockSpec((1, B, N, N), lambda g: (g, 0, 0, 0)),           # cost, pre-oriented
        pl.BlockSpec((1, 3 * H, E, d), lambda g: (g, 0, 0, 0)),       # Wq|Wk|Wv per head
        pl.BlockSpec((1, Hd, E), lambda g: (g, 0, 0)),                # Wcomb
        pl.BlockSpec((1, 5 * G * ms, N, N), lambda g: (g, 0, 0, 0)),  # mixed-score slab
        pl.BlockSpec((1, E, F), lambda g: (g, 0, 0)),                 # Wff1
        pl.BlockSpec((1, F, E), lambda g: (g, 0, 0)),                 # Wff2
        pl.BlockSpec((1, 8, F), lambda g: (g, 0, 0)),                 # bias/scale slab
    ]
    out_spec = pl.BlockSpec((1, B, N, E), lambda g: (g, 0, 0, 0))

    lp = layer_params
    out = pl.pallas_call(
        kernel,
        out_shape=jax.ShapeDtypeStruct((2, B, N, E), jnp.float32),
        grid=(2,),
        in_specs=in_specs,
        out_specs=out_spec,
        compiler_params=pltpu.CompilerParams(dimension_semantics=("parallel",)),
    )(emb_stack, cost_pair, lp["wqkv"], lp["wcomb"], mix_g, lp["wff1"], lp["wff2"], lp["vec"])
    return out[0], out[1]


# ----------------------------------------------------------------------------
# Pure-JAX reference (for validation).
# ----------------------------------------------------------------------------
def ref_encoding_block(x, y, cost, p, *, head_num, qkv_dim, ms_hidden_dim,
                       sqrt_qkv_dim, eps=1e-5):
    B, N1, E = x.shape
    d = qkv_dim

    def split(z):
        return z.reshape(B, -1, head_num, d).transpose(0, 2, 1, 3)   # (B, H, N, d)

    q = split(x @ p["wq"])
    k = split(y @ p["wk"])
    v = split(y @ p["wv"])

    dot = jnp.einsum("bhrd,bhcd->bhrc", q, k) / sqrt_qkv_dim
    cost_b = jnp.broadcast_to(cost[:, None], dot.shape)

    m1w = p["m1w"].reshape(head_num, 2, ms_hidden_dim)
    m1b = p["m1b"].reshape(head_num, ms_hidden_dim)
    m2w = p["m2w"].reshape(head_num, ms_hidden_dim)
    m2b = p["m2b"].reshape(head_num)

    w0 = m1w[:, 0, :]
    w1 = m1w[:, 1, :]
    ms1 = (dot[..., None] * w0[None, :, None, None, :]
           + cost_b[..., None] * w1[None, :, None, None, :]
           + m1b[None, :, None, None, :])
    ms1 = jnp.maximum(ms1, 0.0)
    mixed = jnp.einsum("bhrcm,hm->bhrc", ms1, m2w) + m2b[None, :, None, None]

    attn = jax.nn.softmax(mixed, axis=-1)
    out = jnp.einsum("bhrc,bhcd->bhrd", attn, v)
    out_concat = out.transpose(0, 2, 1, 3).reshape(B, N1, head_num * d)

    mh = out_concat @ p["wcomb"] + p["bcomb"]

    def inorm(z, g, b):
        mean = z.mean(axis=1, keepdims=True)
        var = ((z - mean) ** 2).mean(axis=1, keepdims=True)
        return (z - mean) * jax.lax.rsqrt(var + eps) * g + b

    out1 = inorm(x + mh, p["g1"], p["bt1"])
    ff = jnp.maximum(out1 @ p["wff1"] + p["bff1"], 0.0) @ p["wff2"] + p["bff2"]
    return inorm(out1 + ff, p["g2"], p["bt2"])


def ref_encoder_layer(row_emb, col_emb, cost_mat, rp, cp, cfg):
    r = ref_encoding_block(row_emb, col_emb, cost_mat, rp, **cfg)
    c = ref_encoding_block(col_emb, row_emb,
                           jnp.transpose(cost_mat, (0, 2, 1)), cp, **cfg)
    return r, c


# ----------------------------------------------------------------------------
# Deterministic parameter init (synthetic; mirrors the shapes in __init__).
# ----------------------------------------------------------------------------
def init_block_params(key, E, head_num, qkv_dim, ms_hidden_dim, ff_hidden_dim):
    Hd = head_num * qkv_dim
    keys = jax.random.split(key, 12)

    def lin(k, fan_in, fan_out):
        b = 1.0 / np.sqrt(fan_in)
        return jax.random.uniform(k, (fan_in, fan_out), jnp.float32, -b, b)

    mix1_init = float((1 / 2) ** 0.5)
    mix2_init = float((1 / 16) ** 0.5)

    return {
        "wq": lin(keys[0], E, Hd),
        "wk": lin(keys[1], E, Hd),
        "wv": lin(keys[2], E, Hd),
        "wcomb": lin(keys[3], Hd, E),
        "bcomb": jax.random.uniform(keys[4], (1, E), jnp.float32,
                                    -1.0 / np.sqrt(Hd), 1.0 / np.sqrt(Hd)),
        "g1": jnp.ones((1, E), jnp.float32),
        "bt1": jnp.zeros((1, E), jnp.float32),
        "wff1": lin(keys[5], E, ff_hidden_dim),
        "bff1": jax.random.uniform(keys[6], (1, ff_hidden_dim), jnp.float32,
                                   -1.0 / np.sqrt(E), 1.0 / np.sqrt(E)),
        "wff2": lin(keys[7], ff_hidden_dim, E),
        "bff2": jax.random.uniform(keys[8], (1, E), jnp.float32,
                                   -1.0 / np.sqrt(ff_hidden_dim),
                                   1.0 / np.sqrt(ff_hidden_dim)),
        "g2": jnp.ones((1, E), jnp.float32),
        "bt2": jnp.zeros((1, E), jnp.float32),
        "m1w": jax.random.uniform(keys[9], (head_num * 2 * ms_hidden_dim,),
                                  jnp.float32, -mix1_init, mix1_init),
        "m1b": jax.random.uniform(keys[10], (head_num * ms_hidden_dim,),
                                  jnp.float32, -mix1_init, mix1_init),
        "m2w": jax.random.uniform(keys[11], (head_num * ms_hidden_dim,),
                                  jnp.float32, -mix2_init, mix2_init),
        "m2b": jax.random.uniform(jax.random.fold_in(key, 99), (head_num,),
                                  jnp.float32, -mix2_init, mix2_init),
    }


# ----------------------------------------------------------------------------
if __name__ == "__main__":
    # model_params (TMHA='mixed', MMHA='mixed' -> both blocks are EncodingBlock)
    B, R, C = 2, 8, 8
    E, head_num, qkv_dim = 32, 4, 8
    ms_hidden_dim, ff_hidden_dim = 16, 64
    cfg = dict(head_num=head_num, qkv_dim=qkv_dim, ms_hidden_dim=ms_hidden_dim,
               sqrt_qkv_dim=float(np.sqrt(qkv_dim)))

    key = jax.random.PRNGKey(0)
    k_row, k_col, k_re, k_ce, k_cm = jax.random.split(key, 5)

    row_params = init_block_params(k_row, E, head_num, qkv_dim, ms_hidden_dim, ff_hidden_dim)
    col_params = init_block_params(k_col, E, head_num, qkv_dim, ms_hidden_dim, ff_hidden_dim)

    row_emb = jax.random.normal(k_re, (B, R, E), jnp.float32)
    col_emb = jax.random.normal(k_ce, (B, C, E), jnp.float32)
    cost_mat = jax.random.uniform(k_cm, (B, R, C), jnp.float32)

    # One-time packing of the layer's parameters into the kernel layout.
    layer_params = prepare_layer_params(row_params, col_params,
                                        head_num=head_num, qkv_dim=qkv_dim,
                                        ms_hidden_dim=ms_hidden_dim, n=R)

    run_layer = jax.jit(functools.partial(encoder_layer, **cfg))
    row_out, col_out = run_layer(row_emb, col_emb, cost_mat, layer_params)
    jax.block_until_ready((row_out, col_out))

    # Validate against a pure-JAX reference.
    ref_row, ref_col = ref_encoder_layer(row_emb, col_emb, cost_mat,
                                         row_params, col_params, cfg)
    np.testing.assert_allclose(np.asarray(row_out), np.asarray(ref_row),
                               rtol=2e-3, atol=2e-3)
    np.testing.assert_allclose(np.asarray(col_out), np.asarray(ref_col),
                               rtol=2e-3, atol=2e-3)

    print("KERNEL_OK")
</pallas_src>

<mosaic_0001>
module attributes {stable_mosaic.version = 11 : i64} {
  func.func @_encoder_layer_kernel(%arg0: i32, %arg1: memref<2x2x8x32xf32, #tpu.memory_space<vmem>>, %arg2: memref<1x2x8x8xf32, #tpu.memory_space<vmem>>, %arg3: memref<1x12x32x8xf32, #tpu.memory_space<vmem>>, %arg4: memref<1x32x32xf32, #tpu.memory_space<vmem>>, %arg5: memref<1x640x8x8xf32, #tpu.memory_space<vmem>>, %arg6: memref<1x32x64xf32, #tpu.memory_space<vmem>>, %arg7: memref<1x64x32xf32, #tpu.memory_space<vmem>>, %arg8: memref<1x8x64xf32, #tpu.memory_space<vmem>>, %arg9: memref<1x2x8x32xf32, #tpu.memory_space<vmem>>) attributes {dimension_semantics = [#tpu.dimension_semantics<parallel>], iteration_bounds = array<i64: 2>, scalar_prefetch = 0 : i64, scratch_operands = 0 : i64, tpu.core_type = #tpu.core_type<tc>, window_params = [{pipeline_mode = #tpu.pipeline_mode<synchronous>, transform_indices = @transform_0, window_bounds = array<i64: 2, 2, 8, 32>}, {transform_indices = @transform_1, window_bounds = array<i64: 1, 2, 8, 8>}, {transform_indices = @transform_2, window_bounds = array<i64: 1, 12, 32, 8>}, {transform_indices = @transform_3, window_bounds = array<i64: 1, 32, 32>}, {transform_indices = @transform_4, window_bounds = array<i64: 1, 640, 8, 8>}, {transform_indices = @transform_5, window_bounds = array<i64: 1, 32, 64>}, {transform_indices = @transform_6, window_bounds = array<i64: 1, 64, 32>}, {transform_indices = @transform_7, window_bounds = array<i64: 1, 8, 64>}, {transform_indices = @transform_8, window_bounds = array<i64: 1, 2, 8, 32>}]} {
    %0 = arith.index_cast %arg0 : i32 to index
    %c0 = arith.constant 0 : index
    %c0_0 = arith.constant 0 : index
    %c0_1 = arith.constant 0 : index
    %1 = vector.load %arg1[%0, %c0, %c0_0, %c0_1] : memref<2x2x8x32xf32, #tpu.memory_space<vmem>>, vector<1x2x8x32xf32>
    %2 = vector.shape_cast %1 : vector<1x2x8x32xf32> to vector<2x8x32xf32>
    %c1_i32 = arith.constant 1 : i32
    %3 = arith.subi %c1_i32, %arg0 : i32
    %4 = arith.index_cast %3 : i32 to index
    %c0_2 = arith.constant 0 : index
    %c0_3 = arith.constant 0 : index
    %c0_4 = arith.constant 0 : index
    %5 = vector.load %arg1[%4, %c0_2, %c0_3, %c0_4] : memref<2x2x8x32xf32, #tpu.memory_space<vmem>>, vector<1x2x8x32xf32>
    %6 = vector.shape_cast %5 : vector<1x2x8x32xf32> to vector<2x8x32xf32>
    %c0_5 = arith.constant 0 : index
    %c0_6 = arith.constant 0 : index
    %c0_7 = arith.constant 0 : index
    %c0_8 = arith.constant 0 : index
    %7 = vector.load %arg2[%c0_5, %c0_6, %c0_7, %c0_8] : memref<1x2x8x8xf32, #tpu.memory_space<vmem>>, vector<1x2x8x8xf32>
    %8 = vector.shape_cast %7 : vector<1x2x8x8xf32> to vector<2x8x8xf32>
    %9 = vector.shape_cast %2 : vector<2x8x32xf32> to vector<16x32xf32>
    %10 = vector.shape_cast %6 : vector<2x8x32xf32> to vector<16x32xf32>
    %c0_9 = arith.constant 0 : index
    %c0_10 = arith.constant 0 : index
    %c0_11 = arith.constant 0 : index
    %c0_12 = arith.constant 0 : index
    %11 = vector.load %arg3[%c0_9, %c0_10, %c0_11, %c0_12] : memref<1x12x32x8xf32, #tpu.memory_space<vmem>>, vector<1x12x32x8xf32>
    %12 = vector.shape_cast %11 : vector<1x12x32x8xf32> to vector<12x32x8xf32>
    %13 = vector.shape_cast %9 : vector<16x32xf32> to vector<1x16x32xf32>
    %14 = vector.shape_cast %13 : vector<1x16x32xf32> to vector<1x16x32xf32>
    %15 = vector.broadcast %14 : vector<1x16x32xf32> to vector<4x16x32xf32>
    %16 = vector.shape_cast %10 : vector<16x32xf32> to vector<1x16x32xf32>
    %17 = vector.shape_cast %16 : vector<1x16x32xf32> to vector<1x16x32xf32>
    %18 = vector.broadcast %17 : vector<1x16x32xf32> to vector<4x16x32xf32>
    %19 = vector.extract_strided_slice %12 {offsets = [0, 0, 0], sizes = [4, 32, 8], strides = [1, 1, 1]} : vector<12x32x8xf32> to vector<4x32x8xf32>
    "tpu.trace_start"() <{level = 10 : i32, message = "hme,hed->hmd"}> : () -> ()
    %cst = arith.constant dense<0.000000e+00> : vector<4x16x8xf32>
    %20 = tpu.matmul %15, %19, %cst {dimension_numbers = #tpu.dot_dimension_numbers<[2], [1], [1], [2], [0, 0, 0, 1, 1, 2], [0], [0]>} : vector<4x16x32xf32>, vector<4x32x8xf32>, vector<4x16x8xf32> -> vector<4x16x8xf32>
    "tpu.trace_stop"() : () -> ()
    %21 = vector.extract_strided_slice %12 {offsets = [4, 0, 0], sizes = [4, 32, 8], strides = [1, 1, 1]} : vector<12x32x8xf32> to vector<4x32x8xf32>
    "tpu.trace_start"() <{level = 10 : i32, message = "hme,hed->hmd"}> : () -> ()
    %cst_13 = arith.constant dense<0.000000e+00> : vector<4x16x8xf32>
    %22 = tpu.matmul %18, %21, %cst_13 {dimension_numbers = #tpu.dot_dimension_numbers<[2], [1], [1], [2], [0, 0, 0, 1, 1, 2], [0], [0]>} : vector<4x16x32xf32>, vector<4x32x8xf32>, vector<4x16x8xf32> -> vector<4x16x8xf32>
    "tpu.trace_stop"() : () -> ()
    %23 = vector.extract_strided_slice %12 {offsets = [8, 0, 0], sizes = [4, 32, 8], strides = [1, 1, 1]} : vector<12x32x8xf32> to vector<4x32x8xf32>
    "tpu.trace_start"() <{level = 10 : i32, message = "hme,hed->hmd"}> : () -> ()
    %cst_14 = arith.constant dense<0.000000e+00> : vector<4x16x8xf32>
    %24 = tpu.matmul %18, %23, %cst_14 {dimension_numbers = #tpu.dot_dimension_numbers<[2], [1], [1], [2], [0, 0, 0, 1, 1, 2], [0], [0]>} : vector<4x16x32xf32>, vector<4x32x8xf32>, vector<4x16x8xf32> -> vector<4x16x8xf32>
    "tpu.trace_stop"() : () -> ()
    %25 = vector.shape_cast %20 : vector<4x16x8xf32> to vector<8x8x8xf32>
    %26 = vector.shape_cast %22 : vector<4x16x8xf32> to vector<8x8x8xf32>
    %27 = vector.shape_cast %24 : vector<4x16x8xf32> to vector<8x8x8xf32>
    "tpu.trace_start"() <{level = 10 : i32, message = "gnd,gmd->gnm"}> : () -> ()
    %cst_15 = arith.constant dense<0.000000e+00> : vector<8x8x8xf32>
    %28 = tpu.matmul %25, %26, %cst_15 {dimension_numbers = #tpu.dot_dimension_numbers<[2], [2], [1], [1], [0, 0, 0, 1, 1, 1], [0], [0]>} : vector<8x8x8xf32>, vector<8x8x8xf32>, vector<8x8x8xf32> -> vector<8x8x8xf32>
    "tpu.trace_stop"() : () -> ()
    %cst_16 = arith.constant 0.353553385 : f32
    %29 = vector.broadcast %cst_16 : f32 to vector<8x8x8xf32>
    %30 = arith.mulf %28, %29 : vector<8x8x8xf32>
    %31 = vector.shape_cast %8 : vector<2x8x8xf32> to vector<1x2x8x8xf32>
    %32 = vector.shape_cast %31 : vector<1x2x8x8xf32> to vector<1x2x8x8xf32>
    %33 = vector.broadcast %32 : vector<1x2x8x8xf32> to vector<4x2x8x8xf32>
    %34 = vector.shape_cast %33 : vector<4x2x8x8xf32> to vector<8x8x8xf32>
    %c0_17 = arith.constant 0 : index
    %c0_18 = arith.constant 0 : index
    %c0_19 = arith.constant 0 : index
    %c0_20 = arith.constant 0 : index
    %35 = vector.load %arg5[%c0_17, %c0_18, %c0_19, %c0_20] : memref<1x640x8x8xf32, #tpu.memory_space<vmem>>, vector<1x640x8x8xf32>
    %36 = vector.shape_cast %35 : vector<1x640x8x8xf32> to vector<640x8x8xf32>
    %37 = vector.extract_strided_slice %36 {offsets = [0, 0, 0], sizes = [128, 8, 8], strides = [1, 1, 1]} : vector<640x8x8xf32> to vector<128x8x8xf32>
    %38 = vector.shape_cast %37 : vector<128x8x8xf32> to vector<8x16x8x8xf32>
    %39 = vector.extract_strided_slice %36 {offsets = [128, 0, 0], sizes = [128, 8, 8], strides = [1, 1, 1]} : vector<640x8x8xf32> to vector<128x8x8xf32>
    %40 = vector.shape_cast %39 : vector<128x8x8xf32> to vector<8x16x8x8xf32>
    %41 = vector.extract_strided_slice %36 {offsets = [256, 0, 0], sizes = [128, 8, 8], strides = [1, 1, 1]} : vector<640x8x8xf32> to vector<128x8x8xf32>
    %42 = vector.shape_cast %41 : vector<128x8x8xf32> to vector<8x16x8x8xf32>
    %43 = vector.extract_strided_slice %36 {offsets = [384, 0, 0], sizes = [128, 8, 8], strides = [1, 1, 1]} : vector<640x8x8xf32> to vector<128x8x8xf32>
    %44 = vector.shape_cast %43 : vector<128x8x8xf32> to vector<8x16x8x8xf32>
    %45 = vector.extract_strided_slice %36 {offsets = [512, 0, 0], sizes = [128, 8, 8], strides = [1, 1, 1]} : vector<640x8x8xf32> to vector<128x8x8xf32>
    %46 = vector.shape_cast %45 : vector<128x8x8xf32> to vector<8x16x8x8xf32>
    %47 = vector.shape_cast %30 : vector<8x8x8xf32> to vector<8x1x8x8xf32>
    %48 = vector.broadcast %47 : vector<8x1x8x8xf32> to vector<8x16x8x8xf32>
    %49 = arith.mulf %48, %38 : vector<8x16x8x8xf32>
    %50 = vector.shape_cast %34 : vector<8x8x8xf32> to vector<8x1x8x8xf32>
    %51 = vector.broadcast %50 : vector<8x1x8x8xf32> to vector<8x16x8x8xf32>
    %52 = arith.mulf %51, %40 : vector<8x16x8x8xf32>
    %53 = arith.addf %49, %52 : vector<8x16x8x8xf32>
    %54 = arith.addf %53, %42 : vector<8x16x8x8xf32>
    %cst_21 = arith.constant 0.000000e+00 : f32
    %55 = vector.broadcast %cst_21 : f32 to vector<8x16x8x8xf32>
    %56 = arith.maximumf %54, %55 : vector<8x16x8x8xf32>
    %57 = arith.mulf %56, %44 : vector<8x16x8x8xf32>
    %58 = arith.addf %57, %46 : vector<8x16x8x8xf32>
    %cst_22 = arith.constant dense<0.000000e+00> : vector<8x8x8xf32>
    %59 = vector.multi_reduction <add>, %58, %cst_22 [1] : vector<8x16x8x8xf32> to vector<8x8x8xf32>
    %cst_23 = arith.constant dense<0xFF800000> : vector<8x8xf32>
    %60 = vector.multi_reduction <maximumf>, %59, %cst_23 [2] : vector<8x8x8xf32> to vector<8x8xf32>
    %61 = vector.shape_cast %60 : vector<8x8xf32> to vector<8x8x1xf32>
    %62 = vector.broadcast %61 : vector<8x8x1xf32> to vector<8x8x8xf32>
    %63 = arith.subf %59, %62 : vector<8x8x8xf32>
    %64 = math.exp %63 : vector<8x8x8xf32>
    %cst_24 = arith.constant dense<0.000000e+00> : vector<8x8xf32>
    %65 = vector.multi_reduction <add>, %64, %cst_24 [2] : vector<8x8x8xf32> to vector<8x8xf32>
    %66 = vector.shape_cast %65 : vector<8x8xf32> to vector<8x8x1xf32>
    %67 = tpu.reciprocal %66 {approx = true} : vector<8x8x1xf32> -> vector<8x8x1xf32>
    %68 = vector.broadcast %67 : vector<8x8x1xf32> to vector<8x8x8xf32>
    %69 = arith.mulf %64, %68 : vector<8x8x8xf32>
    "tpu.trace_start"() <{level = 10 : i32, message = "gnm,gmd->gnd"}> : () -> ()
    %cst_25 = arith.constant dense<0.000000e+00> : vector<8x8x8xf32>
    %70 = tpu.matmul %69, %27, %cst_25 {dimension_numbers = #tpu.dot_dimension_numbers<[2], [1], [1], [2], [0, 0, 0, 1, 1, 2], [0], [0]>} : vector<8x8x8xf32>, vector<8x8x8xf32>, vector<8x8x8xf32> -> vector<8x8x8xf32>
    "tpu.trace_stop"() : () -> ()
    %c0_26 = arith.constant 0 : index
    %c0_27 = arith.constant 0 : index
    %c0_28 = arith.constant 0 : index
    %71 = vector.load %arg4[%c0_26, %c0_27, %c0_28] : memref<1x32x32xf32, #tpu.memory_space<vmem>>, vector<1x32x32xf32>
    %72 = vector.shape_cast %71 : vector<1x32x32xf32> to vector<32x32xf32>
    %73 = vector.shape_cast %72 : vector<32x32xf32> to vector<4x1x8x32xf32>
    %74 = vector.shape_cast %73 : vector<4x1x8x32xf32> to vector<4x1x8x32xf32>
    %75 = vector.broadcast %74 : vector<4x1x8x32xf32> to vector<4x2x8x32xf32>
    %76 = vector.shape_cast %75 : vector<4x2x8x32xf32> to vector<8x8x32xf32>
    "tpu.trace_start"() <{level = 10 : i32, message = "gnd,gde->gne"}> : () -> ()
    %cst_29 = arith.constant dense<0.000000e+00> : vector<8x8x32xf32>
    %77 = tpu.matmul %70, %76, %cst_29 {dimension_numbers = #tpu.dot_dimension_numbers<[2], [1], [1], [2], [0, 0, 0, 1, 1, 2], [0], [0]>} : vector<8x8x8xf32>, vector<8x8x32xf32>, vector<8x8x32xf32> -> vector<8x8x32xf32>
    "tpu.trace_stop"() : () -> ()
    %c0_30 = arith.constant 0 : index
    %c0_31 = arith.constant 0 : index
    %c0_32 = arith.constant 0 : index
    %78 = vector.load %arg8[%c0_30, %c0_31, %c0_32] : memref<1x8x64xf32, #tpu.memory_space<vmem>>, vector<1x8x64xf32>
    %79 = vector.shape_cast %78 : vector<1x8x64xf32> to vector<8x64xf32>
    %80 = vector.shape_cast %77 : vector<8x8x32xf32> to vector<4x2x8x32xf32>
    %cst_33 = arith.constant dense<0.000000e+00> : vector<2x8x32xf32>
    %81 = vector.multi_reduction <add>, %80, %cst_33 [0] : vector<4x2x8x32xf32> to vector<2x8x32xf32>
    %82 = vector.extract_strided_slice %79 {offsets = [0, 0], sizes = [1, 32], strides = [1, 1]} : vector<8x64xf32> to vector<1x32xf32>
    %83 = vector.shape_cast %82 : vector<1x32xf32> to vector<1x1x32xf32>
    %84 = vector.broadcast %83 : vector<1x1x32xf32> to vector<2x8x32xf32>
    %85 = arith.addf %81, %84 : vector<2x8x32xf32>
    %86 = arith.addf %2, %85 : vector<2x8x32xf32>
    %87 = vector.extract_strided_slice %79 {offsets = [1, 0], sizes = [1, 32], strides = [1, 1]} : vector<8x64xf32> to vector<1x32xf32>
    %88 = vector.extract_strided_slice %79 {offsets = [2, 0], sizes = [1, 32], strides = [1, 1]} : vector<8x64xf32> to vector<1x32xf32>
    %cst_34 = arith.constant dense<0.000000e+00> : vector<2x32xf32>
    %89 = vector.multi_reduction <add>, %86, %cst_34 [1] : vector<2x8x32xf32> to vector<2x32xf32>
    %90 = vector.shape_cast %89 : vector<2x32xf32> to vector<2x1x32xf32>
    %cst_35 = arith.constant 8.000000e+00 : f32
    %91 = vector.broadcast %cst_35 : f32 to vector<2x1x32xf32>
    %92 = arith.divf %90, %91 : vector<2x1x32xf32>
    %93 = arith.mulf %86, %86 : vector<2x8x32xf32>
    %cst_36 = arith.constant dense<0.000000e+00> : vector<2x32xf32>
    %94 = vector.multi_reduction <add>, %93, %cst_36 [1] : vector<2x8x32xf32> to vector<2x32xf32>
    %95 = vector.shape_cast %94 : vector<2x32xf32> to vector<2x1x32xf32>
    %cst_37 = arith.constant 8.000000e+00 : f32
    %96 = vector.broadcast %cst_37 : f32 to vector<2x1x32xf32>
    %97 = arith.divf %95, %96 : vector<2x1x32xf32>
    %98 = arith.mulf %92, %92 : vector<2x1x32xf32>
    %99 = arith.subf %97, %98 : vector<2x1x32xf32>
    %100 = vector.broadcast %92 : vector<2x1x32xf32> to vector<2x8x32xf32>
    %101 = arith.subf %86, %100 : vector<2x8x32xf32>
    %cst_38 = arith.constant 9.99999974E-6 : f32
    %102 = vector.broadcast %cst_38 : f32 to vector<2x1x32xf32>
    %103 = arith.addf %99, %102 : vector<2x1x32xf32>
    %104 = math.rsqrt %103 : vector<2x1x32xf32>
    %105 = vector.broadcast %104 : vector<2x1x32xf32> to vector<2x8x32xf32>
    %106 = arith.mulf %101, %105 : vector<2x8x32xf32>
    %107 = vector.shape_cast %87 : vector<1x32xf32> to vector<1x1x32xf32>
    %108 = vector.broadcast %107 : vector<1x1x32xf32> to vector<2x8x32xf32>
    %109 = arith.mulf %106, %108 : vector<2x8x32xf32>
    %110 = vector.shape_cast %88 : vector<1x32xf32> to vector<1x1x32xf32>
    %111 = vector.broadcast %110 : vector<1x1x32xf32> to vector<2x8x32xf32>
    %112 = arith.addf %109, %111 : vector<2x8x32xf32>
    %113 = vector.shape_cast %112 : vector<2x8x32xf32> to vector<16x32xf32>
    %c0_39 = arith.constant 0 : index
    %c0_40 = arith.constant 0 : index
    %c0_41 = arith.constant 0 : index
    %114 = vector.load %arg6[%c0_39, %c0_40, %c0_41] : memref<1x32x64xf32, #tpu.memory_space<vmem>>, vector<1x32x64xf32>
    %115 = vector.shape_cast %114 : vector<1x32x64xf32> to vector<32x64xf32>
    %cst_42 = arith.constant dense<0.000000e+00> : vector<16x64xf32>
    %116 = tpu.matmul %113, %115, %cst_42 {dimension_numbers = #tpu.dot_dimension_numbers<[1], [0], [0], [1], [0, 0, 1, 1], [], []>} : vector<16x32xf32>, vector<32x64xf32>, vector<16x64xf32> -> vector<16x64xf32>
    %117 = vector.extract_strided_slice %79 {offsets = [3, 0], sizes = [1, 64], strides = [1, 1]} : vector<8x64xf32> to vector<1x64xf32>
    %118 = vector.broadcast %117 : vector<1x64xf32> to vector<16x64xf32>
    %119 = arith.addf %116, %118 : vector<16x64xf32>
    %cst_43 = arith.constant 0.000000e+00 : f32
    %120 = vector.broadcast %cst_43 : f32 to vector<16x64xf32>
    %121 = arith.maximumf %119, %120 : vector<16x64xf32>
    %c0_44 = arith.constant 0 : index
    %c0_45 = arith.constant 0 : index
    %c0_46 = arith.constant 0 : index
    %122 = vector.load %arg7[%c0_44, %c0_45, %c0_46] : memref<1x64x32xf32, #tpu.memory_space<vmem>>, vector<1x64x32xf32>
    %123 = vector.shape_cast %122 : vector<1x64x32xf32> to vector<64x32xf32>
    %cst_47 = arith.constant dense<0.000000e+00> : vector<16x32xf32>
    %124 = tpu.matmul %121, %123, %cst_47 {dimension_numbers = #tpu.dot_dimension_numbers<[1], [0], [0], [1], [0, 0, 1, 1], [], []>} : vector<16x64xf32>, vector<64x32xf32>, vector<16x32xf32> -> vector<16x32xf32>
    %125 = vector.extract_strided_slice %79 {offsets = [4, 0], sizes = [1, 32], strides = [1, 1]} : vector<8x64xf32> to vector<1x32xf32>
    %126 = vector.broadcast %125 : vector<1x32xf32> to vector<16x32xf32>
    %127 = arith.addf %124, %126 : vector<16x32xf32>
    %128 = vector.shape_cast %127 : vector<16x32xf32> to vector<2x8x32xf32>
    %129 = arith.addf %112, %128 : vector<2x8x32xf32>
    %130 = vector.extract_strided_slice %79 {offsets = [5, 0], sizes = [1, 32], strides = [1, 1]} : vector<8x64xf32> to vector<1x32xf32>
    %131 = vector.extract_strided_slice %79 {offsets = [6, 0], sizes = [1, 32], strides = [1, 1]} : vector<8x64xf32> to vector<1x32xf32>
    %cst_48 = arith.constant dense<0.000000e+00> : vector<2x32xf32>
    %132 = vector.multi_reduction <add>, %129, %cst_48 [1] : vector<2x8x32xf32> to vector<2x32xf32>
    %133 = vector.shape_cast %132 : vector<2x32xf32> to vector<2x1x32xf32>
    %cst_49 = arith.constant 8.000000e+00 : f32
    %134 = vector.broadcast %cst_49 : f32 to vector<2x1x32xf32>
    %135 = arith.divf %133, %134 : vector<2x1x32xf32>
    %136 = arith.mulf %129, %129 : vector<2x8x32xf32>
    %cst_50 = arith.constant dense<0.000000e+00> : vector<2x32xf32>
    %137 = vector.multi_reduction <add>, %136, %cst_50 [1] : vector<2x8x32xf32> to vector<2x32xf32>
    %138 = vector.shape_cast %137 : vector<2x32xf32> to vector<2x1x32xf32>
    %cst_51 = arith.constant 8.000000e+00 : f32
    %139 = vector.broadcast %cst_51 : f32 to vector<2x1x32xf32>
    %140 = arith.divf %138, %139 : vector<2x1x32xf32>
    %141 = arith.mulf %135, %135 : vector<2x1x32xf32>
    %142 = arith.subf %140, %141 : vector<2x1x32xf32>
    %143 = vector.broadcast %135 : vector<2x1x32xf32> to vector<2x8x32xf32>
    %144 = arith.subf %129, %143 : vector<2x8x32xf32>
    %cst_52 = arith.constant 9.99999974E-6 : f32
    %145 = vector.broadcast %cst_52 : f32 to vector<2x1x32xf32>
    %146 = arith.addf %142, %145 : vector<2x1x32xf32>
    %147 = math.rsqrt %146 : vector<2x1x32xf32>
    %148 = vector.broadcast %147 : vector<2x1x32xf32> to vector<2x8x32xf32>
    %149 = arith.mulf %144, %148 : vector<2x8x32xf32>
    %150 = vector.shape_cast %130 : vector<1x32xf32> to vector<1x1x32xf32>
    %151 = vector.broadcast %150 : vector<1x1x32xf32> to vector<2x8x32xf32>
    %152 = arith.mulf %149, %151 : vector<2x8x32xf32>
    %153 = vector.shape_cast %131 : vector<1x32xf32> to vector<1x1x32xf32>
    %154 = vector.broadcast %153 : vector<1x1x32xf32> to vector<2x8x32xf32>
    %155 = arith.addf %152, %154 : vector<2x8x32xf32>
    %c0_53 = arith.constant 0 : index
    %c0_54 = arith.constant 0 : index
    %c0_55 = arith.constant 0 : index
    %c0_56 = arith.constant 0 : index
    %156 = vector.load %arg9[%c0_53, %c0_54, %c0_55, %c0_56] : memref<1x2x8x32xf32, #tpu.memory_space<vmem>>, vector<1x2x8x32xf32>
    %157 = vector.shape_cast %156 : vector<1x2x8x32xf32> to vector<2x8x32xf32>
    %158 = vector.shape_cast %155 : vector<2x8x32xf32> to vector<1x2x8x32xf32>
    tpu.vector_store %arg9[%c0_53, %c0_54, %c0_55, %c0_56], %158 {strides = array<i32>} : memref<1x2x8x32xf32, #tpu.memory_space<vmem>>, vector<1x2x8x32xf32>,
    return
  }
  func.func @transform_0(%arg0: i32) -> (i32, i32, i32, i32) {
    %c0_i32 = arith.constant 0 : i32
    %c0_i32_0 = arith.constant 0 : i32
    %c0_i32_1 = arith.constant 0 : i32
    %c0_i32_2 = arith.constant 0 : i32
    %c0_i32_3 = arith.constant 0 : i32
    return %c0_i32, %c0_i32_0, %c0_i32_1, %c0_i32_2 : i32, i32, i32, i32
  }
  func.func @transform_1(%arg0: i32) -> (i32, i32, i32, i32) {
    %c0_i32 = arith.constant 0 : i32
    %c0_i32_0 = arith.constant 0 : i32
    %c0_i32_1 = arith.constant 0 : i32
    %c0_i32_2 = arith.constant 0 : i32
    return %arg0, %c0_i32, %c0_i32_0, %c0_i32_1 : i32, i32, i32, i32
  }
  func.func @transform_2(%arg0: i32) -> (i32, i32, i32, i32) {
    %c0_i32 = arith.constant 0 : i32
    %c0_i32_0 = arith.constant 0 : i32
    %c0_i32_1 = arith.constant 0 : i32
    %c0_i32_2 = arith.constant 0 : i32
    return %arg0, %c0_i32, %c0_i32_0, %c0_i32_1 : i32, i32, i32, i32
  }
  func.func @transform_3(%arg0: i32) -> (i32, i32, i32) {
    %c0_i32 = arith.constant 0 : i32
    %c0_i32_0 = arith.constant 0 : i32
    %c0_i32_1 = arith.constant 0 : i32
    return %arg0, %c0_i32, %c0_i32_0 : i32, i32, i32
  }
  func.func @transform_4(%arg0: i32) -> (i32, i32, i32, i32) {
    %c0_i32 = arith.constant 0 : i32
    %c0_i32_0 = arith.constant 0 : i32
    %c0_i32_1 = arith.constant 0 : i32
    %c0_i32_2 = arith.constant 0 : i32
    return %arg0, %c0_i32, %c0_i32_0, %c0_i32_1 : i32, i32, i32, i32
  }
  func.func @transform_5(%arg0: i32) -> (i32, i32, i32) {
    %c0_i32 = arith.constant 0 : i32
    %c0_i32_0 = arith.constant 0 : i32
    %c0_i32_1 = arith.constant 0 : i32
    return %arg0, %c0_i32, %c0_i32_0 : i32, i32, i32
  }
  func.func @transform_6(%arg0: i32) -> (i32, i32, i32) {
    %c0_i32 = arith.constant 0 : i32
    %c0_i32_0 = arith.constant 0 : i32
    %c0_i32_1 = arith.constant 0 : i32
    return %arg0, %c0_i32, %c0_i32_0 : i32, i32, i32
  }
  func.func @transform_7(%arg0: i32) -> (i32, i32, i32) {
    %c0_i32 = arith.constant 0 : i32
    %c0_i32_0 = arith.constant 0 : i32
    %c0_i32_1 = arith.constant 0 : i32
    return %arg0, %c0_i32, %c0_i32_0 : i32, i32, i32
  }
  func.func @transform_8(%arg0: i32) -> (i32, i32, i32, i32) {
    %c0_i32 = arith.constant 0 : i32
    %c0_i32_0 = arith.constant 0 : i32
    %c0_i32_1 = arith.constant 0 : i32
    %c0_i32_2 = arith.constant 0 : i32
    return %arg0, %c0_i32, %c0_i32_0, %c0_i32_1 : i32, i32, i32, i32
  }
}

</mosaic_0001>

<bundles_post_ra>
// kernel: encoder_layer.1
= control target key start
LH: loop header
LB: loop body
LE: loop exit
PB: predicated region body
PF: predicated region fallthrough
CT: control target
= control target key end

     0   :  { %s6134_s27 = smov 0   ;;  %s7893_s0 = inlined_call_operand.vmem [shape: f32[2,2,8,32], index: 0, kind: input, shape index: {}]   ;;  %s7894_s1 = inlined_call_operand.vmem [shape: f32[2,2,8,8], index: 1, kind: input, shape index: {}]   ;;  %s7895_s2 = inlined_call_operand.vmem [shape: f32[2,12,32,8], index: 2, kind: input, shape index: {}]   ;;  %s7896_s3 = inlined_call_operand.vmem [shape: f32[2,32,32], index: 3, kind: input, shape index: {}]   ;;  %s7897_s4 = inlined_call_operand.vmem [shape: f32[2,640,8,8], index: 4, kind: input, shape index: {}]   ;;  %s7898_s5 = inlined_call_operand.vmem [shape: f32[2,32,64], index: 5, kind: input, shape index: {}]   ;;  %s7899_s6 = inlined_call_operand.vmem [shape: f32[2,64,32], index: 6, kind: input, shape index: {}]   ;;  %s7900_s7 = inlined_call_operand.vmem [shape: f32[2,8,64], index: 7, kind: input, shape index: {}]   ;;  %s7901_s8 = inlined_call_operand.vmem [shape: f32[2,2,8,32], index: 8, kind: output, shape index: {}]  }
   0x1 LB: > { %s6140_s28 = sadd.s32 4294967295, %s6085_s27   ;;  %p5520_p0 = scmp.ge.s32.totalorder %s6085_s27, 1  ;;  %s6085_s27 = sphi %s6134_s27, %s18_s27  }
   0x2   : > { %p321_p1 = scmp.lt.s32.totalorder %s6085_s27, 3 }
   0x4   : > { %p322_p2 = pnand %p5520_p0, %p321_p1 }
   0x6   : > { %325 = sbr.rel (%p322_p2) target bundleno = 1919 (0x77f), region = 52 }
   0xb   : > { %p384_p3 = scmp.lt.s32.totalorder %s6140_s28, 1  ;;  %s5534_s29 = sshll.u32 %s6140_s28, 4  ;;  %vm482_vm0 = vcmask 261120   ;;  %v7902_v52 = vmov 0.0   ;;  %vm6088_vm1 = vmmov 0   ;;  %vm1395_vm2 = vcmask 64512  }
   0xc   : > { %s6149_s10 = scalar_lea.vmem %s7893_s0, %s5534_s29  ;;  %s427_s16 = ssub.s32 1, %s6140_s28  ;;  %vm5241_vm3 = vcmask 523264  }
   0xd   : > { %s6152_s11 = scalar_select %p384_p3, %s6140_s28, 1  ;;  %v425_v0 = vld [vmem:[%s6149_s10] sm:$0xff]  ;;  %v426_v9 = vld [vmem:[%s6149_s10 + $0x8] sm:$0xff] }
   0xe   : > { %5747 = vmatprep.mubr.msk.f32.mxu0 %vm482_vm0, %v425_v0  ;;  %5758 = vmatprep.mubr.msk.f32.mxu1 %vm482_vm0, %v425_v0  ;;  %s5535_s17 = sshll.u32 %s427_s16, 4 }
   0xf   : > { %s6021_s12 = smul.u32 384, %s6152_s11  ;;  %s429_s20 = scalar_lea.vmem %s7893_s0, %s5535_s17 }
  0x10   : > { %v6198_v26 = vld [vmem:[%s429_s20] sm:$0xff]  ;;  %v6200_v27 = vld [vmem:[%s429_s20 + $0x8] sm:$0xff]  ;;  %s6022_s21 = smul.u32 5120, %s6152_s11  ;;  %s5598_s22 = sshll.u32 %s6152_s11, 4 }
  0x11   : > { %s6161_s15 = scalar_lea.vmem %s7895_s2, %s6021_s12  ;;  %s6315_s25 = scalar_lea.vmem %s7894_s1, %s5598_s22 }
  0x12   : > { %v437_v1 = vld [vmem:[%s6161_s15 + $0x18] sm:$0xff]  ;;  %v436_v3 = vld [vmem:[%s6161_s15 + $0x10] sm:$0xff]  ;;  %v435_v5 = vld [vmem:[%s6161_s15 + $0x8] sm:$0xff]  ;;  %s6320_s29 = scalar_lea.vmem %s7897_s4, %s6022_s21  ;;  %s5599_s30 = sshll.u32 %s6152_s11, 5 }
  0x13   : > { %v441_v2 = vld [vmem:[%s6161_s15 + $0x38] sm:$0xff]  ;;  %5739 = vmatprep.subr.mxu0 %v437_v1  ;;  %v440_v4 = vld [vmem:[%s6161_s15 + $0x30] sm:$0xff]  ;;  %v439_v6 = vld [vmem:[%s6161_s15 + $0x28] sm:$0xff]  ;;  %s7783_s13 = scalar_lea.vmem %s7896_s3, %s5599_s30  ;;  %s408_s16 = scalar_lea.vmem %s7898_s5, %s5599_s30 }
  0x14   : > { %5750 = vmatprep.subr.mxu1 %v441_v2  ;;  %5740 = vmatpush3.msra.mxu0 %v437_v1  ;;  %v434_v7 = vld [vmem:[%s6161_s15] sm:$0xff]  ;;  %v445_v10 = vld [vmem:[%s6161_s15 + $0x58] sm:$0xff]  ;;  %v444_v12 = vld [vmem:[%s6161_s15 + $0x50] sm:$0xff]  ;;  %s5601_s17 = sshll.u32 %s6152_s11, 6  ;;  %s5531_s21 = sshll.u32 %s6152_s11, 3 }
  0x15   : > { %5751 = vmatpush3.msra.mxu1 %v441_v2  ;;  %5741 = vmatprep.subr.mxu0 %v436_v3  ;;  %v438_v8 = vld [vmem:[%s6161_s15 + $0x20] sm:$0xff]  ;;  %v449_v11 = vld [vmem:[%s6161_s15 + $0x78] sm:$0xff]  ;;  %v448_v13 = vld [vmem:[%s6161_s15 + $0x70] sm:$0xff]  ;;  %s7836_s20 = scalar_lea.vmem %s7899_s6, %s5601_s17  ;;  %s422_s28 = scalar_lea.vmem %s7901_s8, %s5598_s22 }
  0x16   : > { %5752 = vmatprep.subr.mxu1 %v440_v4  ;;  %5742 = vmatpush3.msra.mxu0 %v436_v3  ;;  %v443_v14 = vld [vmem:[%s6161_s15 + $0x48] sm:$0xff]  ;;  %v442_v16 = vld [vmem:[%s6161_s15 + $0x40] sm:$0xff]  ;;  %v453_v18 = vld [vmem:[%s6161_s15 + $0x98] sm:$0xff] }
  0x17   : > { %5753 = vmatpush3.msra.mxu1 %v440_v4  ;;  %5743 = vmatprep.subr.mxu0 %v435_v5  ;;  %v447_v15 = vld [vmem:[%s6161_s15 + $0x68] sm:$0xff]  ;;  %v446_v17 = vld [vmem:[%s6161_s15 + $0x60] sm:$0xff]  ;;  %v457_v19 = vld [vmem:[%s6161_s15 + $0xb8] sm:$0xff] }
  0x18   : > { %5754 = vmatprep.subr.mxu1 %v439_v6  ;;  %5744 = vmatpush3.msra.mxu0 %v435_v5  ;;  %v452_v20 = vld [vmem:[%s6161_s15 + $0x90] sm:$0xff]  ;;  %v451_v22 = vld [vmem:[%s6161_s15 + $0x88] sm:$0xff]  ;;  %v450_v24 = vld [vmem:[%s6161_s15 + $0x80] sm:$0xff] }
  0x19   : > { %5755 = vmatpush3.msra.mxu1 %v439_v6  ;;  %5745 = vmatprep.subr.mxu0 %v434_v7  ;;  %v456_v21 = vld [vmem:[%s6161_s15 + $0xb0] sm:$0xff]  ;;  %v455_v23 = vld [vmem:[%s6161_s15 + $0xa8] sm:$0xff]  ;;  %v454_v25 = vld [vmem:[%s6161_s15 + $0xa0] sm:$0xff] }
  0x1a   : > { %5756 = vmatprep.subr.mxu1 %v438_v8  ;;  %5746 = vmatpush3.msra.mxu0 %v434_v7  ;;  %v461_v28 = vld [vmem:[%s6161_s15 + $0xd8] sm:$0xff]  ;;  %v460_v30 = vld [vmem:[%s6161_s15 + $0xd0] sm:$0xff]  ;;  %v459_v32 = vld [vmem:[%s6161_s15 + $0xc8] sm:$0xff] }
  0x1b   : > { %5757 = vmatpush3.msra.mxu1 %v438_v8  ;;  %5748 = vmatmul.mubr.msk.f32.vlgmr.msra.gmra.mxu0 %vm482_vm0, %v426_v9  ;;  %v465_v29 = vld [vmem:[%s6161_s15 + $0xf8] sm:$0xff]  ;;  %v464_v31 = vld [vmem:[%s6161_s15 + $0xf0] sm:$0xff]  ;;  %v463_v33 = vld [vmem:[%s6161_s15 + $0xe8] sm:$0xff] }
  0x1c   : > { %5761 = vmatprep.subr.mxu0 %v445_v10  ;;  %5772 = vmatprep.subr.mxu1 %v449_v11  ;;  %v458_v34 = vld [vmem:[%s6161_s15 + $0xc0] sm:$0xff]  ;;  %v473_v36 = vld [vmem:[%s6161_s15 + $0x138] sm:$0xff]  ;;  %v472_v38 = vld [vmem:[%s6161_s15 + $0x130] sm:$0xff] }
  0x1d   : > { %5759 = vmatmul.mubr.msk.f32.vlgmr.msra.gmra.mxu1 %vm482_vm0, %v426_v9  ;;  %5762 = vmatpush3.msra.mxu0 %v445_v10  ;;  %v462_v35 = vld [vmem:[%s6161_s15 + $0xe0] sm:$0xff]  ;;  %v469_v37 = vld [vmem:[%s6161_s15 + $0x118] sm:$0xff]  ;;  %v468_v39 = vld [vmem:[%s6161_s15 + $0x110] sm:$0xff] }
  0x1e   : > { %5773 = vmatpush3.msra.mxu1 %v449_v11  ;;  %5763 = vmatprep.subr.mxu0 %v444_v12  ;;  %v471_v40 = vld [vmem:[%s6161_s15 + $0x128] sm:$0xff]  ;;  %v470_v42 = vld [vmem:[%s6161_s15 + $0x120] sm:$0xff]  ;;  %v481_v44 = vld [vmem:[%s6161_s15 + $0x178] sm:$0xff] }
  0x1f   : > { %5774 = vmatprep.subr.mxu1 %v448_v13  ;;  %5764 = vmatpush3.msra.mxu0 %v444_v12  ;;  %v467_v41 = vld [vmem:[%s6161_s15 + $0x108] sm:$0xff]  ;;  %v466_v43 = vld [vmem:[%s6161_s15 + $0x100] sm:$0xff]  ;;  %v477_v45 = vld [vmem:[%s6161_s15 + $0x158] sm:$0xff] }
  0x20   : > { %5775 = vmatpush3.msra.mxu1 %v448_v13  ;;  %5765 = vmatprep.subr.mxu0 %v443_v14  ;;  %v480_v46 = vld [vmem:[%s6161_s15 + $0x170] sm:$0xff]  ;;  %v479_v48 = vld [vmem:[%s6161_s15 + $0x168] sm:$0xff]  ;;  %v478_v50 = vld [vmem:[%s6161_s15 + $0x160] sm:$0xff] }
  0x21   : > { %5776 = vmatprep.subr.mxu1 %v447_v15  ;;  %5766 = vmatpush3.msra.mxu0 %v443_v14  ;;  %v476_v47 = vld [vmem:[%s6161_s15 + $0x150] sm:$0xff]  ;;  %v475_v49 = vld [vmem:[%s6161_s15 + $0x148] sm:$0xff]  ;;  %v474_v51 = vld [vmem:[%s6161_s15 + $0x140] sm:$0xff] }
  0x22   : > { %5777 = vmatpush3.msra.mxu1 %v447_v15  ;;  %5767 = vmatprep.subr.mxu0 %v442_v16  ;;  %v2140_v10 = vld [vmem:[%s6320_s29 + $0x400] sm:$0xff]  ;;  %v2141_v11 = vld [vmem:[%s6320_s29 + $0x408] sm:$0xff]  ;;  %v2142_v12 = vld [vmem:[%s6320_s29 + $0x410] sm:$0xff] }
  0x23   : > { %5778 = vmatprep.subr.mxu1 %v446_v17  ;;  %5768 = vmatpush3.msra.mxu0 %v442_v16  ;;  %v2143_v13 = vld [vmem:[%s6320_s29 + $0x418] sm:$0xff]  ;;  %v2144_v14 = vld [vmem:[%s6320_s29 + $0x420] sm:$0xff]  ;;  %v2145_v15 = vld [vmem:[%s6320_s29 + $0x428] sm:$0xff] }
  0x24   : > { %5769 = vmatprep.mubr.msk.f32.mxu0 %vm482_vm0, %v425_v0  ;;  %5779 = vmatpush3.msra.mxu1 %v446_v17  ;;  %v2146_v16 = vld [vmem:[%s6320_s29 + $0x430] sm:$0xff]  ;;  %v2147_v17 = vld [vmem:[%s6320_s29 + $0x438] sm:$0xff] }
  0x25   : > { %5770 = vmatmul.mubr.msk.f32.vlgmr.msra.gmra.mxu0 %vm482_vm0, %v426_v9  ;;  %5780 = vmatprep.mubr.msk.f32.mxu1 %vm482_vm0, %v425_v0 }
  0x26   : > { %5783 = vmatprep.subr.mxu0 %v453_v18  ;;  %5794 = vmatprep.subr.mxu1 %v457_v19 }
  0x27   : > { %5781 = vmatmul.mubr.msk.f32.vlgmr.msra.gmra.mxu1 %vm482_vm0, %v426_v9  ;;  %5784 = vmatpush3.msra.mxu0 %v453_v18  ;;  %v6325_v9 = vld [vmem:[%s6315_s25] sm:$0xff] }
  0x28   : > { %5795 = vmatpush3.msra.mxu1 %v457_v19  ;;  %5785 = vmatprep.subr.mxu0 %v452_v20  ;;  %v2148_v18 = vld [vmem:[%s6320_s29 + $0x440] sm:$0xff] }
  0x29   : > { %5796 = vmatprep.subr.mxu1 %v456_v21  ;;  %5786 = vmatpush3.msra.mxu0 %v452_v20  ;;  %v2149_v20 = vld [vmem:[%s6320_s29 + $0x448] sm:$0xff] }
  0x2a   : > { %5797 = vmatpush3.msra.mxu1 %v456_v21  ;;  %5787 = vmatprep.subr.mxu0 %v451_v22  ;;  %v2150_v21 = vld [vmem:[%s6320_s29 + $0x450] sm:$0xff] }
  0x2b   : > { %5798 = vmatprep.subr.mxu1 %v455_v23  ;;  %5788 = vmatpush3.msra.mxu0 %v451_v22  ;;  %v2151_v22 = vld [vmem:[%s6320_s29 + $0x458] sm:$0xff] }
  0x2c   : > { %5799 = vmatpush3.msra.mxu1 %v455_v23  ;;  %5789 = vmatprep.subr.mxu0 %v450_v24  ;;  %v2152_v23 = vld [vmem:[%s6320_s29 + $0x460] sm:$0xff] }
  0x2d   : > { %5800 = vmatprep.subr.mxu1 %v454_v25  ;;  %5790 = vmatpush3.msra.mxu0 %v450_v24  ;;  %v2153_v24 = vld [vmem:[%s6320_s29 + $0x468] sm:$0xff] }
  0x2e   : > { %5791 = vmatprep.mubr.msk.f32.mxu0 %vm482_vm0, %v6198_v26  ;;  %5801 = vmatpush3.msra.mxu1 %v454_v25  ;;  %v2154_v25 = vld [vmem:[%s6320_s29 + $0x470] sm:$0xff] }
  0x2f   : > { %5802 = vmatprep.mubr.msk.f32.mxu1 %vm482_vm0, %v6198_v26  ;;  %5792 = vmatmul.mubr.msk.f32.vlgmr.msra.gmra.mxu0 %vm482_vm0, %v6200_v27 }
  0x30   : > { %5803 = vmatmul.mubr.msk.f32.vlgmr.msra.gmra.mxu1 %vm482_vm0, %v6200_v27  ;;  %5805 = vmatprep.subr.mxu0 %v461_v28 }
  0x31   : > { %5816 = vmatprep.subr.mxu1 %v465_v29  ;;  %5806 = vmatpush3.msra.mxu0 %v461_v28  ;;  %v6347_v28 = vmul.f32 %v2140_v10, %v6325_v9 }
  0x32   : > { %5817 = vmatpush3.msra.mxu1 %v465_v29  ;;  %5807 = vmatprep.subr.mxu0 %v460_v30  ;;  %v2157_v29 = vld [vmem:[%s6320_s29 + $0x488] sm:$0xff] }
  0x33   : > { %5818 = vmatprep.subr.mxu1 %v464_v31  ;;  %5808 = vmatpush3.msra.mxu0 %v460_v30  ;;  %v2158_v30 = vld [vmem:[%s6320_s29 + $0x490] sm:$0xff] }
  0x34   : > { %5813 = vmatprep.mubr.msk.f32.mxu0 %vm482_vm0, %v6198_v26  ;;  %5809 = vmatprep.subr.mxu0 %v459_v32 }
  0x35   : > { %5819 = vmatpush3.msra.mxu1 %v464_v31  ;;  %5810 = vmatpush3.msra.mxu0 %v459_v32  ;;  %v2159_v31 = vld [vmem:[%s6320_s29 + $0x498] sm:$0xff]  ;;  %v6353_v32 = vld [vmem:[%s6315_s25 + $0x8] sm:$0xff] }
  0x36   : > { %5820 = vmatprep.subr.mxu1 %v463_v33  ;;  %5811 = vmatprep.subr.mxu0 %v458_v34 }
  0x37   : > { %5821 = vmatpush3.msra.mxu1 %v463_v33  ;;  %5812 = vmatpush3.msra.mxu0 %v458_v34  ;;  %v6356_v33 = vmul.f32 %v2141_v11, %v6325_v9  ;;  %v6359_v34 = vmul.f32 %v2142_v12, %v6325_v9 }
  0x38   : > { %5822 = vmatprep.subr.mxu1 %v462_v35  ;;  %5814 = vmatmul.mubr.msk.f32.vlgmr.msra.gmra.mxu0 %vm482_vm0, %v6200_v27 }
  0x39   : > { %5823 = vmatpush3.msra.mxu1 %v462_v35  ;;  %5824 = vmatprep.mubr.msk.f32.mxu1 %vm482_vm0, %v6198_v26  ;;  %v6362_v35 = vmul.f32 %v2143_v13, %v6325_v9 }
  0x3a   : > { %5835 = vmatprep.mubr.msk.f32.mxu0 %vm482_vm0, %v6198_v26  ;;  %5825 = vmatmul.mubr.msk.f32.vlgmr.msra.gmra.mxu1 %vm482_vm0, %v6200_v27 }
  0x3b   : > { %5846 = vmatprep.mubr.msk.f32.mxu1 %vm482_vm0, %v6198_v26  ;;  %5838 = vmatprep.subr.mxu1 %v473_v36 }
  0x3c   : > { %5827 = vmatprep.subr.mxu0 %v469_v37  ;;  %5839 = vmatpush3.msra.mxu1 %v473_v36  ;;  %v6365_v36 = vmul.f32 %v2144_v14, %v6325_v9 }
  0x3d   : > { %5828 = vmatpush3.msra.mxu0 %v469_v37  ;;  %5840 = vmatprep.subr.mxu1 %v472_v38  ;;  %v2160_v37 = vld [vmem:[%s6320_s29 + $0x4a0] sm:$0xff] }
  0x3e   : > { %5829 = vmatprep.subr.mxu0 %v468_v39  ;;  %5841 = vmatpush3.msra.mxu1 %v472_v38  ;;  %v2161_v38 = vld [vmem:[%s6320_s29 + $0x4a8] sm:$0xff] }
  0x3f   : > { %5830 = vmatpush3.msra.mxu0 %v468_v39  ;;  %5842 = vmatprep.subr.mxu1 %v471_v40  ;;  %v2162_v39 = vld [vmem:[%s6320_s29 + $0x4b0] sm:$0xff]  ;;  %v6439_v12 = vmul.f32 %v2161_v38, %v6353_v32 }
  0x40   : > { %5831 = vmatprep.subr.mxu0 %v467_v41  ;;  %5843 = vmatpush3.msra.mxu1 %v471_v40  ;;  %v6442_v13 = vmul.f32 %v2162_v39, %v6353_v32 }
  0x41   : > { %5832 = vmatpush3.msra.mxu0 %v467_v41  ;;  %5844 = vmatprep.subr.mxu1 %v470_v42 }
  0x42   : > { %5833 = vmatprep.subr.mxu0 %v466_v43  ;;  %5845 = vmatpush3.msra.mxu1 %v470_v42  ;;  %v6375_v42 = vmul.f32 %v2145_v15, %v6325_v9 }
  0x43   : > { %5834 = vmatpush3.msra.mxu0 %v466_v43  ;;  %5847 = vmatmul.mubr.msk.f32.vlgmr.msra.gmra.mxu1 %vm482_vm0, %v6200_v27  ;;  %v6378_v43 = vmul.f32 %v2146_v16, %v6325_v9  ;;  %v2175_v16 = vld [vmem:[%s6320_s29 + $0x518] sm:$0xff] }
  0x44   : > { %5836 = vmatmul.mubr.msk.f32.vlgmr.msra.gmra.mxu0 %vm482_vm0, %v6200_v27  ;;  %5860 = vmatprep.subr.mxu1 %v481_v44 }
  0x45   : > { %5849 = vmatprep.subr.mxu0 %v477_v45  ;;  %5861 = vmatpush3.msra.mxu1 %v481_v44  ;;  %v6381_v44 = vmul.f32 %v2147_v17, %v6325_v9  ;;  %v2176_v17 = vld [vmem:[%s6320_s29 + $0x520] sm:$0xff] }
  0x46   : > { %5850 = vmatpush3.msra.mxu0 %v477_v45  ;;  %5862 = vmatprep.subr.mxu1 %v480_v46  ;;  %v6384_v45 = vmul.f32 %v2148_v18, %v6325_v9  ;;  %v2177_v18 = vld [vmem:[%s6320_s29 + $0x528] sm:$0xff] }
  0x47   : > { %5851 = vmatprep.subr.mxu0 %v476_v47  ;;  %5863 = vmatpush3.msra.mxu1 %v480_v46  ;;  %v2163_v46 = vld [vmem:[%s6320_s29 + $0x4b8] sm:$0xff] }
  0x48   : > { %5852 = vmatpush3.msra.mxu0 %v476_v47  ;;  %5864 = vmatprep.subr.mxu1 %v479_v48  ;;  %v2164_v47 = vld [vmem:[%s6320_s29 + $0x4c0] sm:$0xff]  ;;  %v6445_v14 = vmul.f32 %v2163_v46, %v6353_v32  ;;  %v2181_v46 = vld [vmem:[%s6320_s29 + $0x548] sm:$0xff] }
  0x49   : > { %5853 = vmatprep.subr.mxu0 %v475_v49  ;;  %5865 = vmatpush3.msra.mxu1 %v479_v48  ;;  %v2165_v48 = vld [vmem:[%s6320_s29 + $0x4c8] sm:$0xff]  ;;  %v6448_v15 = vmul.f32 %v2164_v47, %v6353_v32  ;;  %v2182_v47 = vld [vmem:[%s6320_s29 + $0x550] sm:$0xff] }
  0x4a   : > { %5854 = vmatpush3.msra.mxu0 %v475_v49  ;;  %5866 = vmatprep.subr.mxu1 %v478_v50  ;;  %v6390_v49 = vmul.f32 %v2149_v20, %v6325_v9  ;;  %v2012_v20 = vld [vmem:[%s6320_s29] sm:$0xff] }
  0x4b   : > { %5855 = vmatprep.subr.mxu0 %v474_v51  ;;  %5867 = vmatpush3.msra.mxu1 %v478_v50  ;;  %v6393_v50 = vmul.f32 %v2150_v21, %v6325_v9  ;;  %v2013_v21 = vld [vmem:[%s6320_s29 + $0x8] sm:$0xff] }
  0x4c   : > { %5868 = vmatprep.mubr.msk.f32.mxu1 %vm482_vm0, %v6198_v26  ;;  %5856 = vmatpush3.msra.mxu0 %v474_v51  ;;  %v6396_v51 = vmul.f32 %v2151_v22, %v6325_v9  ;;  %v6456_v22 = vmul.f32 %v2165_v48, %v6353_v32  ;;  %v2183_v48 = vld [vmem:[%s6320_s29 + $0x558] sm:$0xff] }
  0x4d   : > { %5857 = vmatprep.mubr.msk.f32.mxu0 %vm482_vm0, %v6198_v26  ;;  %5869 = vmatmul.mubr.msk.f32.vlgmr.msra.gmra.mxu1 %vm482_vm0, %v6200_v27  ;;  %v2155_v26 = vld [vmem:[%s6320_s29 + $0x478] sm:$0xff] }
  0x4e   : > { %5858 = vmatmul.mubr.msk.f32.vlgmr.msra.gmra.mxu0 %vm482_vm0, %v6200_v27  ;;  %5886 = vmatprep.subr.mxu1 %v7902_v52  ;;  %v2156_v27 = vld [vmem:[%s6320_s29 + $0x480] sm:$0xff] }
  0x4f   : > { %5871 = vmatprep.subr.mxu0 %v7902_v52  ;;  %5888 = vmatprep.mubr.msk.f32.mxu1 %vm6088_vm1, %v7902_v52 }
  0x50   : > { %5873 = vmatprep.mubr.msk.f32.mxu0 %vm6088_vm1, %v7902_v52 }
  0xdb   : > { %v5749_v54 = vpop.f32.mrf.mxu0 }
  0xdd   : > { %v5760_v53 = vpop.f32.mrf.mxu1  ;;  %v555_v56 = vpop.f32.mrf.mxu0 }
  0xdf   : > { %v630_v55 = vpop.f32.mrf.mxu1 }
  0xe5   : > { %v5771_v58 = vpop.f32.mrf.mxu0 }
  0xe7   : > { %v5782_v57 = vpop.f32.mrf.mxu1  ;;  %v705_v60 = vpop.f32.mrf.mxu0 }
  0xe9   : > { %v780_v59 = vpop.f32.mrf.mxu1 }
  0xef   : > { %v5793_v61 = vpop.f32.mrf.mxu0 }
  0xf0   : > { %v5804_v62 = vpop.f32.mrf.mxu1 }
  0xf1   : > { %5887 = vmatpush3.xpose.msk.msra.mxu1 %vm1395_vm2, %v5804_v62  ;;  %v861_v63 = vpop.f32.mrf.mxu0  ;;  %v2171_v62 = vld [vmem:[%s6320_s29 + $0x4f8] sm:$0xff] }
  0xf2   : > { %5896 = vmatprep.subr.mxu1 %v7902_v52  ;;  %5872 = vmatpush3.xpose.msk.msra.mxu0 %vm1395_vm2, %v861_v63  ;;  %v936_v0 = vpop.f32.mrf.mxu1  ;;  %v6417_v63 = vmul.f32 %v2156_v27, %v6353_v32  ;;  %v2179_v27 = vld [vmem:[%s6320_s29 + $0x538] sm:$0xff]  ;;  %v6477_v39 = vmul.f32 %v2171_v62, %v6353_v32 }
  0xf3   : > { %5876 = vmatprep.subr.mxu0 %v7902_v52 }
  0xf4   : > { %5889 = vmatmul.mubr.msk.f32.vlgmr.msra.gmra.mxu1 %vm1395_vm2, %v5760_v53  ;;  %v6399_v53 = vmul.f32 %v2152_v23, %v6325_v9 }
  0xf5   : > { %5898 = vmatprep.mubr.msk.f32.mxu1 %vm6088_vm1, %v7902_v52  ;;  %5874 = vmatmul.mubr.msk.f32.vlgmr.msra.gmra.mxu0 %vm1395_vm2, %v555_v56  ;;  %v2168_v56 = vld [vmem:[%s6320_s29 + $0x4e0] sm:$0xff] }
  0xf6   : > { %5877 = vmatpush3.xpose.msk.msra.mxu0 %vm1395_vm2, %v5793_v61  ;;  %5878 = vmatprep.mubr.msk.f32.mxu0 %vm6088_vm1, %v7902_v52  ;;  %v2170_v61 = vld [vmem:[%s6320_s29 + $0x4f0] sm:$0xff] }
  0xf7   : > { %5881 = vmatprep.subr.mxu0 %v7902_v52  ;;  %v6474_v38 = vmul.f32 %v2170_v61, %v6353_v32 }
  0xf8   : > { %v5815_v1 = vpop.f32.mrf.mxu0 }
  0xf9   : > { %5897 = vmatpush3.xpose.msk.msra.mxu1 %vm1395_vm2, %v5815_v1  ;;  %5879 = vmatmul.mubr.msk.f32.vlgmr.msra.gmra.mxu0 %vm1395_vm2, %v5749_v54  ;;  %v2166_v54 = vld [vmem:[%s6320_s29 + $0x4d0] sm:$0xff]  ;;  %v6423_v1 = vmul.f32 %v2158_v30, %v6353_v32 }
  0xfa   : > { %5882 = vmatpush3.xpose.msk.msra.mxu0 %vm1395_vm2, %v936_v0  ;;  %v5826_v2 = vpop.f32.mrf.mxu1  ;;  %5906 = vmatprep.subr.mxu1 %v7902_v52  ;;  %v1011_v3 = vpop.f32.mrf.mxu0  ;;  %v6420_v0 = vmul.f32 %v2157_v29, %v6353_v32  ;;  %v6459_v23 = vmul.f32 %v2166_v54, %v6353_v32  ;;  %v2180_v29 = vld [vmem:[%s6320_s29 + $0x540] sm:$0xff] }
  0xfb   : > { %5883 = vmatprep.mubr.msk.f32.mxu0 %vm6088_vm1, %v7902_v52  ;;  %5891 = vmatprep.subr.mxu0 %v7902_v52 }
  0xfc   : > { %5899 = vmatmul.mubr.msk.f32.vlgmr.msra.gmra.mxu1 %vm1395_vm2, %v5771_v58  ;;  %v1086_v4 = vpop.f32.mrf.mxu1  ;;  %v6408_v58 = vmul.f32 %v2154_v25, %v6325_v9  ;;  %v6465_v25 = vmul.f32 %v2168_v56, %v6353_v32  ;;  %v2014_v56 = vld [vmem:[%s6320_s29 + $0x10] sm:$0xff] }
  0xfd   : > { %5907 = vmatpush3.xpose.msk.msra.mxu1 %vm1395_vm2, %v5826_v2  ;;  %5884 = vmatmul.mubr.msk.f32.vlgmr.msra.gmra.mxu0 %vm1395_vm2, %v630_v55  ;;  %v2167_v55 = vld [vmem:[%s6320_s29 + $0x4d8] sm:$0xff]  ;;  %v6426_v2 = vmul.f32 %v2159_v31, %v6353_v32 }
  0xfe   : > { %5892 = vmatpush3.xpose.msk.msra.mxu0 %vm1395_vm2, %v1011_v3  ;;  %5908 = vmatprep.mubr.msk.f32.mxu1 %vm6088_vm1, %v7902_v52  ;;  %v6429_v3 = vmul.f32 %v2160_v37, %v6353_v32 }
  0xff   : > { %5893 = vmatprep.mubr.msk.f32.mxu0 %vm6088_vm1, %v7902_v52  ;;  %5901 = vmatprep.subr.mxu0 %v7902_v52 }
 0x100   : > { %5909 = vmatmul.mubr.msk.f32.vlgmr.msra.gmra.mxu1 %vm1395_vm2, %v5782_v57  ;;  %5916 = vmatprep.subr.mxu1 %v7902_v52  ;;  %v6405_v57 = vmul.f32 %v2153_v24, %v6325_v9  ;;  %v6462_v24 = vmul.f32 %v2167_v55, %v6353_v32 }
 0x101   : > { %5894 = vmatmul.mubr.msk.f32.vlgmr.msra.gmra.mxu0 %vm1395_vm2, %v705_v60  ;;  %5918 = vmatprep.mubr.msk.f32.mxu1 %vm6088_vm1, %v7902_v52  ;;  %v2169_v60 = vld [vmem:[%s6320_s29 + $0x4e8] sm:$0xff] }
 0x102   : > { %5902 = vmatpush3.xpose.msk.msra.mxu0 %vm1395_vm2, %v1086_v4  ;;  %5903 = vmatprep.mubr.msk.f32.mxu0 %vm6088_vm1, %v7902_v52  ;;  %v2172_v4 = vld [vmem:[%s6320_s29 + $0x500] sm:$0xff]  ;;  %v6471_v37 = vmul.f32 %v2169_v60, %v6353_v32 }
 0x103   : > { %5911 = vmatprep.subr.mxu0 %v7902_v52  ;;  %v6307_v7 = vpop.f32.mrf.mxu1  ;;  %v6483_v54 = vmul.f32 %v2172_v4, %v6325_v9  ;;  %v2184_v60 = vld [vmem:[%s6320_s29 + $0x560] sm:$0xff] }
 0x104   : > { %v5837_v5 = vpop.f32.mrf.mxu0  ;;  %7904 = vst [vmem:[#allocation2_spill] sm:$0xff] %v6307_v7  ;;  %v2015_v7 = vld [vmem:[%s6320_s29 + $0x18] sm:$0xff] }
 0x105   : > { %5904 = vmatmul.mubr.msk.f32.vlgmr.msra.gmra.mxu0 %vm1395_vm2, %v780_v59  ;;  %5917 = vmatpush3.msra.mxu1 %v5837_v5  ;;  %v6322_v8 = vpop.f32.mrf.mxu1  ;;  %v6411_v59 = vmul.f32 %v2155_v26, %v6325_v9  ;;  %v2173_v5 = vld [vmem:[%s6320_s29 + $0x508] sm:$0xff]  ;;  %v2178_v26 = vld [vmem:[%s6320_s29 + $0x530] sm:$0xff]  ;;  %7910 = vst [vmem:[#allocation8_spill] sm:$0xff] %v6483_v54  ;;  %v2271_v54 = vld [vmem:[%s6320_s29 + $0x818] sm:$0xff] }
 0x106   : > { %5913 = vmatprep.mubr.msk.f32.mxu0 %vm6088_vm1, %v7902_v52  ;;  %v1161_v6 = vpop.f32.mrf.mxu0  ;;  %5926 = vmatprep.subr.mxu1 %v7902_v52  ;;  %7905 = vst [vmem:[#allocation3_spill] sm:$0xff] %v6322_v8  ;;  %v6492_v61 = vmul.f32 %v2173_v5, %v6325_v9  ;;  %v6508_v5 = vmul.f32 %v2178_v26, %v6325_v9  ;;  %v2191_v8 = vld [vmem:[%s6320_s29 + $0x598] sm:$0xff] }
 0x107   : > { %5912 = vmatpush3.msra.mxu0 %v1161_v6  ;;  %v2174_v6 = vld [vmem:[%s6320_s29 + $0x510] sm:$0xff]  ;;  %v6526_v26 = vmul.f32 %v2183_v48, %v6325_v9  ;;  %v2193_v48 = vld [vmem:[%s6320_s29 + $0x5a8] sm:$0xff] }
 0x108   : > { %5921 = vmatprep.subr.mxu0 %v7902_v52  ;;  %v2186_v52 = vld [vmem:[%s6320_s29 + $0x570] sm:$0xff]  ;;  %7911 = vst [vmem:[#allocation9_spill] sm:$0xff] %v6492_v61  ;;  %v6495_v62 = vmul.f32 %v2174_v6, %v6325_v9  ;;  %7916 = vst [vmem:[#allocation14_spill] sm:$0xff] %v6508_v5  ;;  %v2188_v6 = vld [vmem:[%s6320_s29 + $0x580] sm:$0xff] }
 0x109   : > { %7921 = vst [vmem:[#allocation19_spill] sm:$0xff] %v6526_v26  ;;  %v2194_v26 = vld [vmem:[%s6320_s29 + $0x5b0] sm:$0xff]  ;;  %v2269_v61 = vld [vmem:[%s6320_s29 + $0x808] sm:$0xff] }
 0x10a   : > { %7912 = vst [vmem:[#allocation10_spill] sm:$0xff] %v6495_v62  ;;  %v2061_v62 = vld [vmem:[%s6320_s29 + $0x188] sm:$0xff] }
 0x10d   : > { %v6336_v19 = vpop.f32.mrf.mxu1 }
 0x10e   : > { %7906 = vst [vmem:[#allocation4_spill] sm:$0xff] %v6336_v19  ;;  %v6370_v40 = vpop.f32.mrf.mxu0  ;;  %v6498_v19 = vmul.f32 %v2175_v16, %v6325_v9  ;;  %v2189_v16 = vld [vmem:[%s6320_s29 + $0x588] sm:$0xff] }
 0x10f   : > { %7907 = vst [vmem:[#allocation5_spill] sm:$0xff] %v6370_v40  ;;  %v6372_v41 = vpop.f32.mrf.mxu1  ;;  %v6505_v40 = vmul.f32 %v2177_v18, %v6325_v9  ;;  %v6523_v18 = vmul.f32 %v2182_v47, %v6325_v9 }
 0x110   : > { %7908 = vst [vmem:[#allocation6_spill] sm:$0xff] %v6372_v41  ;;  %v6434_v10 = vpop.f32.mrf.mxu0  ;;  %7913 = vst [vmem:[#allocation11_spill] sm:$0xff] %v6498_v19  ;;  %v6502_v41 = vmul.f32 %v2176_v17, %v6325_v9  ;;  %v6520_v17 = vmul.f32 %v2181_v46, %v6325_v9  ;;  %v6536_v46 = vmul.f32 %v2184_v60, %v6325_v9  ;;  %v2197_v60 = vld [vmem:[%s6320_s29 + $0x5c8] sm:$0xff]  ;;  %v2200_v19 = vld [vmem:[%s6320_s29 + $0x5e0] sm:$0xff] }
 0x111   : > { %7909 = vst [vmem:[#allocation7_spill] sm:$0xff] %v6434_v10  ;;  %7915 = vst [vmem:[#allocation13_spill] sm:$0xff] %v6505_v40  ;;  %v6511_v10 = vmul.f32 %v2179_v27, %v6325_v9  ;;  %v2190_v27 = vld [vmem:[%s6320_s29 + $0x590] sm:$0xff] }
 0x112   : > { %7914 = vst [vmem:[#allocation12_spill] sm:$0xff] %v6502_v41  ;;  %7919 = vst [vmem:[#allocation17_spill] sm:$0xff] %v6520_v17  ;;  %v2016_v17 = vld [vmem:[%s6320_s29 + $0x20] sm:$0xff] }
 0x113   : > { %7917 = vst [vmem:[#allocation15_spill] sm:$0xff] %v6511_v10  ;;  %7920 = vst [vmem:[#allocation18_spill] sm:$0xff] %v6523_v18  ;;  %v2192_v10 = vld [vmem:[%s6320_s29 + $0x5a0] sm:$0xff]  ;;  %v2195_v18 = vld [vmem:[%s6320_s29 + $0x5b8] sm:$0xff] }
 0x114   : > { %7922 = vst [vmem:[#allocation20_spill] sm:$0xff] %v6536_v46  ;;  %v6554_v46 = vmul.f32 %v2188_v6, %v6353_v32  ;;  %v6570_v6 = vmul.f32 %v2192_v10, %v6353_v32  ;;  %v6585_v10 = vmul.f32 %v2194_v26, %v6353_v32 }
 0x116   : > { %7926 = vst [vmem:[#allocation24_spill] sm:$0xff] %v6554_v46  ;;  %7930 = vst [vmem:[#allocation28_spill] sm:$0xff] %v6570_v6  ;;  %v2201_v46 = vld [vmem:[%s6320_s29 + $0x5e8] sm:$0xff]  ;;  %v6588_v6 = vmul.f32 %v2195_v18, %v6353_v32 }
 0x117   : > { %7933 = vst [vmem:[#allocation31_spill] sm:$0xff] %v6585_v10  ;;  %v2268_v10 = vld [vmem:[%s6320_s29 + $0x800] sm:$0xff] }
 0x118   : > { %7934 = vst [vmem:[#allocation32_spill] sm:$0xff] %v6588_v6  ;;  %v2019_v6 = vld [vmem:[%s6320_s29 + $0x38] sm:$0xff] }
 0x1b4   : > { %v6436_v11 = vpop.f32.mrf.mxu1 }
 0x1b5   : > { %v1468_v30 = vpop.f32.mrf.mxu0 }
 0x1b6   : > { %v5890_v31 = vpop.f32.mrf.mxu1  ;;  %v6485_v55 = vmul.f32 0.35355338, %v1468_v30  ;;  %v2187_v30 = vld [vmem:[%s6320_s29 + $0x578] sm:$0xff] }
 0x1b7   : > { %v2185_v31 = vld [vmem:[%s6320_s29 + $0x568] sm:$0xff]  ;;  %v5875_v4 = vpop.f32.mrf.mxu0 }
 0x1b8   : > { %v6517_v4 = vmul.f32 %v2180_v29, %v6325_v9  ;;  %v2652_v40 = vmul.f32 %v2012_v20, %v6485_v55  ;;  %v2653_v29 = vmul.f32 %v2013_v21, %v6485_v55  ;;  %v6539_v47 = vmul.f32 %v2185_v31, %v6325_v9  ;;  %v2196_v21 = vld [vmem:[%s6320_s29 + $0x5c0] sm:$0xff] }
 0x1b9   : > { %v6531_v5 = vpop.f32.mrf.mxu0  ;;  %v6549_v20 = vmul.f32 %v2187_v30, %v6325_v9  ;;  %v6557_v31 = vmul.f32 %v2189_v16, %v6353_v32  ;;  %v2654_v41 = vmul.f32 %v2014_v56, %v6485_v55  ;;  %v6567_v30 = vmul.f32 %v2191_v8, %v6353_v32 }
 0x1ba   : > { %7918 = vst [vmem:[#allocation16_spill] sm:$0xff] %v6517_v4  ;;  %7923 = vst [vmem:[#allocation21_spill] sm:$0xff] %v6539_v47  ;;  %v6546_v4 = vmul.f32 %v2186_v52, %v6325_v9  ;;  %v2198_v52 = vld [vmem:[%s6320_s29 + $0x5d0] sm:$0xff]  ;;  %v6564_v9 = vmul.f32 %v2190_v27, %v6353_v32  ;;  %v6573_v16 = vmul.f32 0.35355338, %v6436_v11  ;;  %v6582_v8 = vmul.f32 %v2193_v48, %v6353_v32 }
 0x1bb   : > { %7925 = vst [vmem:[#allocation23_spill] sm:$0xff] %v6549_v20  ;;  %7927 = vst [vmem:[#allocation25_spill] sm:$0xff] %v6557_v31  ;;  %v5880_v47 = vpop.f32.mrf.mxu0  ;;  %v2060_v31 = vld [vmem:[%s6320_s29 + $0x180] sm:$0xff]  ;;  %v2202_v27 = vld [vmem:[%s6320_s29 + $0x5f0] sm:$0xff]  ;;  %v2909_v20 = vadd.f32 %v6356_v33, %v2653_v29  ;;  %v6600_v26 = vmul.f32 %v2196_v21, %v6353_v32 }
 0x1bc   : > { %7924 = vst [vmem:[#allocation22_spill] sm:$0xff] %v6546_v4  ;;  %v2199_v4 = vld [vmem:[%s6320_s29 + $0x5d8] sm:$0xff]  ;;  %7928 = vst [vmem:[#allocation26_spill] sm:$0xff] %v6564_v9  ;;  %v6575_v56 = vpop.f32.mrf.mxu1  ;;  %v2017_v47 = vld [vmem:[%s6320_s29 + $0x28] sm:$0xff]  ;;  %v2908_v9 = vadd.f32 %v6347_v28, %v2652_v40  ;;  %v6609_v28 = vmul.f32 %v2198_v52, %v6353_v32  ;;  %v6615_v40 = vmul.f32 %v2200_v19, %v6353_v32 }
 0x1bd   : > { %7929 = vst [vmem:[#allocation27_spill] sm:$0xff] %v6567_v30  ;;  %7931 = vst [vmem:[#allocation29_spill] sm:$0xff] %v6575_v56  ;;  %v6590_v11 = vpop.f32.mrf.mxu0  ;;  %v2018_v30 = vld [vmem:[%s6320_s29 + $0x30] sm:$0xff]  ;;  %v2655_v56 = vmul.f32 %v2015_v7, %v6485_v55  ;;  %v6606_v7 = vmul.f32 %v2197_v60, %v6353_v32  ;;  %v6612_v33 = vmul.f32 %v2199_v4, %v6353_v32  ;;  %v2020_v21 = vld [vmem:[%s6320_s29 + $0x40] sm:$0xff] }
 0x1be   : > { %7932 = vst [vmem:[#allocation30_spill] sm:$0xff] %v6582_v8  ;;  %v2062_v48 = vld [vmem:[%s6320_s29 + $0x190] sm:$0xff]  ;;  %v2203_v8 = vld [vmem:[%s6320_s29 + $0x5f8] sm:$0xff]  ;;  %7935 = vst [vmem:[#allocation33_spill] sm:$0xff] %v6600_v26  ;;  %v5900_v18 = vpop.f32.mrf.mxu1  ;;  %v2656_v26 = vmul.f32 %v2016_v17, %v6485_v55  ;;  %v2910_v60 = vadd.f32 %v6359_v34, %v2654_v41  ;;  %v6623_v52 = vmul.f32 %v2201_v46, %v6353_v32 }
 0x1bf   : > { %7936 = vst [vmem:[#allocation34_spill] sm:$0xff] %v6606_v7  ;;  %7937 = vst [vmem:[#allocation35_spill] sm:$0xff] %v6609_v28  ;;  %v5885_v29 = vpop.f32.mrf.mxu0  ;;  %v2021_v18 = vld [vmem:[%s6320_s29 + $0x48] sm:$0xff]  ;;  %v2063_v7 = vld [vmem:[%s6320_s29 + $0x198] sm:$0xff]  ;;  %v6626_v4 = vmul.f32 %v2202_v27, %v6353_v32  ;;  %v6634_v28 = vmul.f32 %v2060_v31, %v6573_v16  ;;  %v6637_v17 = vmul.f32 %v2061_v62, %v6573_v16 }
 0x1c0   : > { %7938 = vst [vmem:[#allocation36_spill] sm:$0xff] %v6612_v33  ;;  %7939 = vst [vmem:[#allocation37_spill] sm:$0xff] %v6615_v40  ;;  %v6628_v33 = vpop.f32.mrf.mxu1  ;;  %v2022_v19 = vld [vmem:[%s6320_s29 + $0x50] sm:$0xff]  ;;  %v2023_v29 = vld [vmem:[%s6320_s29 + $0x58] sm:$0xff]  ;;  %v6640_v34 = vmul.f32 %v2062_v48, %v6573_v16  ;;  %v6643_v41 = vmul.f32 %v2203_v8, %v6353_v32  ;;  %v2911_v31 = vadd.f32 %v6362_v35, %v2655_v56 }
 0x1c1   : > { %7940 = vst [vmem:[#allocation38_spill] sm:$0xff] %v6623_v52  ;;  %7941 = vst [vmem:[#allocation39_spill] sm:$0xff] %v6626_v4  ;;  %v2270_v40 = vld [vmem:[%s6320_s29 + $0x810] sm:$0xff]  ;;  %v6645_v46 = vpop.f32.mrf.mxu0  ;;  %v2024_v27 = vld [vmem:[%s6320_s29 + $0x60] sm:$0xff]  ;;  %v2657_v52 = vmul.f32 %v2017_v47, %v6485_v55  ;;  %v3037_v62 = vadd.f32 %v2909_v20, %v2269_v61  ;;  %v2658_v48 = vmul.f32 %v2018_v30, %v6485_v55 }
 0x1c2   : > { %7942 = vst [vmem:[#allocation40_spill] sm:$0xff] %v6628_v33  ;;  %7943 = vst [vmem:[#allocation41_spill] sm:$0xff] %v6634_v28  ;;  %v2025_v33 = vld [vmem:[%s6320_s29 + $0x68] sm:$0xff]  ;;  %v2026_v4 = vld [vmem:[%s6320_s29 + $0x70] sm:$0xff]  ;;  %v3036_v28 = vadd.f32 %v2908_v9, %v2268_v10  ;;  %v2659_v32 = vmul.f32 %v2019_v6, %v6485_v55  ;;  %v2660_v8 = vmul.f32 %v2020_v21, %v6485_v55 }
 0x1c3   : > { %7944 = vst [vmem:[#allocation42_spill] sm:$0xff] %v6637_v17  ;;  %7945 = vst [vmem:[#allocation43_spill] sm:$0xff] %v6640_v34  ;;  %v5910_v17 = vpop.f32.mrf.mxu1  ;;  %v2027_v34 = vld [vmem:[%s6320_s29 + $0x78] sm:$0xff]  ;;  %v2661_v47 = vmul.f32 %v2021_v18, %v6485_v55  ;;  %v2662_v35 = vmul.f32 %v2022_v19, %v6485_v55  ;;  %v2912_v61 = vadd.f32 %v6365_v36, %v2656_v26  ;;  %v2272_v9 = vld [vmem:[%s6320_s29 + $0x820] sm:$0xff]  ;;  %v3165_v26 = vmax.f32 %v3037_v62, 0.0 }
 0x1c4   : > { %7946 = vst [vmem:[#allocation44_spill] sm:$0xff] %v6643_v41  ;;  %7947 = vst [vmem:[#allocation45_spill] sm:$0xff] %v6645_v46  ;;  %v6657_v46 = vmul.f32 %v2063_v7, %v6573_v16  ;;  %v5895_v41 = vpop.f32.mrf.mxu0  ;;  %v3038_v20 = vadd.f32 %v2910_v60, %v2270_v40  ;;  %v2663_v30 = vmul.f32 %v2023_v29, %v6485_v55  ;;  %v2273_v21 = vld [vmem:[%s6320_s29 + $0x828] sm:$0xff]  ;;  %v3164_v36 = vmax.f32 %v3036_v28, 0.0  ;;  %v2274_v40 = vld [vmem:[%s6320_s29 + $0x830] sm:$0xff] }
 0x1c5   : > { %v2664_v6 = vmul.f32 %v2024_v27, %v6485_v55  ;;  %v2665_v56 = vmul.f32 %v2025_v33, %v6485_v55  ;;  %v2666_v10 = vmul.f32 %v2026_v4, %v6485_v55  ;;  %v2913_v18 = vadd.f32 %v6375_v42, %v2657_v52  ;;  %v2396_v60 = vld [vmem:[%s6320_s29 + $0xc00] sm:$0xff]  ;;  %v2397_v29 = vld [vmem:[%s6320_s29 + $0xc08] sm:$0xff]  ;;  %v2275_v42 = vld [vmem:[%s6320_s29 + $0x838] sm:$0xff] }
 0x1c6   : > { %7948 = vst [vmem:[#allocation46_spill] sm:$0xff] %v6657_v46  ;;  %v6668_v7 = vpop.f32.mrf.mxu0  ;;  %v3039_v19 = vadd.f32 %v2911_v31, %v2271_v54  ;;  %v2667_v33 = vmul.f32 %v2027_v34, %v6485_v55  ;;  %v2914_v4 = vadd.f32 %v6378_v43, %v2658_v48  ;;  %v2915_v17 = vadd.f32 %v6381_v44, %v2659_v32  ;;  %v2276_v54 = vld [vmem:[%s6320_s29 + $0x840] sm:$0xff]  ;;  %v2277_v28 = vld [vmem:[%s6320_s29 + $0x848] sm:$0xff]  ;;  %v2278_v43 = vld [vmem:[%s6320_s29 + $0x850] sm:$0xff] }
 0x1c7   : > { %7949 = vst [vmem:[#allocation47_spill] sm:$0xff] %v6668_v7  ;;  %v2916_v41 = vadd.f32 %v6384_v45, %v2660_v8  ;;  %v2917_v52 = vadd.f32 %v6390_v49, %v2661_v47  ;;  %v2918_v31 = vadd.f32 %v6393_v50, %v2662_v35  ;;  %v3040_v62 = vadd.f32 %v2912_v61, %v2272_v9  ;;  %v2279_v44 = vld [vmem:[%s6320_s29 + $0x858] sm:$0xff]  ;;  %v2398_v34 = vld [vmem:[%s6320_s29 + $0xc10] sm:$0xff]  ;;  %v2280_v49 = vld [vmem:[%s6320_s29 + $0x860] sm:$0xff] }
 0x1c8   : > { %v5905_v27 = vpop.f32.mrf.mxu0  ;;  %v3166_v55 = vmax.f32 %v3038_v20, 0.0  ;;  %v2919_v45 = vadd.f32 %v6396_v51, %v2663_v30  ;;  %v2920_v48 = vadd.f32 %v6399_v53, %v2664_v6  ;;  %v2921_v32 = vadd.f32 %v6405_v57, %v2665_v56  ;;  %v2281_v47 = vld [vmem:[%s6320_s29 + $0x868] sm:$0xff]  ;;  %v2282_v50 = vld [vmem:[%s6320_s29 + $0x870] sm:$0xff]  ;;  %v2524_v7 = vld [vmem:[%s6320_s29 + $0x1000] sm:$0xff] }
 0x1c9   : > { %v2922_v8 = vadd.f32 %v6408_v58, %v2666_v10  ;;  %v3041_v35 = vadd.f32 %v2913_v18, %v2273_v21  ;;  %v3167_v61 = vmax.f32 %v3039_v19, 0.0  ;;  %v3292_v20 = vmul.f32 %v3164_v36, %v2396_v60  ;;  %v2399_v27 = vld [vmem:[%s6320_s29 + $0xc18] sm:$0xff]  ;;  %v2525_v46 = vld [vmem:[%s6320_s29 + $0x1008] sm:$0xff]  ;;  %v2400_v18 = vld [vmem:[%s6320_s29 + $0xc20] sm:$0xff] }
 0x1ca   : > { %v3293_v9 = vmul.f32 %v3165_v26, %v2397_v29  ;;  %v2923_v51 = vadd.f32 %v6411_v59, %v2667_v33  ;;  %v3042_v53 = vadd.f32 %v2914_v4, %v2274_v40  ;;  %v3043_v30 = vadd.f32 %v2915_v17, %v2275_v42  ;;  %v2283_v6 = vld [vmem:[%s6320_s29 + $0x878] sm:$0xff]  ;;  %v2526_v19 = vld [vmem:[%s6320_s29 + $0x1010] sm:$0xff]  ;;  %v2401_v17 = vld [vmem:[%s6320_s29 + $0xc28] sm:$0xff] }
 0x1cb   : > { %v3044_v57 = vadd.f32 %v2916_v41, %v2276_v54  ;;  %v3045_v58 = vadd.f32 %v2917_v52, %v2277_v28  ;;  %v3046_v56 = vadd.f32 %v2918_v31, %v2278_v43  ;;  %v3168_v10 = vmax.f32 %v3040_v62, 0.0  ;;  %v2527_v41 = vld [vmem:[%s6320_s29 + $0x1018] sm:$0xff]  ;;  %v2402_v31 = vld [vmem:[%s6320_s29 + $0xc30] sm:$0xff] }
 0x1cc   : > { %v3294_v21 = vmul.f32 %v3166_v55, %v2398_v34  ;;  %v3047_v36 = vadd.f32 %v2919_v45, %v2279_v44  ;;  %v3048_v26 = vadd.f32 %v2920_v48, %v2280_v49  ;;  %v3049_v60 = vadd.f32 %v2921_v32, %v2281_v47  ;;  %v2403_v62 = vld [vmem:[%s6320_s29 + $0xc38] sm:$0xff]  ;;  %v2404_v55 = vld [vmem:[%s6320_s29 + $0xc40] sm:$0xff]  ;;  %v2405_v45 = vld [vmem:[%s6320_s29 + $0xc48] sm:$0xff] }
 0x1cd   : > { %v3050_v29 = vadd.f32 %v2922_v8, %v2282_v50  ;;  %v3169_v59 = vmax.f32 %v3041_v35, 0.0  ;;  %v3295_v40 = vmul.f32 %v3167_v61, %v2399_v27  ;;  %v3420_v33 = vadd.f32 %v3292_v20, %v2524_v7  ;;  %v2406_v47 = vld [vmem:[%s6320_s29 + $0xc50] sm:$0xff]  ;;  %v2407_v50 = vld [vmem:[%s6320_s29 + $0xc58] sm:$0xff]  ;;  %v2408_v35 = vld [vmem:[%s6320_s29 + $0xc60] sm:$0xff] }
 0x1ce   : > { %v3421_v4 = vadd.f32 %v3293_v9, %v2525_v46  ;;  %v3051_v42 = vadd.f32 %v2923_v51, %v2283_v6  ;;  %v3170_v54 = vmax.f32 %v3042_v53, 0.0  ;;  %v3171_v28 = vmax.f32 %v3043_v30, 0.0  ;;  %v2528_v46 = vld [vmem:[%s6320_s29 + $0x1020] sm:$0xff]  ;;  %v2409_v51 = vld [vmem:[%s6320_s29 + $0xc68] sm:$0xff] }
 0x1cf   : > { %v3172_v52 = vmax.f32 %v3044_v57, 0.0  ;;  %v3173_v43 = vmax.f32 %v3045_v58, 0.0  ;;  %v3174_v44 = vmax.f32 %v3046_v56, 0.0  ;;  %v3296_v34 = vmul.f32 %v3168_v10, %v2400_v18  ;;  %v2529_v53 = vld [vmem:[%s6320_s29 + $0x1028] sm:$0xff]  ;;  %v2410_v56 = vld [vmem:[%s6320_s29 + $0xc70] sm:$0xff]  ;;  %v2411_v10 = vld [vmem:[%s6320_s29 + $0xc78] sm:$0xff] }
 0x1d0   : > { %v3422_v7 = vadd.f32 %v3294_v21, %v2526_v19  ;;  %v3175_v48 = vmax.f32 %v3047_v36, 0.0  ;;  %v3176_v32 = vmax.f32 %v3048_v26, 0.0  ;;  %v3177_v8 = vmax.f32 %v3049_v60, 0.0  ;;  %v2530_v21 = vld [vmem:[%s6320_s29 + $0x1030] sm:$0xff]  ;;  %v2531_v60 = vld [vmem:[%s6320_s29 + $0x1038] sm:$0xff] }
 0x1d1   : > { %v3178_v49 = vmax.f32 %v3050_v29, 0.0  ;;  %v3297_v61 = vmul.f32 %v3169_v59, %v2401_v17  ;;  %v3423_v20 = vadd.f32 %v3295_v40, %v2527_v41  ;;  %v3548_v9 = vsel %vm1395_vm2, %v3420_v33, 0.0  ;;  %v2532_v29 = vld [vmem:[%s6320_s29 + $0x1040] sm:$0xff]  ;;  %v2533_v59 = vld [vmem:[%s6320_s29 + $0x1048] sm:$0xff] }
 0x1d2   : > { %v3549_v27 = vsel %vm1395_vm2, %v3421_v4, 0.0  ;;  %v3179_v30 = vmax.f32 %v3051_v42, 0.0  ;;  %v3298_v57 = vmul.f32 %v3170_v54, %v2402_v31  ;;  %v3299_v6 = vmul.f32 %v3171_v28, %v2403_v62  ;;  %v2534_v42 = vld [vmem:[%s6320_s29 + $0x1050] sm:$0xff]  ;;  %v2535_v54 = vld [vmem:[%s6320_s29 + $0x1058] sm:$0xff]  ;;  %v2536_v28 = vld [vmem:[%s6320_s29 + $0x1060] sm:$0xff] }
 0x1d3   : > { %v3550_v58 = vadd.f32 %v3549_v27, %v3548_v9  ;;  %v3300_v18 = vmul.f32 %v3172_v52, %v2404_v55  ;;  %v3301_v19 = vmul.f32 %v3173_v43, %v2405_v45  ;;  %v3424_v36 = vadd.f32 %v3296_v34, %v2528_v46  ;;  %v2537_v55 = vld [vmem:[%s6320_s29 + $0x1068] sm:$0xff]  ;;  %v2028_v45 = vld [vmem:[%s6320_s29 + $0x80] sm:$0xff] }
 0x1d4   : > { %v3551_v26 = vsel %vm1395_vm2, %v3422_v7, 0.0  ;;  %v3302_v40 = vmul.f32 %v3174_v44, %v2406_v47  ;;  %v3303_v33 = vmul.f32 %v3175_v48, %v2407_v50  ;;  %v3304_v4 = vmul.f32 %v3176_v32, %v2408_v35  ;;  %v2029_v46 = vld [vmem:[%s6320_s29 + $0x88] sm:$0xff]  ;;  %v2538_v48 = vld [vmem:[%s6320_s29 + $0x1070] sm:$0xff]  ;;  %v2539_v32 = vld [vmem:[%s6320_s29 + $0x1078] sm:$0xff] }
 0x1d5   : > { %v3552_v17 = vadd.f32 %v3551_v26, %v3550_v58  ;;  %v6723_v41 = vmul.f32 0.35355338, %v6531_v5  ;;  %v3305_v52 = vmul.f32 %v3177_v8, %v2409_v51  ;;  %v3425_v31 = vadd.f32 %v3297_v61, %v2529_v53 }
 0x1d6   : > { %v3553_v62 = vsel %vm1395_vm2, %v3423_v20, 0.0  ;;  %v3306_v43 = vmul.f32 %v3178_v49, %v2410_v56  ;;  %v3307_v44 = vmul.f32 %v3179_v30, %v2411_v10  ;;  %v3426_v34 = vadd.f32 %v3298_v57, %v2530_v21  ;;  %v2030_v49 = vld [vmem:[%s6320_s29 + $0x90] sm:$0xff]  ;;  %v2031_v10 = vld [vmem:[%s6320_s29 + $0x98] sm:$0xff] }
 0x1d7   : > { %v3554_v7 = vadd.f32 %v3553_v62, %v3552_v17  ;;  %v3427_v47 = vadd.f32 %v3299_v6, %v2531_v60  ;;  %v3428_v5 = vadd.f32 %v3300_v18, %v2532_v29  ;;  %v3429_v50 = vadd.f32 %v3301_v19, %v2533_v59  ;;  %v2035_v17 = vld [vmem:[%s6320_s29 + $0xb8] sm:$0xff] }
 0x1d8   : > { %v3555_v35 = vsel %vm1395_vm2, %v3424_v36, 0.0  ;;  %v3430_v8 = vadd.f32 %v3302_v40, %v2534_v42  ;;  %v3431_v61 = vadd.f32 %v3303_v33, %v2535_v54  ;;  %v3432_v20 = vadd.f32 %v3304_v4, %v2536_v28  ;;  %v2032_v36 = vld [vmem:[%s6320_s29 + $0xa0] sm:$0xff]  ;;  %v2033_v33 = vld [vmem:[%s6320_s29 + $0xa8] sm:$0xff]  ;;  %v2034_v4 = vld [vmem:[%s6320_s29 + $0xb0] sm:$0xff] }
 0x1d9   : > { %v3556_v9 = vadd.f32 %v3555_v35, %v3554_v7  ;;  %v3433_v27 = vadd.f32 %v3305_v52, %v2537_v55  ;;  %v3557_v51 = vsel %vm1395_vm2, %v3425_v31, 0.0  ;;  %v2668_v53 = vmul.f32 %v2028_v45, %v6723_v41  ;;  %v2036_v54 = vld [vmem:[%s6320_s29 + $0xc0] sm:$0xff]  ;;  %v2037_v28 = vld [vmem:[%s6320_s29 + $0xc8] sm:$0xff]  ;;  %v2038_v52 = vld [vmem:[%s6320_s29 + $0xd0] sm:$0xff] }
 0x1da   : > { %v2669_v30 = vmul.f32 %v2029_v46, %v6723_v41  ;;  %v3434_v57 = vadd.f32 %v3306_v43, %v2538_v48  ;;  %v3435_v6 = vadd.f32 %v3307_v44, %v2539_v32  ;;  %v3559_v56 = vsel %vm1395_vm2, %v3426_v34, 0.0  ;;  %v2039_v7 = vld [vmem:[%s6320_s29 + $0xd8] sm:$0xff]  ;;  %v2284_v45 = vld [vmem:[%s6320_s29 + $0x880] sm:$0xff]  ;;  %v2285_v46 = vld [vmem:[%s6320_s29 + $0x888] sm:$0xff] }
 0x1db   : > { %v3558_v58 = vadd.f32 %v3557_v51, %v3556_v9  ;;  %v3561_v21 = vsel %vm1395_vm2, %v3427_v47, 0.0  ;;  %v3563_v18 = vsel %vm1395_vm2, %v3428_v5, 0.0  ;;  %v3565_v19 = vsel %vm1395_vm2, %v3429_v50, 0.0  ;;  %v2040_v32 = vld [vmem:[%s6320_s29 + $0xe0] sm:$0xff]  ;;  %v2041_v47 = vld [vmem:[%s6320_s29 + $0xe8] sm:$0xff]  ;;  %v2042_v5 = vld [vmem:[%s6320_s29 + $0xf0] sm:$0xff] }
 0x1dc   : > { %v2670_v26 = vmul.f32 %v2030_v49, %v6723_v41  ;;  %v3567_v29 = vsel %vm1395_vm2, %v3430_v8, 0.0  ;;  %v3569_v59 = vsel %vm1395_vm2, %v3431_v61, 0.0  ;;  %v6749_v40 = vsel %vm1395_vm2, %v3432_v20, 0.0  ;;  %v2043_v61 = vld [vmem:[%s6320_s29 + $0xf8] sm:$0xff]  ;;  %v2286_v20 = vld [vmem:[%s6320_s29 + $0x890] sm:$0xff] }
 0x1dd   : > { %v3560_v60 = vadd.f32 %v3559_v56, %v3558_v58  ;;  %v6755_v42 = vsel %vm1395_vm2, %v3433_v27, 0.0  ;;  %v2671_v31 = vmul.f32 %v2031_v10, %v6723_v41  ;;  %v2924_v62 = vadd.f32 %v6417_v63, %v2668_v53 }
 0x1de   : > { %v2925_v55 = vadd.f32 %v6420_v0, %v2669_v30  ;;  %v6764_v44 = vsel %vm1395_vm2, %v3434_v57, 0.0  ;;  %v6767_v34 = vsel %vm1395_vm2, %v3435_v6, 0.0  ;;  %v2672_v48 = vmul.f32 %v2032_v36, %v6723_v41 }
 0x1df   : > { %v3562_v43 = vadd.f32 %v3561_v21, %v3560_v60  ;;  %v2673_v63 = vmul.f32 %v2033_v33, %v6723_v41  ;;  %v2674_v0 = vmul.f32 %v2034_v4, %v6723_v41  ;;  %v2675_v50 = vmul.f32 %v2035_v17, %v6723_v41  ;;  %v2288_v60 = vld [vmem:[%s6320_s29 + $0x8a0] sm:$0xff]  ;;  %v2290_v17 = vld [vmem:[%s6320_s29 + $0x8b0] sm:$0xff] }
 0x1e0   : > { %v2926_v35 = vadd.f32 %v6423_v1, %v2670_v26  ;;  %v2676_v9 = vmul.f32 %v2036_v54, %v6723_v41  ;;  %v2677_v49 = vmul.f32 %v2037_v28, %v6723_v41  ;;  %v2678_v27 = vmul.f32 %v2038_v52, %v6723_v41  ;;  %v2287_v1 = vld [vmem:[%s6320_s29 + $0x898] sm:$0xff] }
 0x1e1   : > { %v3564_v8 = vadd.f32 %v3563_v18, %v3562_v43  ;;  %v2679_v51 = vmul.f32 %v2039_v7, %v6723_v41  ;;  %v2927_v53 = vadd.f32 %v6426_v2, %v2671_v31  ;;  %v3052_v30 = vadd.f32 %v2924_v62, %v2284_v45  ;;  %v2413_v31 = vld [vmem:[%s6320_s29 + $0xc88] sm:$0xff]  ;;  %v2294_v43 = vld [vmem:[%s6320_s29 + $0x8d0] sm:$0xff] }
 0x1e2   : > { %v3053_v57 = vadd.f32 %v2925_v55, %v2285_v46  ;;  %v2680_v58 = vmul.f32 %v2040_v32, %v6723_v41  ;;  %v2681_v56 = vmul.f32 %v2041_v47, %v6723_v41  ;;  %v2682_v10 = vmul.f32 %v2042_v5, %v6723_v41  ;;  %v2292_v55 = vld [vmem:[%s6320_s29 + $0x8c0] sm:$0xff]  ;;  %v2414_v32 = vld [vmem:[%s6320_s29 + $0xc90] sm:$0xff] }
 0x1e3   : > { %v3566_v6 = vadd.f32 %v3565_v19, %v3564_v8  ;;  %v2683_v21 = vmul.f32 %v2043_v61, %v6723_v41  ;;  %v2928_v18 = vadd.f32 %v6429_v3, %v2672_v48  ;;  %v2929_v2 = vadd.f32 %v6439_v12, %v2673_v63  ;;  %v2289_v41 = vld [vmem:[%s6320_s29 + $0x8a8] sm:$0xff]  ;;  %v2415_v61 = vld [vmem:[%s6320_s29 + $0xc98] sm:$0xff] }
 0x1e4   : > { %v3054_v36 = vadd.f32 %v2926_v35, %v2286_v20  ;;  %v2930_v19 = vadd.f32 %v6442_v13, %v2674_v0  ;;  %v2931_v33 = vadd.f32 %v6445_v14, %v2675_v50  ;;  %v2932_v4 = vadd.f32 %v6448_v15, %v2676_v9  ;;  %v2412_v13 = vld [vmem:[%s6320_s29 + $0xc80] sm:$0xff]  ;;  %v2297_v63 = vld [vmem:[%s6320_s29 + $0x8e8] sm:$0xff]  ;;  %v2298_v0 = vld [vmem:[%s6320_s29 + $0x8f0] sm:$0xff] }
 0x1e5   : > { %v3568_v26 = vadd.f32 %v3567_v29, %v3566_v6  ;;  %v2933_v3 = vadd.f32 %v6456_v22, %v2677_v49  ;;  %v3055_v54 = vadd.f32 %v2927_v53, %v2287_v1  ;;  %v3180_v28 = vmax.f32 %v3052_v30, 0.0  ;;  %v2291_v29 = vld [vmem:[%s6320_s29 + $0x8b8] sm:$0xff]  ;;  %v2293_v22 = vld [vmem:[%s6320_s29 + $0x8c8] sm:$0xff]  ;;  %v2540_v20 = vld [vmem:[%s6320_s29 + $0x1080] sm:$0xff] }
 0x1e6   : > { %v3181_v12 = vmax.f32 %v3053_v57, 0.0  ;;  %v2934_v14 = vadd.f32 %v6459_v23, %v2678_v27  ;;  %v2935_v62 = vadd.f32 %v6462_v24, %v2679_v51  ;;  %v2936_v15 = vadd.f32 %v6465_v25, %v2680_v58  ;;  %v2295_v23 = vld [vmem:[%s6320_s29 + $0x8d8] sm:$0xff]  ;;  %v2296_v24 = vld [vmem:[%s6320_s29 + $0x8e0] sm:$0xff]  ;;  %v2541_v9 = vld [vmem:[%s6320_s29 + $0x1088] sm:$0xff] }
 0x1e7   : > { %v3570_v52 = vadd.f32 %v3569_v59, %v3568_v26  ;;  %v2937_v7 = vadd.f32 %v6471_v37, %v2681_v56  ;;  %v2938_v59 = vadd.f32 %v6474_v38, %v2682_v10  ;;  %v3056_v45 = vadd.f32 %v2928_v18, %v2288_v60  ;;  %v2299_v50 = vld [vmem:[%s6320_s29 + $0x8f8] sm:$0xff]  ;;  %v2416_v1 = vld [vmem:[%s6320_s29 + $0xca0] sm:$0xff]  ;;  %v2542_v58 = vld [vmem:[%s6320_s29 + $0x1090] sm:$0xff] }
 0x1e8   : > { %v3182_v46 = vmax.f32 %v3054_v36, 0.0  ;;  %v2939_v25 = vadd.f32 %v6477_v39, %v2683_v21  ;;  %v3057_v47 = vadd.f32 %v2929_v2, %v2289_v41  ;;  %v3058_v5 = vadd.f32 %v2930_v19, %v2290_v17  ;;  %v2417_v60 = vld [vmem:[%s6320_s29 + $0xca8] sm:$0xff]  ;;  %v2543_v19 = vld [vmem:[%s6320_s29 + $0x1098] sm:$0xff]  ;;  %v2418_v41 = vld [vmem:[%s6320_s29 + $0xcb0] sm:$0xff] }
 0x1e9   : > { %v3572_v48 = vadd.f32 %v6749_v40, %v3570_v52  ;;  %v3059_v37 = vadd.f32 %v2931_v33, %v2291_v29  ;;  %v3183_v38 = vmax.f32 %v3055_v54, 0.0  ;;  %v3308_v35 = vmul.f32 %v3180_v28, %v2412_v13  ;;  %v2419_v17 = vld [vmem:[%s6320_s29 + $0xcb8] sm:$0xff]  ;;  %v2420_v52 = vld [vmem:[%s6320_s29 + $0xcc0] sm:$0xff] }
 0x1ea   : > { %v3309_v8 = vmul.f32 %v3181_v12, %v2413_v31  ;;  %v3060_v49 = vadd.f32 %v2932_v4, %v2292_v55  ;;  %v3061_v27 = vadd.f32 %v2933_v3, %v2293_v22  ;;  %v3062_v51 = vadd.f32 %v2934_v14, %v2294_v43  ;;  %v2544_v29 = vld [vmem:[%s6320_s29 + $0x10a0] sm:$0xff]  ;;  %v2423_v55 = vld [vmem:[%s6320_s29 + $0xcd8] sm:$0xff] }
 0x1eb   : > { %v3574_v40 = vadd.f32 %v6755_v42, %v3572_v48  ;;  %v3063_v39 = vadd.f32 %v2935_v62, %v2295_v23  ;;  %v6824_v53 = vadd.f32 %v2936_v15, %v2296_v24  ;;  %v3184_v30 = vmax.f32 %v3056_v45, 0.0  ;;  %v2421_v62 = vld [vmem:[%s6320_s29 + $0xcc8] sm:$0xff]  ;;  %v2422_v15 = vld [vmem:[%s6320_s29 + $0xcd0] sm:$0xff]  ;;  %v2424_v45 = vld [vmem:[%s6320_s29 + $0xce0] sm:$0xff] }
 0x1ec   : > { %v3310_v57 = vmul.f32 %v3182_v46, %v2414_v32  ;;  %v3065_v42 = vadd.f32 %v2937_v7, %v2297_v63  ;;  %v3066_v56 = vadd.f32 %v2938_v59, %v2298_v0  ;;  %v3067_v10 = vadd.f32 %v2939_v25, %v2299_v50  ;;  %v2545_v46 = vld [vmem:[%s6320_s29 + $0x10a8] sm:$0xff] }
 0x1ed   : > { %v3576_v6 = vadd.f32 %v6764_v44, %v3574_v40  ;;  %v3185_v21 = vmax.f32 %v3057_v47, 0.0  ;;  %v3311_v18 = vmul.f32 %v3183_v38, %v2415_v61  ;;  %v3436_v2 = vadd.f32 %v3308_v35, %v2540_v20  ;;  %v2425_v25 = vld [vmem:[%s6320_s29 + $0xce8] sm:$0xff]  ;;  %v2426_v47 = vld [vmem:[%s6320_s29 + $0xcf0] sm:$0xff]  ;;  %v2547_v35 = vld [vmem:[%s6320_s29 + $0x10b8] sm:$0xff] }
 0x1ee   : > { %v3437_v36 = vadd.f32 %v3309_v8, %v2541_v9  ;;  %v3186_v33 = vmax.f32 %v3058_v5, 0.0  ;;  %v3187_v44 = vmax.f32 %v3059_v37, 0.0  ;;  %v3188_v4 = vmax.f32 %v3060_v49, 0.0  ;;  %v2427_v5 = vld [vmem:[%s6320_s29 + $0xcf8] sm:$0xff]  ;;  %v2546_v38 = vld [vmem:[%s6320_s29 + $0x10b0] sm:$0xff]  ;;  %v2548_v8 = vld [vmem:[%s6320_s29 + $0x10c0] sm:$0xff] }
 0x1ef   : > { %v6830_v26 = vadd.f32 %v6767_v34, %v3576_v6  ;;  %v3189_v3 = vmax.f32 %v3061_v27, 0.0  ;;  %v3190_v54 = vmax.f32 %v3062_v51, 0.0  ;;  %v3312_v28 = vmul.f32 %v3184_v30, %v2416_v1  ;;  %v2549_v27 = vld [vmem:[%s6320_s29 + $0x10c8] sm:$0xff]  ;;  %v2550_v51 = vld [vmem:[%s6320_s29 + $0x10d0] sm:$0xff]  ;;  %v2552_v6 = vld [vmem:[%s6320_s29 + $0x10e0] sm:$0xff] }
 0x1f0   : > { %v3438_v12 = vadd.f32 %v3310_v57, %v2542_v58  ;;  %v3191_v13 = vmax.f32 %v3063_v39, 0.0  ;;  %v3192_v31 = vmax.f32 %v6824_v53, 0.0  ;;  %v3193_v14 = vmax.f32 %v3065_v42, 0.0  ;;  %v2551_v39 = vld [vmem:[%s6320_s29 + $0x10d8] sm:$0xff] }
 0x1f1   : > { %v3796_v34 = vsel %vm1395_vm2, %v6830_v26, -inf  ;;  %v3313_v22 = vmul.f32 %v3185_v21, %v2417_v60  ;;  %v3439_v43 = vadd.f32 %v3311_v18, %v2543_v19  ;;  %v3579_v7 = vsel %vm1395_vm2, %v3436_v2, 0.0  ;;  %v2045_v21 = vld [vmem:[%s6320_s29 + $0x108] sm:$0xff]  ;;  %v2554_v2 = vld [vmem:[%s6320_s29 + $0x10f0] sm:$0xff] }
 0x1f2   : > { %3797 = vmax.xlane.f32.xlu0 %v3796_v34  ;;  %v3580_v59 = vsel %vm1395_vm2, %v3437_v36, 0.0  ;;  %v3194_v48 = vmax.f32 %v3066_v56, 0.0  ;;  %v3195_v23 = vmax.f32 %v3067_v10, 0.0  ;;  %v3314_v24 = vmul.f32 %v3186_v33, %v2418_v41  ;;  %v2044_v10 = vld [vmem:[%s6320_s29 + $0x100] sm:$0xff]  ;;  %v2553_v18 = vld [vmem:[%s6320_s29 + $0x10e8] sm:$0xff] }
 0x1f3   : > { %v3581_v32 = vadd.f32 %v3580_v59, %v3579_v7  ;;  %v3315_v63 = vmul.f32 %v3187_v44, %v2419_v17  ;;  %v3316_v0 = vmul.f32 %v3188_v4, %v2420_v52  ;;  %v3440_v50 = vadd.f32 %v3312_v28, %v2544_v29 }
 0x1f4   : > { %v3582_v37 = vsel %vm1395_vm2, %v3438_v12, 0.0  ;;  %v3317_v40 = vmul.f32 %v3189_v3, %v2421_v62  ;;  %v3318_v61 = vmul.f32 %v3190_v54, %v2422_v15  ;;  %v3319_v20 = vmul.f32 %v3191_v13, %v2423_v55  ;;  %v2046_v3 = vld [vmem:[%s6320_s29 + $0x110] sm:$0xff] }
 0x1f5   : > { %v3583_v9 = vadd.f32 %v3582_v37, %v3581_v32  ;;  %v6856_v49 = vmul.f32 0.35355338, %v6590_v11  ;;  %v3320_v53 = vmul.f32 %v3192_v31, %v2424_v45  ;;  %v3441_v30 = vadd.f32 %v3313_v22, %v2545_v46  ;;  %v2555_v11 = vld [vmem:[%s6320_s29 + $0x10f8] sm:$0xff]  ;;  %v2048_v46 = vld [vmem:[%s6320_s29 + $0x120] sm:$0xff] }
 0x1f6   : > { %v3584_v57 = vsel %vm1395_vm2, %v3439_v43, 0.0  ;;  %v3321_v1 = vmul.f32 %v3193_v14, %v2425_v25  ;;  %v3322_v58 = vmul.f32 %v3194_v48, %v2426_v47  ;;  %v3323_v42 = vmul.f32 %v3195_v23, %v2427_v5  ;;  %v2047_v14 = vld [vmem:[%s6320_s29 + $0x118] sm:$0xff]  ;;  %v2049_v48 = vld [vmem:[%s6320_s29 + $0x128] sm:$0xff]  ;;  %v2050_v23 = vld [vmem:[%s6320_s29 + $0x130] sm:$0xff] }
 0x1f7   : > { %v3585_v56 = vadd.f32 %v3584_v57, %v3583_v9  ;;  %v3442_v36 = vadd.f32 %v3314_v24, %v2546_v38  ;;  %v3443_v60 = vadd.f32 %v3315_v63, %v2547_v35  ;;  %v3444_v19 = vadd.f32 %v3316_v0, %v2548_v8  ;;  %v2051_v32 = vld [vmem:[%s6320_s29 + $0x138] sm:$0xff]  ;;  %v2052_v25 = vld [vmem:[%s6320_s29 + $0x140] sm:$0xff]  ;;  %v2053_v47 = vld [vmem:[%s6320_s29 + $0x148] sm:$0xff] }
 0x1f8   : > { %v3586_v33 = vsel %vm1395_vm2, %v3440_v50, 0.0  ;;  %v3445_v44 = vadd.f32 %v3317_v40, %v2549_v27  ;;  %v3446_v4 = vadd.f32 %v3318_v61, %v2550_v51  ;;  %v3447_v41 = vadd.f32 %v3319_v20, %v2551_v39  ;;  %v7950_v63 = vld [vmem:[#allocation8_spill] sm:$0xff]  ;;  %v7951_v50 = vld [vmem:[#allocation9_spill] sm:$0xff]  ;;  %v2300_v20 = vld [vmem:[%s6320_s29 + $0x900] sm:$0xff] }
 0x1f9   : > { %v3587_v17 = vadd.f32 %v3586_v33, %v3585_v56  ;;  %v3448_v54 = vadd.f32 %v3320_v53, %v2552_v6  ;;  %v3588_v28 = vsel %vm1395_vm2, %v3441_v30, 0.0  ;;  %v2684_v12 = vmul.f32 %v2044_v10, %v6856_v49  ;;  %v2054_v61 = vld [vmem:[%s6320_s29 + $0x150] sm:$0xff]  ;;  %v2301_v9 = vld [vmem:[%s6320_s29 + $0x908] sm:$0xff]  ;;  %v2055_v27 = vld [vmem:[%s6320_s29 + $0x158] sm:$0xff] }
 0x1fa   : > { %v2685_v34 = vmul.f32 %v2045_v21, %v6856_v49  ;;  %v3449_v52 = vadd.f32 %v3321_v1, %v2553_v18  ;;  %v3450_v29 = vadd.f32 %v3322_v58, %v2554_v2  ;;  %v3451_v13 = vadd.f32 %v3323_v42, %v2555_v11  ;;  %v2056_v51 = vld [vmem:[%s6320_s29 + $0x160] sm:$0xff]  ;;  %v2057_v39 = vld [vmem:[%s6320_s29 + $0x168] sm:$0xff]  ;;  %v2058_v42 = vld [vmem:[%s6320_s29 + $0x170] sm:$0xff] }
 0x1fb   : > { %v3589_v31 = vadd.f32 %v3588_v28, %v3587_v17  ;;  %v3590_v62 = vsel %vm1395_vm2, %v3442_v36, 0.0  ;;  %v3592_v15 = vsel %vm1395_vm2, %v3443_v60, 0.0  ;;  %v3594_v55 = vsel %vm1395_vm2, %v3444_v19, 0.0  ;;  %v7952_v6 = vld [vmem:[#allocation10_spill] sm:$0xff]  ;;  %v2059_v56 = vld [vmem:[%s6320_s29 + $0x178] sm:$0xff]  ;;  %v2302_v10 = vld [vmem:[%s6320_s29 + $0x910] sm:$0xff] }
 0x1fc   : > { %v2686_v22 = vmul.f32 %v2046_v3, %v6856_v49  ;;  %v3596_v7 = vsel %vm1395_vm2, %v3445_v44, 0.0  ;;  %v3598_v59 = vsel %vm1395_vm2, %v3446_v4, 0.0  ;;  %v3600_v45 = vsel %vm1395_vm2, %v3447_v41, 0.0  ;;  %v7953_v36 = vld [vmem:[#allocation11_spill] sm:$0xff]  ;;  %v2303_v4 = vld [vmem:[%s6320_s29 + $0x918] sm:$0xff] }
 0x1fd   : > { %v3591_v43 = vadd.f32 %v3590_v62, %v3589_v31  ;;  %v6885_v24 = vsel %vm1395_vm2, %v3448_v54, 0.0  ;;  %v2687_v5 = vmul.f32 %v2047_v14, %v6856_v49  ;;  %v2940_v0 = vadd.f32 %v7950_v63, %v2684_v12  ;;  %v7954_v12 = vld [vmem:[#allocation12_spill] sm:$0xff]  ;;  %v7955_v31 = vld [vmem:[#allocation13_spill] sm:$0xff]  ;;  %v7956_v62 = vld [vmem:[#allocation14_spill] sm:$0xff] }
 0x1fe   : > { %v2941_v37 = vadd.f32 %v7951_v50, %v2685_v34  ;;  %v6894_v35 = vsel %vm1395_vm2, %v3449_v52, 0.0  ;;  %v6897_v8 = vsel %vm1395_vm2, %v3450_v29, 0.0  ;;  %v6900_v40 = vsel %vm1395_vm2, %v3451_v13, 0.0  ;;  %v2304_v13 = vld [vmem:[%s6320_s29 + $0x920] sm:$0xff] }
 0x1ff   : > { %v3593_v38 = vadd.f32 %v3592_v15, %v3591_v43  ;;  %v2688_v53 = vmul.f32 %v2048_v46, %v6856_v49  ;;  %v2689_v30 = vmul.f32 %v2049_v48, %v6856_v49  ;;  %v2690_v57 = vmul.f32 %v2050_v23, %v6856_v49  ;;  %v2305_v43 = vld [vmem:[%s6320_s29 + $0x928] sm:$0xff] }
 0x200   : > { %v2942_v1 = vadd.f32 %v7952_v6, %v2686_v22  ;;  %v2691_v21 = vmul.f32 %v2051_v32, %v6856_v49  ;;  %v2692_v18 = vmul.f32 %v2052_v25, %v6856_v49  ;;  %v2693_v2 = vmul.f32 %v2053_v47, %v6856_v49  ;;  %v2428_v25 = vld [vmem:[%s6320_s29 + $0xd00] sm:$0xff]  ;;  %v2429_v47 = vld [vmem:[%s6320_s29 + $0xd08] sm:$0xff]  ;;  %v2310_v6 = vld [vmem:[%s6320_s29 + $0x950] sm:$0xff] }
 0x201   : > { %v3595_v58 = vadd.f32 %v3594_v55, %v3593_v38  ;;  %v2694_v11 = vmul.f32 %v2054_v61, %v6856_v49  ;;  %v2943_v60 = vadd.f32 %v7953_v36, %v2687_v5  ;;  %v3068_v19 = vadd.f32 %v2940_v0, %v2300_v20  ;;  %v7957_v55 = vld [vmem:[#allocation15_spill] sm:$0xff]  ;;  %v7959_v5 = vld [vmem:[#allocation17_spill] sm:$0xff]  ;;  %v7960_v0 = vld [vmem:[#allocation18_spill] sm:$0xff] }
 0x202   : > { %v3069_v33 = vadd.f32 %v2941_v37, %v2301_v9  ;;  %v2695_v41 = vmul.f32 %v2055_v27, %v6856_v49  ;;  %v2696_v17 = vmul.f32 %v2056_v51, %v6856_v49  ;;  %v2697_v3 = vmul.f32 %v2057_v39, %v6856_v49  ;;  %v7961_v37 = vld [vmem:[#allocation19_spill] sm:$0xff]  ;;  %v2307_v61 = vld [vmem:[%s6320_s29 + $0x938] sm:$0xff]  ;;  %v2308_v20 = vld [vmem:[%s6320_s29 + $0x940] sm:$0xff] }
 0x203   : > { %v3597_v44 = vadd.f32 %v3596_v7, %v3595_v58  ;;  %v2698_v54 = vmul.f32 %v2058_v42, %v6856_v49  ;;  %v2699_v28 = vmul.f32 %v2059_v56, %v6856_v49  ;;  %v2944_v34 = vadd.f32 %v7954_v12, %v2688_v53  ;;  %v7958_v7 = vld [vmem:[#allocation16_spill] sm:$0xff]  ;;  %v2309_v9 = vld [vmem:[%s6320_s29 + $0x948] sm:$0xff]  ;;  %v7964_v42 = vld [vmem:[#allocation22_spill] sm:$0xff] }
 0x204   : > { %v3070_v52 = vadd.f32 %v2942_v1, %v2302_v10  ;;  %v2945_v14 = vadd.f32 %v7955_v31, %v2689_v30  ;;  %v2946_v15 = vadd.f32 %v7956_v62, %v2690_v57  ;;  %v2947_v22 = vadd.f32 %v7957_v55, %v2691_v21  ;;  %v7962_v27 = vld [vmem:[#allocation20_spill] sm:$0xff]  ;;  %v2311_v1 = vld [vmem:[%s6320_s29 + $0x958] sm:$0xff]  ;;  %v7965_v10 = vld [vmem:[#allocation23_spill] sm:$0xff] }
 0x205   : > { %v3599_v29 = vadd.f32 %v3598_v59, %v3597_v44  ;;  %v2948_v46 = vadd.f32 %v7958_v7, %v2692_v18  ;;  %v3071_v48 = vadd.f32 %v2943_v60, %v2303_v4  ;;  %v3196_v49 = vmax.f32 %v3068_v19, 0.0  ;;  %v2306_v59 = vld [vmem:[%s6320_s29 + $0x930] sm:$0xff]  ;;  %v2431_v4 = vld [vmem:[%s6320_s29 + $0xd18] sm:$0xff] }
 0x206   : > { %v3197_v23 = vmax.f32 %v3069_v33, 0.0  ;;  %v2949_v63 = vadd.f32 %v7959_v5, %v2693_v2  ;;  %v2950_v50 = vadd.f32 %v7960_v0, %v2694_v11  ;;  %v2951_v38 = vadd.f32 %v7961_v37, %v2695_v41  ;;  %v2430_v58 = vld [vmem:[%s6320_s29 + $0xd10] sm:$0xff]  ;;  %v2312_v2 = vld [vmem:[%s6320_s29 + $0x960] sm:$0xff]  ;;  %v2313_v11 = vld [vmem:[%s6320_s29 + $0x968] sm:$0xff] }
 0x207   : > { %v3601_v32 = vadd.f32 %v3600_v45, %v3599_v29  ;;  %v2952_v51 = vadd.f32 %v7962_v27, %v2696_v17  ;;  %v7963_v45 = vld [vmem:[#allocation21_spill] sm:$0xff]  ;;  %v3072_v53 = vadd.f32 %v2944_v34, %v2304_v13  ;;  %v3198_v30 = vmax.f32 %v3070_v52, 0.0  ;;  %v2314_v36 = vld [vmem:[%s6320_s29 + $0x970] sm:$0xff]  ;;  %v2556_v41 = vld [vmem:[%s6320_s29 + $0x1100] sm:$0xff] }
 0x208   : > { %v2953_v39 = vadd.f32 %v7963_v45, %v2697_v3  ;;  %v2954_v56 = vadd.f32 %v7964_v42, %v2698_v54  ;;  %v2955_v21 = vadd.f32 %v7965_v10, %v2699_v28  ;;  %v3073_v18 = vadd.f32 %v2945_v14, %v2305_v43  ;;  %v2557_v17 = vld [vmem:[%s6320_s29 + $0x1108] sm:$0xff]  ;;  %v2315_v28 = vld [vmem:[%s6320_s29 + $0x978] sm:$0xff]  ;;  %v2432_v14 = vld [vmem:[%s6320_s29 + $0xd20] sm:$0xff] }
 0x209   : > { %v3603_v57 = vadd.f32 %v6885_v24, %v3601_v32  ;;  %v3074_v60 = vadd.f32 %v2946_v15, %v2306_v59  ;;  %v3199_v19 = vmax.f32 %v3071_v48, 0.0  ;;  %v3324_v33 = vmul.f32 %v3196_v49, %v2428_v25  ;;  %v2558_v62 = vld [vmem:[%s6320_s29 + $0x1110] sm:$0xff]  ;;  %v2433_v49 = vld [vmem:[%s6320_s29 + $0xd28] sm:$0xff]  ;;  %v2560_v37 = vld [vmem:[%s6320_s29 + $0x1120] sm:$0xff] }
 0x20a   : > { %v3325_v24 = vmul.f32 %v3197_v23, %v2429_v47  ;;  %v3075_v3 = vadd.f32 %v2947_v22, %v2307_v61  ;;  %v3076_v54 = vadd.f32 %v2948_v46, %v2308_v20  ;;  %v3077_v12 = vadd.f32 %v2949_v63, %v2309_v9  ;;  %v2559_v23 = vld [vmem:[%s6320_s29 + $0x1118] sm:$0xff]  ;;  %v2434_v25 = vld [vmem:[%s6320_s29 + $0xd30] sm:$0xff]  ;;  %v2436_v9 = vld [vmem:[%s6320_s29 + $0xd40] sm:$0xff] }
 0x20b   : > { %v3605_v44 = vadd.f32 %v6894_v35, %v3603_v57  ;;  %v3078_v34 = vadd.f32 %v2950_v50, %v2310_v6  ;;  %v6958_v52 = vadd.f32 %v2951_v38, %v2311_v1  ;;  %v3200_v29 = vmax.f32 %v3072_v53, 0.0  ;;  %v2437_v27 = vld [vmem:[%s6320_s29 + $0xd48] sm:$0xff]  ;;  %v2439_v57 = vld [vmem:[%s6320_s29 + $0xd58] sm:$0xff]  ;;  %v2440_v6 = vld [vmem:[%s6320_s29 + $0xd60] sm:$0xff] }
 0x20c   : > { %v3326_v13 = vmul.f32 %v3198_v30, %v2430_v58  ;;  %v3080_v35 = vadd.f32 %v2952_v51, %v2312_v2  ;;  %v6963_v15 = vadd.f32 %v2953_v39, %v2313_v11  ;;  %v6965_v55 = vadd.f32 %v2954_v56, %v2314_v36  ;;  %v2438_v51 = vld [vmem:[%s6320_s29 + $0xd50] sm:$0xff]  ;;  %v2561_v1 = vld [vmem:[%s6320_s29 + $0x1128] sm:$0xff]  ;;  %v2443_v2 = vld [vmem:[%s6320_s29 + $0xd78] sm:$0xff] }
 0x20d   : > { %v3607_v31 = vadd.f32 %v6897_v8, %v3605_v44  ;;  %v3201_v22 = vmax.f32 %v3073_v18, 0.0  ;;  %v3327_v43 = vmul.f32 %v3199_v19, %v2431_v4  ;;  %v3452_v7 = vadd.f32 %v3324_v33, %v2556_v41  ;;  %v2442_v18 = vld [vmem:[%s6320_s29 + $0xd70] sm:$0xff] }
 0x20e   : > { %v3453_v46 = vadd.f32 %v3325_v24, %v2557_v17  ;;  %v3083_v8 = vadd.f32 %v2955_v21, %v2315_v28  ;;  %v3202_v32 = vmax.f32 %v3074_v60, 0.0  ;;  %v3203_v59 = vmax.f32 %v3075_v3, 0.0  ;;  %v2441_v21 = vld [vmem:[%s6320_s29 + $0xd68] sm:$0xff]  ;;  %v2562_v33 = vld [vmem:[%s6320_s29 + $0x1130] sm:$0xff]  ;;  %v2064_v17 = vld [vmem:[%s6320_s29 + $0x1a0] sm:$0xff] }
 0x20f   : > { %v6968_v48 = vadd.f32 %v6900_v40, %v3607_v31  ;;  %v3204_v47 = vmax.f32 %v3076_v54, 0.0  ;;  %v3205_v5 = vmax.f32 %v3077_v12, 0.0  ;;  %v3328_v63 = vmul.f32 %v3200_v29, %v2432_v14  ;;  %v2435_v40 = vld [vmem:[%s6320_s29 + $0xd38] sm:$0xff]  ;;  %v2065_v3 = vld [vmem:[%s6320_s29 + $0x1a8] sm:$0xff]  ;;  %v2564_v12 = vld [vmem:[%s6320_s29 + $0x1140] sm:$0xff] }
 0x210   : > { %v3454_v0 = vadd.f32 %v3326_v13, %v2558_v62  ;;  %v3206_v38 = vmax.f32 %v3078_v34, 0.0  ;;  %v3207_v61 = vmax.f32 %v6958_v52, 0.0  ;;  %v3208_v20 = vmax.f32 %v3080_v35, 0.0  ;;  %v2563_v54 = vld [vmem:[%s6320_s29 + $0x1138] sm:$0xff]  ;;  %v2565_v28 = vld [vmem:[%s6320_s29 + $0x1148] sm:$0xff]  ;;  %v2566_v31 = vld [vmem:[%s6320_s29 + $0x1150] sm:$0xff] }
 0x211   : > { %v3799_v50 = vsel %vm1395_vm2, %v6968_v48, -inf  ;;  %v3329_v45 = vmul.f32 %v3201_v22, %v2433_v49  ;;  %v3455_v39 = vadd.f32 %v3327_v43, %v2559_v23  ;;  %v3610_v53 = vsel %vm1395_vm2, %v3452_v7, 0.0  ;;  %v2567_v14 = vld [vmem:[%s6320_s29 + $0x1158] sm:$0xff]  ;;  %v2568_v62 = vld [vmem:[%s6320_s29 + $0x1160] sm:$0xff]  ;;  %v2569_v43 = vld [vmem:[%s6320_s29 + $0x1168] sm:$0xff] }
 0x212   : > { %3800 = vmax.xlane.f32.xlu0 %v3799_v50  ;;  %v3611_v30 = vsel %vm1395_vm2, %v3453_v46, 0.0  ;;  %v3209_v58 = vmax.f32 %v6963_v15, 0.0  ;;  %v3210_v42 = vmax.f32 %v6965_v55, 0.0  ;;  %v3211_v56 = vmax.f32 %v3083_v8, 0.0  ;;  %v2570_v7 = vld [vmem:[%s6320_s29 + $0x1170] sm:$0xff]  ;;  %v2571_v46 = vld [vmem:[%s6320_s29 + $0x1178] sm:$0xff] }
 0x213   : > { %v3612_v10 = vadd.f32 %v3611_v30, %v3610_v53  ;;  %v3330_v11 = vmul.f32 %v3202_v32, %v2434_v25  ;;  %v3331_v36 = vmul.f32 %v3203_v59, %v2435_v40  ;;  %v3456_v60 = vadd.f32 %v3328_v63, %v2560_v37  ;;  %v2066_v63 = vld [vmem:[%s6320_s29 + $0x1b0] sm:$0xff]  ;;  %v7968_v30 = vld [vmem:[#allocation42_spill] sm:$0xff] }
 0x214   : > { %v3613_v19 = vsel %vm1395_vm2, %v3454_v0, 0.0  ;;  %v3332_v24 = vmul.f32 %v3204_v47, %v2436_v9  ;;  %v3333_v44 = vmul.f32 %v3205_v5, %v2437_v27  ;;  %v3334_v4 = vmul.f32 %v3206_v38, %v2438_v51 }
 0x215   : > { %v3614_v41 = vadd.f32 %v3613_v19, %v3612_v10  ;;  %v3335_v34 = vmul.f32 %v3207_v61, %v2439_v57  ;;  %v3336_v52 = vmul.f32 %v3208_v20, %v2440_v6  ;;  %v3457_v29 = vadd.f32 %v3329_v45, %v2561_v1  ;;  %v7966_v45 = vld [vmem:[#allocation41_spill] sm:$0xff]  ;;  %v2069_v19 = vld [vmem:[%s6320_s29 + $0x1c8] sm:$0xff] }
 0x216   : > { %v3615_v13 = vsel %vm1395_vm2, %v3455_v39, 0.0  ;;  %v3337_v35 = vmul.f32 %v3209_v58, %v2441_v21  ;;  %v3338_v15 = vmul.f32 %v3210_v42, %v2442_v18  ;;  %v3339_v55 = vmul.f32 %v3211_v56, %v2443_v2  ;;  %v7967_v39 = vld [vmem:[#allocation24_spill] sm:$0xff]  ;;  %v7969_v57 = vld [vmem:[#allocation25_spill] sm:$0xff]  ;;  %v2316_v21 = vld [vmem:[%s6320_s29 + $0x980] sm:$0xff] }
 0x217   : > { %v3616_v22 = vadd.f32 %v3615_v13, %v3614_v41  ;;  %v3458_v49 = vadd.f32 %v3330_v11, %v2562_v33  ;;  %v3617_v23 = vsel %vm1395_vm2, %v3456_v60, 0.0  ;;  %v2704_v8 = vmul.f32 %v2064_v17, %v6573_v16  ;;  %v2067_v10 = vld [vmem:[%s6320_s29 + $0x1b8] sm:$0xff]  ;;  %v2317_v18 = vld [vmem:[%s6320_s29 + $0x988] sm:$0xff]  ;;  %v2068_v60 = vld [vmem:[%s6320_s29 + $0x1c0] sm:$0xff] }
 0x218   : > { %v2705_v32 = vmul.f32 %v2065_v3, %v6573_v16  ;;  %v3459_v59 = vadd.f32 %v3331_v36, %v2563_v54  ;;  %v3460_v25 = vadd.f32 %v3332_v24, %v2564_v12  ;;  %v3461_v47 = vadd.f32 %v3333_v44, %v2565_v28  ;;  %v2070_v33 = vld [vmem:[%s6320_s29 + $0x1d0] sm:$0xff]  ;;  %v7970_v24 = vld [vmem:[#allocation43_spill] sm:$0xff]  ;;  %v7971_v44 = vld [vmem:[#allocation26_spill] sm:$0xff] }
 0x219   : > { %v3618_v5 = vadd.f32 %v3617_v23, %v3616_v22  ;;  %v3462_v0 = vadd.f32 %v3334_v4, %v2566_v31  ;;  %v3463_v50 = vadd.f32 %v3335_v34, %v2567_v14  ;;  %v3464_v40 = vadd.f32 %v3336_v52, %v2568_v62  ;;  %v2071_v12 = vld [vmem:[%s6320_s29 + $0x1d8] sm:$0xff]  ;;  %v2072_v28 = vld [vmem:[%s6320_s29 + $0x1e0] sm:$0xff]  ;;  %v2318_v34 = vld [vmem:[%s6320_s29 + $0x990] sm:$0xff] }
 0x21a   : > { %v3619_v37 = vsel %vm1395_vm2, %v3457_v29, 0.0  ;;  %v3465_v38 = vadd.f32 %v3337_v35, %v2569_v43  ;;  %v3466_v61 = vadd.f32 %v3338_v15, %v2570_v7  ;;  %v3467_v20 = vadd.f32 %v3339_v55, %v2571_v46  ;;  %v2073_v52 = vld [vmem:[%s6320_s29 + $0x1e8] sm:$0xff]  ;;  %v2074_v29 = vld [vmem:[%s6320_s29 + $0x1f0] sm:$0xff]  ;;  %v2075_v13 = vld [vmem:[%s6320_s29 + $0x1f8] sm:$0xff] }
 0x21b   : > { %v3620_v9 = vadd.f32 %v3619_v37, %v3618_v5  ;;  %v3621_v27 = vsel %vm1395_vm2, %v3458_v49, 0.0  ;;  %v2706_v51 = vmul.f32 %v2066_v63, %v6573_v16  ;;  %v2956_v53 = vadd.f32 %v7967_v39, %v7966_v45  ;;  %v7972_v14 = vld [vmem:[#allocation46_spill] sm:$0xff]  ;;  %v7973_v62 = vld [vmem:[#allocation27_spill] sm:$0xff]  ;;  %v2319_v43 = vld [vmem:[%s6320_s29 + $0x998] sm:$0xff] }
 0x21c   : > { %v2957_v6 = vadd.f32 %v7969_v57, %v7968_v30  ;;  %v3623_v58 = vsel %vm1395_vm2, %v3459_v59, 0.0  ;;  %v3625_v42 = vsel %vm1395_vm2, %v3460_v25, 0.0  ;;  %v3627_v56 = vsel %vm1395_vm2, %v3461_v47, 0.0  ;;  %v7974_v25 = vld [vmem:[#allocation28_spill] sm:$0xff]  ;;  %v2444_v39 = vld [vmem:[%s6320_s29 + $0xd80] sm:$0xff]  ;;  %v7976_v30 = vld [vmem:[#allocation31_spill] sm:$0xff] }
 0x21d   : > { %v3622_v1 = vadd.f32 %v3621_v27, %v3620_v9  ;;  %v3629_v2 = vsel %vm1395_vm2, %v3462_v0, 0.0  ;;  %v3631_v11 = vsel %vm1395_vm2, %v3463_v50, 0.0  ;;  %v7025_v36 = vsel %vm1395_vm2, %v3464_v40, 0.0  ;;  %v2320_v0 = vld [vmem:[%s6320_s29 + $0x9a0] sm:$0xff] }
 0x21e   : > { %v2958_v4 = vadd.f32 %v7971_v44, %v7970_v24  ;;  %v7033_v17 = vsel %vm1395_vm2, %v3465_v38, 0.0  ;;  %v7036_v3 = vsel %vm1395_vm2, %v3466_v61, 0.0  ;;  %v7039_v54 = vsel %vm1395_vm2, %v3467_v20, 0.0  ;;  %v7975_v38 = vld [vmem:[#allocation30_spill] sm:$0xff]  ;;  %v7981_v24 = vld [vmem:[#allocation36_spill] sm:$0xff] }
 0x21f   : > { %v3624_v41 = vadd.f32 %v3623_v58, %v3622_v1  ;;  %v2707_v31 = vmul.f32 %v2067_v10, %v6573_v16  ;;  %v2959_v35 = vadd.f32 %v7973_v62, %v7972_v14  ;;  %v3084_v15 = vadd.f32 %v2956_v53, %v2316_v21  ;;  %v2445_v53 = vld [vmem:[%s6320_s29 + $0xd88] sm:$0xff]  ;;  %v7978_v58 = vld [vmem:[#allocation33_spill] sm:$0xff] }
 0x220   : > { %v3085_v55 = vadd.f32 %v2957_v6, %v2317_v18  ;;  %v2708_v7 = vmul.f32 %v2068_v60, %v6573_v16  ;;  %v2709_v46 = vmul.f32 %v2069_v19, %v6573_v16  ;;  %v2710_v49 = vmul.f32 %v2070_v33, %v6573_v16  ;;  %v7977_v6 = vld [vmem:[#allocation32_spill] sm:$0xff]  ;;  %v7980_v10 = vld [vmem:[#allocation35_spill] sm:$0xff]  ;;  %v2323_v19 = vld [vmem:[%s6320_s29 + $0x9b8] sm:$0xff] }
 0x221   : > { %v3626_v22 = vadd.f32 %v3625_v42, %v3624_v41  ;;  %v2711_v23 = vmul.f32 %v2071_v12, %v6573_v16  ;;  %v2712_v59 = vmul.f32 %v2072_v28, %v6573_v16  ;;  %v2960_v47 = vadd.f32 %v7974_v25, %v2704_v8  ;;  %v2321_v8 = vld [vmem:[%s6320_s29 + $0x9a8] sm:$0xff]  ;;  %v7979_v42 = vld [vmem:[#allocation34_spill] sm:$0xff]  ;;  %v2330_v25 = vld [vmem:[%s6320_s29 + $0x9f0] sm:$0xff] }
 0x222   : > { %v3086_v5 = vadd.f32 %v2958_v4, %v2318_v34  ;;  %v2713_v50 = vmul.f32 %v2073_v52, %v6573_v16  ;;  %v2714_v40 = vmul.f32 %v2074_v29, %v6573_v16  ;;  %v2715_v37 = vmul.f32 %v2075_v13, %v6573_v16  ;;  %v2324_v33 = vld [vmem:[%s6320_s29 + $0x9c0] sm:$0xff]  ;;  %v7982_v4 = vld [vmem:[#allocation37_spill] sm:$0xff]  ;;  %v2325_v34 = vld [vmem:[%s6320_s29 + $0x9c8] sm:$0xff] }
 0x223   : > { %v3628_v63 = vadd.f32 %v3627_v56, %v3626_v22  ;;  %v2961_v61 = vadd.f32 %v7975_v38, %v2705_v32  ;;  %v3087_v20 = vadd.f32 %v2959_v35, %v2319_v43  ;;  %v3212_v9 = vmax.f32 %v3084_v15, 0.0  ;;  %v2322_v32 = vld [vmem:[%s6320_s29 + $0x9b0] sm:$0xff]  ;;  %v7983_v12 = vld [vmem:[#allocation38_spill] sm:$0xff]  ;;  %v2327_v29 = vld [vmem:[%s6320_s29 + $0x9d8] sm:$0xff] }
 0x224   : > { %v3213_v27 = vmax.f32 %v3085_v55, 0.0  ;;  %v2962_v57 = vadd.f32 %v7976_v30, %v2706_v51  ;;  %v2963_v1 = vadd.f32 %v7977_v6, %v2707_v31  ;;  %v2964_v16 = vadd.f32 %v7978_v58, %v2708_v7  ;;  %v2446_v51 = vld [vmem:[%s6320_s29 + $0xd90] sm:$0xff]  ;;  %v2447_v35 = vld [vmem:[%s6320_s29 + $0xd98] sm:$0xff]  ;;  %v2572_v15 = vld [vmem:[%s6320_s29 + $0x1180] sm:$0xff] }
 0x225   : > { %v3630_v45 = vadd.f32 %v3629_v2, %v3628_v63  ;;  %v2965_v56 = vadd.f32 %v7979_v42, %v2709_v46  ;;  %v2966_v21 = vadd.f32 %v7980_v10, %v2710_v49  ;;  %v3088_v18 = vadd.f32 %v2960_v47, %v2320_v0  ;;  %v2326_v52 = vld [vmem:[%s6320_s29 + $0x9d0] sm:$0xff]  ;;  %v2573_v55 = vld [vmem:[%s6320_s29 + $0x1188] sm:$0xff]  ;;  %v2448_v38 = vld [vmem:[%s6320_s29 + $0xda0] sm:$0xff] }
 0x226   : > { %v3214_v60 = vmax.f32 %v3086_v5, 0.0  ;;  %v2967_v44 = vadd.f32 %v7981_v24, %v2711_v23  ;;  %v2968_v41 = vadd.f32 %v7982_v4, %v2712_v59  ;;  %v2969_v28 = vadd.f32 %v7983_v12, %v2713_v50  ;;  %v7984_v22 = vld [vmem:[#allocation39_spill] sm:$0xff]  ;;  %v7985_v7 = vld [vmem:[#allocation44_spill] sm:$0xff]  ;;  %v2328_v23 = vld [vmem:[%s6320_s29 + $0x9e0] sm:$0xff] }
 0x227   : > { %v3632_v2 = vadd.f32 %v3631_v11, %v3630_v45  ;;  %v3089_v13 = vadd.f32 %v2961_v61, %v2321_v8  ;;  %v3215_v31 = vmax.f32 %v3087_v20, 0.0  ;;  %v3340_v11 = vmul.f32 %v3212_v9, %v2444_v39  ;;  %v2329_v59 = vld [vmem:[%s6320_s29 + $0x9e8] sm:$0xff]  ;;  %v2331_v50 = vld [vmem:[%s6320_s29 + $0x9f8] sm:$0xff]  ;;  %v2574_v61 = vld [vmem:[%s6320_s29 + $0x1190] sm:$0xff] }
 0x228   : > { %v3341_v14 = vmul.f32 %v3213_v27, %v2445_v53  ;;  %v2970_v43 = vadd.f32 %v7984_v22, %v2714_v40  ;;  %v2971_v46 = vadd.f32 %v7985_v7, %v2715_v37  ;;  %v3090_v49 = vadd.f32 %v2962_v57, %v2322_v32  ;;  %v2449_v53 = vld [vmem:[%s6320_s29 + $0xda8] sm:$0xff]  ;;  %v2575_v30 = vld [vmem:[%s6320_s29 + $0x1198] sm:$0xff]  ;;  %v2576_v10 = vld [vmem:[%s6320_s29 + $0x11a0] sm:$0xff] }
 0x229   : > { %v3634_v62 = vadd.f32 %v7025_v36, %v3632_v2  ;;  %v3091_v47 = vadd.f32 %v2963_v1, %v2323_v19  ;;  %v7089_v5 = vadd.f32 %v2964_v16, %v2324_v33  ;;  %v3216_v63 = vmax.f32 %v3088_v18, 0.0  ;;  %v2577_v24 = vld [vmem:[%s6320_s29 + $0x11a8] sm:$0xff]  ;;  %v2452_v12 = vld [vmem:[%s6320_s29 + $0xdc0] sm:$0xff] }
 0x22a   : > { %v3342_v36 = vmul.f32 %v3214_v60, %v2446_v51  ;;  %v3093_v20 = vadd.f32 %v2965_v56, %v2325_v34  ;;  %v3094_v40 = vadd.f32 %v2966_v21, %v2326_v52  ;;  %v3095_v9 = vadd.f32 %v2967_v44, %v2327_v29  ;;  %v2450_v56 = vld [vmem:[%s6320_s29 + $0xdb0] sm:$0xff]  ;;  %v2451_v51 = vld [vmem:[%s6320_s29 + $0xdb8] sm:$0xff]  ;;  %v2457_v22 = vld [vmem:[%s6320_s29 + $0xde8] sm:$0xff] }
 0x22b   : > { %v3636_v0 = vadd.f32 %v7033_v17, %v3634_v62  ;;  %v3217_v37 = vmax.f32 %v3089_v13, 0.0  ;;  %v3343_v27 = vmul.f32 %v3215_v31, %v2447_v35  ;;  %v3468_v45 = vadd.f32 %v3340_v11, %v2572_v15  ;;  %v2454_v34 = vld [vmem:[%s6320_s29 + $0xdd0] sm:$0xff]  ;;  %v2455_v11 = vld [vmem:[%s6320_s29 + $0xdd8] sm:$0xff] }
 0x22c   : > { %v3469_v8 = vadd.f32 %v3341_v14, %v2573_v55  ;;  %v3096_v57 = vadd.f32 %v2968_v41, %v2328_v23  ;;  %v3097_v6 = vadd.f32 %v2969_v28, %v2329_v59  ;;  %v3098_v1 = vadd.f32 %v2970_v43, %v2330_v25  ;;  %v2453_v28 = vld [vmem:[%s6320_s29 + $0xdc8] sm:$0xff]  ;;  %v2456_v14 = vld [vmem:[%s6320_s29 + $0xde0] sm:$0xff]  ;;  %v2578_v62 = vld [vmem:[%s6320_s29 + $0x11b0] sm:$0xff] }
 0x22d   : > { %v3638_v39 = vadd.f32 %v7036_v3, %v3636_v0  ;;  %v3099_v17 = vadd.f32 %v2971_v46, %v2331_v50  ;;  %v3218_v58 = vmax.f32 %v3090_v49, 0.0  ;;  %v3344_v16 = vmul.f32 %v3216_v63, %v2448_v38  ;;  %v2458_v43 = vld [vmem:[%s6320_s29 + $0xdf0] sm:$0xff]  ;;  %v2459_v59 = vld [vmem:[%s6320_s29 + $0xdf8] sm:$0xff]  ;;  %v2580_v0 = vld [vmem:[%s6320_s29 + $0x11c0] sm:$0xff] }
 0x22e   : > { %v3470_v32 = vadd.f32 %v3342_v36, %v2574_v61  ;;  %v3219_v21 = vmax.f32 %v3091_v47, 0.0  ;;  %v3220_v3 = vmax.f32 %v7089_v5, 0.0  ;;  %v3221_v18 = vmax.f32 %v3093_v20, 0.0  ;;  %v2579_v25 = vld [vmem:[%s6320_s29 + $0x11b8] sm:$0xff]  ;;  %v2581_v50 = vld [vmem:[%s6320_s29 + $0x11c8] sm:$0xff] }
 0x22f   : > { %v7099_v42 = vadd.f32 %v7039_v54, %v3638_v39  ;;  %v3345_v60 = vmul.f32 %v3217_v37, %v2449_v53  ;;  %v3471_v2 = vadd.f32 %v3343_v27, %v2575_v30  ;;  %v3641_v19 = vsel %vm1395_vm2, %v3468_v45, 0.0  ;;  %v2583_v37 = vld [vmem:[%s6320_s29 + $0x11d8] sm:$0xff]  ;;  %v2584_v27 = vld [vmem:[%s6320_s29 + $0x11e0] sm:$0xff] }
 0x230   : > { %v3642_v33 = vsel %vm1395_vm2, %v3469_v8, 0.0  ;;  %v3222_v44 = vmax.f32 %v3094_v40, 0.0  ;;  %v3223_v4 = vmax.f32 %v3095_v9, 0.0  ;;  %v3224_v52 = vmax.f32 %v3096_v57, 0.0  ;;  %v2582_v9 = vld [vmem:[%s6320_s29 + $0x11d0] sm:$0xff]  ;;  %v7986_v53 = vld [vmem:[#allocation45_spill] sm:$0xff] }
 0x231   : > { %v3802_v54 = vsel %vm1395_vm2, %v7099_v42, -inf  ;;  %v3643_v41 = vadd.f32 %v3642_v33, %v3641_v19  ;;  %v3346_v29 = vmul.f32 %v3218_v58, %v2450_v56  ;;  %v3472_v13 = vadd.f32 %v3344_v16, %v2576_v10  ;;  %v2585_v57 = vld [vmem:[%s6320_s29 + $0x11e8] sm:$0xff]  ;;  %v2587_v16 = vld [vmem:[%s6320_s29 + $0x11f8] sm:$0xff] }
 0x232   : > { %3803 = vmax.xlane.f32.xlu1 %v3802_v54  ;;  %v3644_v31 = vsel %vm1395_vm2, %v3470_v32, 0.0  ;;  %v3225_v35 = vmax.f32 %v3097_v6, 0.0  ;;  %v3226_v15 = vmax.f32 %v3098_v1, 0.0  ;;  %v3227_v7 = vmax.f32 %v3099_v17, 0.0  ;;  %v2586_v6 = vld [vmem:[%s6320_s29 + $0x11f0] sm:$0xff]  ;;  %v2077_v33 = vld [vmem:[%s6320_s29 + $0x208] sm:$0xff] }
 0x233   : > { %v3645_v55 = vadd.f32 %v3644_v31, %v3643_v41  ;;  %v3347_v46 = vmul.f32 %v3219_v21, %v2451_v51  ;;  %v3473_v49 = vadd.f32 %v3345_v60, %v2577_v24  ;;  %v3646_v23 = vsel %vm1395_vm2, %v3471_v2, 0.0  ;;  %v2076_v21 = vld [vmem:[%s6320_s29 + $0x200] sm:$0xff]  ;;  %v2205_v54 = vld [vmem:[%s6320_s29 + $0x608] sm:$0xff] }
 0x234   : > { %v3348_v47 = vmul.f32 %v3220_v3, %v2452_v12  ;;  %v3349_v5 = vmul.f32 %v3221_v18, %v2453_v28  ;;  %v3350_v63 = vmul.f32 %v3222_v44, %v2454_v34  ;;  %v3351_v38 = vmul.f32 %v3223_v4, %v2455_v11  ;;  %v2204_v3 = vld [vmem:[%s6320_s29 + $0x600] sm:$0xff]  ;;  %v2078_v12 = vld [vmem:[%s6320_s29 + $0x210] sm:$0xff]  ;;  %v2079_v11 = vld [vmem:[%s6320_s29 + $0x218] sm:$0xff] }
 0x235   : > { %v3647_v36 = vadd.f32 %v3646_v23, %v3645_v55  ;;  %v3352_v61 = vmul.f32 %v3224_v52, %v2456_v14  ;;  %v3474_v20 = vadd.f32 %v3346_v29, %v2578_v62  ;;  %v3648_v40 = vsel %vm1395_vm2, %v3472_v13, 0.0  ;;  %v2206_v28 = vld [vmem:[%s6320_s29 + $0x610] sm:$0xff]  ;;  %v7145_v52 = vld [vmem:[%s6315_s25] sm:$0xff] }
 0x236   : > { %v3353_v45 = vmul.f32 %v3225_v35, %v2457_v22  ;;  %v3354_v8 = vmul.f32 %v3226_v15, %v2458_v43  ;;  %v7129_v30 = vmul.f32 0.35355338, %v7986_v53  ;;  %v3355_v1 = vmul.f32 %v3227_v7, %v2459_v59  ;;  %v2080_v14 = vld [vmem:[%s6320_s29 + $0x220] sm:$0xff]  ;;  %v2081_v7 = vld [vmem:[%s6320_s29 + $0x228] sm:$0xff]  ;;  %v2082_v59 = vld [vmem:[%s6320_s29 + $0x230] sm:$0xff] }
 0x237   : > { %v3649_v39 = vadd.f32 %v3648_v40, %v3647_v36  ;;  %v3475_v17 = vadd.f32 %v3347_v46, %v2579_v25  ;;  %v3650_v58 = vsel %vm1395_vm2, %v3473_v49, 0.0  ;;  %v3476_v32 = vadd.f32 %v3348_v47, %v2580_v0  ;;  %v2207_v46 = vld [vmem:[%s6320_s29 + $0x618] sm:$0xff]  ;;  %v2084_v47 = vld [vmem:[%s6320_s29 + $0x240] sm:$0xff] }
 0x238   : > { %v3477_v56 = vadd.f32 %v3349_v5, %v2581_v50  ;;  %v3478_v18 = vadd.f32 %v3350_v63, %v2582_v9  ;;  %v3479_v60 = vadd.f32 %v3351_v38, %v2583_v37  ;;  %v3480_v2 = vadd.f32 %v3352_v61, %v2584_v27  ;;  %v2083_v25 = vld [vmem:[%s6320_s29 + $0x238] sm:$0xff]  ;;  %v2085_v50 = vld [vmem:[%s6320_s29 + $0x248] sm:$0xff]  ;;  %v2086_v38 = vld [vmem:[%s6320_s29 + $0x250] sm:$0xff] }
 0x239   : > { %v3651_v10 = vadd.f32 %v3650_v58, %v3649_v39  ;;  %v3652_v19 = vsel %vm1395_vm2, %v3474_v20, 0.0  ;;  %v3481_v51 = vadd.f32 %v3353_v45, %v2585_v57  ;;  %v3482_v24 = vadd.f32 %v3354_v8, %v2586_v6  ;;  %v2208_v61 = vld [vmem:[%s6320_s29 + $0x620] sm:$0xff]  ;;  %v2087_v37 = vld [vmem:[%s6320_s29 + $0x258] sm:$0xff]  ;;  %v2089_v57 = vld [vmem:[%s6320_s29 + $0x268] sm:$0xff] }
 0x23a   : > { %v3483_v4 = vadd.f32 %v3355_v1, %v2587_v16  ;;  %v3654_v41 = vsel %vm1395_vm2, %v3475_v17, 0.0  ;;  %v2716_v34 = vmul.f32 %v2076_v21, %v7129_v30  ;;  %v2844_v29 = vmul.f32 %v7145_v52, %v2204_v3  ;;  %v2088_v27 = vld [vmem:[%s6320_s29 + $0x260] sm:$0xff]  ;;  %v2209_v6 = vld [vmem:[%s6320_s29 + $0x628] sm:$0xff]  ;;  %v2091_v21 = vld [vmem:[%s6320_s29 + $0x278] sm:$0xff] }
 0x23b   : > { %v3653_v44 = vadd.f32 %v3652_v19, %v3651_v10  ;;  %v3656_v31 = vsel %vm1395_vm2, %v3476_v32, 0.0  ;;  %v2717_v62 = vmul.f32 %v2077_v33, %v7129_v30  ;;  %v2845_v35 = vmul.f32 %v7145_v52, %v2205_v54  ;;  %v2332_v45 = vld [vmem:[%s6320_s29 + $0xa00] sm:$0xff]  ;;  %v2333_v1 = vld [vmem:[%s6320_s29 + $0xa08] sm:$0xff]  ;;  %v2090_v10 = vld [vmem:[%s6320_s29 + $0x270] sm:$0xff] }
 0x23c   : > { %v3658_v15 = vsel %vm1395_vm2, %v3477_v56, 0.0  ;;  %v3660_v55 = vsel %vm1395_vm2, %v3478_v18, 0.0  ;;  %v3662_v22 = vsel %vm1395_vm2, %v3479_v60, 0.0  ;;  %v3664_v43 = vsel %vm1395_vm2, %v3480_v2, 0.0  ;;  %v2210_v3 = vld [vmem:[%s6320_s29 + $0x630] sm:$0xff]  ;;  %v2211_v19 = vld [vmem:[%s6320_s29 + $0x638] sm:$0xff] }
 0x23d   : > { %v3655_v13 = vadd.f32 %v3654_v41, %v3653_v44  ;;  %v7160_v23 = vsel %vm1395_vm2, %v3481_v51, 0.0  ;;  %v2718_v5 = vmul.f32 %v2078_v12, %v7129_v30  ;;  %v2846_v63 = vmul.f32 %v7145_v52, %v2206_v28  ;;  %v2334_v33 = vld [vmem:[%s6320_s29 + $0xa10] sm:$0xff]  ;;  %v2212_v41 = vld [vmem:[%s6320_s29 + $0x640] sm:$0xff]  ;;  %v2213_v12 = vld [vmem:[%s6320_s29 + $0x648] sm:$0xff] }
 0x23e   : > { %v7168_v36 = vsel %vm1395_vm2, %v3482_v24, 0.0  ;;  %v7171_v0 = vsel %vm1395_vm2, %v3483_v4, 0.0  ;;  %v2719_v20 = vmul.f32 %v2079_v11, %v7129_v30  ;;  %v2972_v40 = vadd.f32 %v2844_v29, %v2716_v34  ;;  %v2214_v28 = vld [vmem:[%s6320_s29 + $0x650] sm:$0xff]  ;;  %v2335_v11 = vld [vmem:[%s6320_s29 + $0xa18] sm:$0xff] }
 0x23f   : > { %v3657_v49 = vadd.f32 %v3656_v31, %v3655_v13  ;;  %v2720_v8 = vmul.f32 %v2080_v14, %v7129_v30  ;;  %v2847_v39 = vmul.f32 %v7145_v52, %v2207_v46  ;;  %v2973_v53 = vadd.f32 %v2845_v35, %v2717_v62  ;;  %v2215_v31 = vld [vmem:[%s6320_s29 + $0x658] sm:$0xff]  ;;  %v2218_v46 = vld [vmem:[%s6320_s29 + $0x670] sm:$0xff] }
 0x240   : > { %v2721_v17 = vmul.f32 %v2081_v7, %v7129_v30  ;;  %v2722_v58 = vmul.f32 %v2082_v59, %v7129_v30  ;;  %v2723_v16 = vmul.f32 %v2083_v25, %v7129_v30  ;;  %v2724_v32 = vmul.f32 %v2084_v47, %v7129_v30  ;;  %v2217_v7 = vld [vmem:[%s6320_s29 + $0x668] sm:$0xff]  ;;  %v2336_v47 = vld [vmem:[%s6320_s29 + $0xa20] sm:$0xff] }
 0x241   : > { %v3659_v9 = vadd.f32 %v3658_v15, %v3657_v49  ;;  %v7193_v18 = vmul.f32 %v2085_v50, %v7129_v30  ;;  %v2848_v60 = vmul.f32 %v7145_v52, %v2208_v61  ;;  %v2974_v2 = vadd.f32 %v2846_v63, %v2718_v5  ;;  %v2460_v61 = vld [vmem:[%s6320_s29 + $0xe00] sm:$0xff] }
 0x242   : > { %v2726_v54 = vmul.f32 %v2086_v38, %v7129_v30  ;;  %v2727_v51 = vmul.f32 %v2087_v37, %v7129_v30  ;;  %v2728_v24 = vmul.f32 %v2088_v27, %v7129_v30  ;;  %v3100_v44 = vadd.f32 %v2972_v40, %v2332_v45  ;;  %v2337_v37 = vld [vmem:[%s6320_s29 + $0xa28] sm:$0xff] }
 0x243   : > { %v3661_v56 = vadd.f32 %v3660_v55, %v3659_v9  ;;  %v2849_v34 = vmul.f32 %v7145_v52, %v2209_v6  ;;  %v2975_v29 = vadd.f32 %v2847_v39, %v2719_v20  ;;  %v3101_v13 = vadd.f32 %v2973_v53, %v2333_v1  ;;  %v2461_v27 = vld [vmem:[%s6320_s29 + $0xe08] sm:$0xff] }
 0x244   : > { %v2729_v14 = vmul.f32 %v2089_v57, %v7129_v30  ;;  %v2730_v62 = vmul.f32 %v2090_v10, %v7129_v30  ;;  %v2731_v35 = vmul.f32 %v2091_v21, %v7129_v30  ;;  %v2850_v15 = vmul.f32 %v7145_v52, %v2210_v3 }
 0x245   : > { %v3663_v4 = vadd.f32 %v3662_v22, %v3661_v56  ;;  %v2216_v22 = vld [vmem:[%s6320_s29 + $0x660] sm:$0xff]  ;;  %v2851_v49 = vmul.f32 %v7145_v52, %v2211_v19  ;;  %v2976_v59 = vadd.f32 %v2848_v60, %v2720_v8  ;;  %v3102_v25 = vadd.f32 %v2974_v2, %v2334_v33  ;;  %v2462_v56 = vld [vmem:[%s6320_s29 + $0xe10] sm:$0xff] }
 0x246   : > { %v2852_v5 = vmul.f32 %v7145_v52, %v2212_v41  ;;  %v2853_v63 = vmul.f32 %v7145_v52, %v2213_v12  ;;  %v2854_v30 = vmul.f32 %v7145_v52, %v2214_v28  ;;  %v3228_v50 = vmax.f32 %v3100_v44, 0.0  ;;  %v2588_v19 = vld [vmem:[%s6320_s29 + $0x1200] sm:$0xff]  ;;  %v2463_v41 = vld [vmem:[%s6320_s29 + $0xe18] sm:$0xff]  ;;  %v2589_v12 = vld [vmem:[%s6320_s29 + $0x1208] sm:$0xff] }
 0x247   : > { %v3665_v55 = vadd.f32 %v3664_v43, %v3663_v4  ;;  %v2219_v43 = vld [vmem:[%s6320_s29 + $0x678] sm:$0xff]  ;;  %v2977_v20 = vadd.f32 %v2849_v34, %v2721_v17  ;;  %v3103_v40 = vadd.f32 %v2975_v29, %v2335_v11  ;;  %v3229_v9 = vmax.f32 %v3101_v13, 0.0  ;;  %v2338_v17 = vld [vmem:[%s6320_s29 + $0xa30] sm:$0xff]  ;;  %v2340_v4 = vld [vmem:[%s6320_s29 + $0xa40] sm:$0xff] }
 0x248   : > { %v2855_v45 = vmul.f32 %v7145_v52, %v2215_v31  ;;  %v2856_v8 = vmul.f32 %v7145_v52, %v2216_v22  ;;  %v2857_v39 = vmul.f32 %v7145_v52, %v2217_v7  ;;  %v2858_v53 = vmul.f32 %v7145_v52, %v2218_v46  ;;  %v2341_v29 = vld [vmem:[%s6320_s29 + $0xa48] sm:$0xff]  ;;  %v2342_v13 = vld [vmem:[%s6320_s29 + $0xa50] sm:$0xff]  ;;  %v2343_v31 = vld [vmem:[%s6320_s29 + $0xa58] sm:$0xff] }
 0x249   : > { %v3667_v38 = vadd.f32 %v7160_v23, %v3665_v55  ;;  %v2978_v57 = vadd.f32 %v2850_v15, %v2722_v58  ;;  %v3104_v6 = vadd.f32 %v2976_v59, %v2336_v47  ;;  %v3230_v1 = vmax.f32 %v3102_v25, 0.0  ;;  %v2344_v22 = vld [vmem:[%s6320_s29 + $0xa60] sm:$0xff]  ;;  %v2346_v59 = vld [vmem:[%s6320_s29 + $0xa70] sm:$0xff]  ;;  %v2347_v25 = vld [vmem:[%s6320_s29 + $0xa78] sm:$0xff] }
 0x24a   : > { %v2859_v10 = vmul.f32 %v7145_v52, %v2219_v43  ;;  %v2979_v21 = vadd.f32 %v2851_v49, %v2723_v16  ;;  %v2980_v3 = vadd.f32 %v2852_v5, %v2724_v32  ;;  %v3356_v60 = vmul.f32 %v3228_v50, %v2460_v61  ;;  %v2345_v49 = vld [vmem:[%s6320_s29 + $0xa68] sm:$0xff] }
 0x24b   : > { %v3669_v23 = vadd.f32 %v7168_v36, %v3667_v38  ;;  %v2339_v36 = vld [vmem:[%s6320_s29 + $0xa38] sm:$0xff]  ;;  %v3105_v58 = vadd.f32 %v2977_v20, %v2337_v37  ;;  %v3231_v33 = vmax.f32 %v3103_v40, 0.0  ;;  %v3357_v44 = vmul.f32 %v3229_v9, %v2461_v27  ;;  %v2465_v50 = vld [vmem:[%s6320_s29 + $0xe28] sm:$0xff]  ;;  %v2466_v37 = vld [vmem:[%s6320_s29 + $0xe30] sm:$0xff] }
 0x24c   : > { %v2981_v16 = vadd.f32 %v2853_v63, %v7193_v18  ;;  %v2982_v32 = vadd.f32 %v2854_v30, %v2726_v54  ;;  %v2983_v28 = vadd.f32 %v2855_v45, %v2727_v51  ;;  %v2984_v34 = vadd.f32 %v2856_v8, %v2728_v24  ;;  %v2464_v18 = vld [vmem:[%s6320_s29 + $0xe20] sm:$0xff]  ;;  %v2590_v54 = vld [vmem:[%s6320_s29 + $0x1210] sm:$0xff]  ;;  %v2591_v38 = vld [vmem:[%s6320_s29 + $0x1218] sm:$0xff] }
 0x24d   : > { %v7233_v2 = vadd.f32 %v7171_v0, %v3669_v23  ;;  %v3106_v11 = vadd.f32 %v2978_v57, %v2338_v17  ;;  %v3232_v15 = vmax.f32 %v3104_v6, 0.0  ;;  %v3358_v55 = vmul.f32 %v3230_v1, %v2462_v56  ;;  %v2592_v27 = vld [vmem:[%s6320_s29 + $0x1220] sm:$0xff]  ;;  %v2467_v17 = vld [vmem:[%s6320_s29 + $0xe38] sm:$0xff]  ;;  %v2593_v56 = vld [vmem:[%s6320_s29 + $0x1228] sm:$0xff] }
 0x24e   : > { %v2985_v51 = vadd.f32 %v2857_v39, %v2729_v14  ;;  %v2986_v24 = vadd.f32 %v2858_v53, %v2730_v62  ;;  %v2987_v7 = vadd.f32 %v2859_v10, %v2731_v35  ;;  %v3484_v46 = vadd.f32 %v3356_v60, %v2588_v19  ;;  %v2469_v19 = vld [vmem:[%s6320_s29 + $0xe48] sm:$0xff] }
 0x24f   : > { %v3805_v0 = vsel %vm1395_vm2, %v7233_v2, -inf  ;;  %v3107_v47 = vadd.f32 %v2979_v21, %v2339_v36  ;;  %v3233_v5 = vmax.f32 %v3105_v58, 0.0  ;;  %v3359_v63 = vmul.f32 %v3231_v33, %v2463_v41  ;;  %v2468_v36 = vld [vmem:[%s6320_s29 + $0xe40] sm:$0xff]  ;;  %v2470_v41 = vld [vmem:[%s6320_s29 + $0xe50] sm:$0xff] }
 0x250   : > { %3806 = vmax.xlane.f32.xlu1 %v3805_v0  ;;  %v3485_v30 = vadd.f32 %v3357_v44, %v2589_v12  ;;  %v3108_v43 = vadd.f32 %v2980_v3, %v2340_v4  ;;  %v3109_v61 = vadd.f32 %v2981_v16, %v2341_v29  ;;  %v3110_v20 = vadd.f32 %v2982_v32, %v2342_v13  ;;  %v2471_v12 = vld [vmem:[%s6320_s29 + $0xe58] sm:$0xff]  ;;  %v2594_v16 = vld [vmem:[%s6320_s29 + $0x1230] sm:$0xff]  ;;  %v2472_v0 = vld [vmem:[%s6320_s29 + $0xe60] sm:$0xff] }
 0x251   : > { %v3111_v40 = vadd.f32 %v2983_v28, %v2343_v31  ;;  %v3112_v14 = vadd.f32 %v2984_v34, %v2344_v22  ;;  %v3234_v62 = vmax.f32 %v3106_v11, 0.0  ;;  %v3360_v35 = vmul.f32 %v3232_v15, %v2464_v18  ;;  %v2473_v15 = vld [vmem:[%s6320_s29 + $0xe68] sm:$0xff] }
 0x252   : > { %v3486_v9 = vadd.f32 %v3358_v55, %v2590_v54  ;;  %v3113_v45 = vadd.f32 %v2985_v51, %v2345_v49  ;;  %v3114_v8 = vadd.f32 %v2986_v24, %v2346_v59  ;;  %v3115_v39 = vadd.f32 %v2987_v7, %v2347_v25  ;;  %v2595_v55 = vld [vmem:[%s6320_s29 + $0x1238] sm:$0xff]  ;;  %v2474_v24 = vld [vmem:[%s6320_s29 + $0xe70] sm:$0xff] }
 0x253   : > { %v3672_v53 = vsel %vm1395_vm2, %v3484_v46, 0.0  ;;  %v3235_v23 = vmax.f32 %v3107_v47, 0.0  ;;  %v3361_v57 = vmul.f32 %v3233_v5, %v2465_v50  ;;  %v3487_v6 = vadd.f32 %v3359_v63, %v2591_v38  ;;  %v2475_v7 = vld [vmem:[%s6320_s29 + $0xe78] sm:$0xff]  ;;  %v2596_v46 = vld [vmem:[%s6320_s29 + $0x1240] sm:$0xff]  ;;  %v2598_v50 = vld [vmem:[%s6320_s29 + $0x1250] sm:$0xff] }
 0x254   : > { %v3673_v1 = vsel %vm1395_vm2, %v3485_v30, 0.0  ;;  %v3236_v10 = vmax.f32 %v3108_v43, 0.0  ;;  %v3237_v21 = vmax.f32 %v3109_v61, 0.0  ;;  %v3238_v3 = vmax.f32 %v3110_v20, 0.0  ;;  %v7987_v5 = vld [vmem:[#allocation29_spill] sm:$0xff]  ;;  %v2597_v30 = vld [vmem:[%s6320_s29 + $0x1248] sm:$0xff] }
 0x255   : > { %v3674_v60 = vadd.f32 %v3673_v1, %v3672_v53  ;;  %v3239_v58 = vmax.f32 %v3111_v40, 0.0  ;;  %v3362_v33 = vmul.f32 %v3234_v62, %v2466_v37  ;;  %v3488_v44 = vadd.f32 %v3360_v35, %v2592_v27  ;;  %v2599_v38 = vld [vmem:[%s6320_s29 + $0x1258] sm:$0xff]  ;;  %v2600_v20 = vld [vmem:[%s6320_s29 + $0x1260] sm:$0xff]  ;;  %v2601_v37 = vld [vmem:[%s6320_s29 + $0x1268] sm:$0xff] }
 0x256   : > { %v3675_v4 = vsel %vm1395_vm2, %v3486_v9, 0.0  ;;  %v3240_v32 = vmax.f32 %v3112_v14, 0.0  ;;  %v3241_v28 = vmax.f32 %v3113_v45, 0.0  ;;  %v3242_v29 = vmax.f32 %v3114_v8, 0.0  ;;  %v2092_v35 = vld [vmem:[%s6320_s29 + $0x280] sm:$0xff]  ;;  %v2093_v53 = vld [vmem:[%s6320_s29 + $0x288] sm:$0xff] }
 0x257   : > { %v3676_v34 = vadd.f32 %v3675_v4, %v3674_v60  ;;  %v3363_v13 = vmul.f32 %v3235_v23, %v2467_v17  ;;  %v3489_v31 = vadd.f32 %v3361_v57, %v2593_v56  ;;  %v3677_v11 = vsel %vm1395_vm2, %v3487_v6, 0.0  ;;  %v2220_v9 = vld [vmem:[%s6320_s29 + $0x680] sm:$0xff]  ;;  %v2221_v23 = vld [vmem:[%s6320_s29 + $0x688] sm:$0xff]  ;;  %v2602_v57 = vld [vmem:[%s6320_s29 + $0x1270] sm:$0xff] }
 0x258   : > { %v3243_v22 = vmax.f32 %v3115_v39, 0.0  ;;  %v3364_v18 = vmul.f32 %v3236_v10, %v2468_v36  ;;  %v3365_v54 = vmul.f32 %v3237_v21, %v2469_v19  ;;  %v3366_v49 = vmul.f32 %v3238_v3, %v2470_v41  ;;  %v2603_v6 = vld [vmem:[%s6320_s29 + $0x1278] sm:$0xff]  ;;  %v2094_v60 = vld [vmem:[%s6320_s29 + $0x290] sm:$0xff] }
 0x259   : > { %v3678_v51 = vadd.f32 %v3677_v11, %v3676_v34  ;;  %v3367_v59 = vmul.f32 %v3239_v58, %v2471_v12  ;;  %v3490_v25 = vadd.f32 %v3362_v33, %v2594_v16  ;;  %v3679_v47 = vsel %vm1395_vm2, %v3488_v44, 0.0  ;;  %v2222_v36 = vld [vmem:[%s6320_s29 + $0x690] sm:$0xff]  ;;  %v7294_v58 = vld [vmem:[%s6315_s25 + $0x8] sm:$0xff]  ;;  %v2096_v11 = vld [vmem:[%s6320_s29 + $0x2a0] sm:$0xff] }
 0x25a   : > { %v7275_v63 = vmul.f32 0.35355338, %v7987_v5  ;;  %v3368_v43 = vmul.f32 %v3240_v32, %v2472_v0  ;;  %v3369_v40 = vmul.f32 %v3241_v28, %v2473_v15  ;;  %v3491_v14 = vadd.f32 %v3363_v13, %v2595_v55  ;;  %v2095_v0 = vld [vmem:[%s6320_s29 + $0x298] sm:$0xff] }
 0x25b   : > { %v3680_v61 = vadd.f32 %v3679_v47, %v3678_v51  ;;  %v3681_v62 = vsel %vm1395_vm2, %v3489_v31, 0.0  ;;  %v3370_v27 = vmul.f32 %v3242_v29, %v2474_v24  ;;  %v3371_v45 = vmul.f32 %v3243_v22, %v2475_v7  ;;  %v2223_v29 = vld [vmem:[%s6320_s29 + $0x698] sm:$0xff]  ;;  %v2097_v51 = vld [vmem:[%s6320_s29 + $0x2a8] sm:$0xff]  ;;  %v2098_v24 = vld [vmem:[%s6320_s29 + $0x2b0] sm:$0xff] }
 0x25c   : > { %v3492_v8 = vadd.f32 %v3364_v18, %v2596_v46  ;;  %v3493_v1 = vadd.f32 %v3365_v54, %v2597_v30  ;;  %v3494_v17 = vadd.f32 %v3366_v49, %v2598_v50  ;;  %v3495_v56 = vadd.f32 %v3367_v59, %v2599_v38  ;;  %v2224_v7 = vld [vmem:[%s6320_s29 + $0x6a0] sm:$0xff]  ;;  %v2099_v59 = vld [vmem:[%s6320_s29 + $0x2b8] sm:$0xff] }
 0x25d   : > { %v3682_v39 = vadd.f32 %v3681_v62, %v3680_v61  ;;  %v3683_v10 = vsel %vm1395_vm2, %v3490_v25, 0.0  ;;  %v3496_v21 = vadd.f32 %v3368_v43, %v2600_v20  ;;  %v2732_v19 = vmul.f32 %v2092_v35, %v7275_v63  ;;  %v2100_v25 = vld [vmem:[%s6320_s29 + $0x2c0] sm:$0xff]  ;;  %v2101_v20 = vld [vmem:[%s6320_s29 + $0x2c8] sm:$0xff]  ;;  %v2102_v35 = vld [vmem:[%s6320_s29 + $0x2d0] sm:$0xff] }
 0x25e   : > { %v2860_v33 = vmul.f32 %v7294_v58, %v2220_v9  ;;  %v3497_v44 = vadd.f32 %v3369_v40, %v2601_v37  ;;  %v3685_v4 = vsel %vm1395_vm2, %v3491_v14, 0.0  ;;  %v2733_v41 = vmul.f32 %v2093_v53, %v7275_v63  ;;  %v2348_v47 = vld [vmem:[%s6320_s29 + $0xa80] sm:$0xff]  ;;  %v2225_v40 = vld [vmem:[%s6320_s29 + $0x6a8] sm:$0xff]  ;;  %v2103_v9 = vld [vmem:[%s6320_s29 + $0x2d8] sm:$0xff] }
 0x25f   : > { %v3684_v3 = vadd.f32 %v3683_v10, %v3682_v39  ;;  %v2861_v12 = vmul.f32 %v7294_v58, %v2221_v23  ;;  %v3498_v16 = vadd.f32 %v3370_v27, %v2602_v57  ;;  %v3499_v32 = vadd.f32 %v3371_v45, %v2603_v6  ;;  %v2349_v14 = vld [vmem:[%s6320_s29 + $0xa88] sm:$0xff]  ;;  %v2104_v37 = vld [vmem:[%s6320_s29 + $0x2e0] sm:$0xff]  ;;  %v2226_v57 = vld [vmem:[%s6320_s29 + $0x6b0] sm:$0xff] }
 0x260   : > { %v3687_v34 = vsel %vm1395_vm2, %v3492_v8, 0.0  ;;  %v3689_v13 = vsel %vm1395_vm2, %v3493_v1, 0.0  ;;  %v3691_v31 = vsel %vm1395_vm2, %v3494_v17, 0.0  ;;  %v2734_v15 = vmul.f32 %v2094_v60, %v7275_v63  ;;  %v2105_v23 = vld [vmem:[%s6320_s29 + $0x2e8] sm:$0xff]  ;;  %v2350_v6 = vld [vmem:[%s6320_s29 + $0xa90] sm:$0xff] }
 0x261   : > { %v3686_v28 = vadd.f32 %v3685_v4, %v3684_v3  ;;  %v2862_v55 = vmul.f32 %v7294_v58, %v2222_v36  ;;  %v3693_v18 = vsel %vm1395_vm2, %v3495_v56, 0.0  ;;  %v3695_v54 = vsel %vm1395_vm2, %v3496_v21, 0.0  ;;  %v2106_v10 = vld [vmem:[%s6320_s29 + $0x2f0] sm:$0xff]  ;;  %v2107_v21 = vld [vmem:[%s6320_s29 + $0x2f8] sm:$0xff] }
 0x262   : > { %v2988_v46 = vadd.f32 %v2860_v33, %v2732_v19  ;;  %v3697_v49 = vsel %vm1395_vm2, %v3497_v44, 0.0  ;;  %v2735_v5 = vmul.f32 %v2095_v0, %v7275_v63  ;;  %v2863_v30 = vmul.f32 %v7294_v58, %v2223_v29  ;;  %v2227_v44 = vld [vmem:[%s6320_s29 + $0x6b8] sm:$0xff] }
 0x263   : > { %v3688_v22 = vadd.f32 %v3687_v34, %v3686_v28  ;;  %v2989_v50 = vadd.f32 %v2861_v12, %v2733_v41  ;;  %v7320_v43 = vsel %vm1395_vm2, %v3498_v16, 0.0  ;;  %v7323_v61 = vsel %vm1395_vm2, %v3499_v32, 0.0  ;;  %v2351_v4 = vld [vmem:[%s6320_s29 + $0xa98] sm:$0xff]  ;;  %v2228_v32 = vld [vmem:[%s6320_s29 + $0x6c0] sm:$0xff]  ;;  %v2229_v28 = vld [vmem:[%s6320_s29 + $0x6c8] sm:$0xff] }
 0x264   : > { %v2736_v62 = vmul.f32 %v2096_v11, %v7275_v63  ;;  %v2737_v27 = vmul.f32 %v2097_v51, %v7275_v63  ;;  %v2738_v45 = vmul.f32 %v2098_v24, %v7275_v63  ;;  %v2864_v8 = vmul.f32 %v7294_v58, %v2224_v7  ;;  %v2230_v34 = vld [vmem:[%s6320_s29 + $0x6d0] sm:$0xff]  ;;  %v2232_v24 = vld [vmem:[%s6320_s29 + $0x6e0] sm:$0xff]  ;;  %v2233_v7 = vld [vmem:[%s6320_s29 + $0x6e8] sm:$0xff] }
 0x265   : > { %v3690_v38 = vadd.f32 %v3689_v13, %v3688_v22  ;;  %v2990_v39 = vadd.f32 %v2862_v55, %v2734_v15  ;;  %v2739_v1 = vmul.f32 %v2099_v59, %v7275_v63  ;;  %v7340_v17 = vmul.f32 %v2100_v25, %v7275_v63  ;;  %v2231_v15 = vld [vmem:[%s6320_s29 + $0x6d8] sm:$0xff]  ;;  %v2352_v55 = vld [vmem:[%s6320_s29 + $0xaa0] sm:$0xff] }
 0x266   : > { %v3116_v56 = vadd.f32 %v2988_v46, %v2348_v47  ;;  %v2741_v3 = vmul.f32 %v2101_v20, %v7275_v63  ;;  %v2865_v60 = vmul.f32 %v7294_v58, %v2225_v40  ;;  %v2991_v36 = vadd.f32 %v2863_v30, %v2735_v5  ;;  %v2476_v46 = vld [vmem:[%s6320_s29 + $0xe80] sm:$0xff]  ;;  %v2353_v30 = vld [vmem:[%s6320_s29 + $0xaa8] sm:$0xff]  ;;  %v2234_v40 = vld [vmem:[%s6320_s29 + $0x6f0] sm:$0xff] }
 0x267   : > { %v3692_v53 = vadd.f32 %v3691_v31, %v3690_v38  ;;  %v3117_v19 = vadd.f32 %v2989_v50, %v2349_v14  ;;  %v2742_v41 = vmul.f32 %v2102_v35, %v7275_v63  ;;  %v2743_v12 = vmul.f32 %v2103_v9, %v7275_v63  ;;  %v2477_v50 = vld [vmem:[%s6320_s29 + $0xe88] sm:$0xff]  ;;  %v2235_v14 = vld [vmem:[%s6320_s29 + $0x6f8] sm:$0xff] }
 0x268   : > { %v7351_v16 = vmul.f32 %v2104_v37, %v7275_v63  ;;  %v7357_v0 = vmul.f32 %v2105_v23, %v7275_v63  ;;  %v2866_v29 = vmul.f32 %v7294_v58, %v2226_v57  ;;  %v2992_v13 = vadd.f32 %v2864_v8, %v2736_v62  ;;  %v2478_v8 = vld [vmem:[%s6320_s29 + $0xe90] sm:$0xff]  ;;  %v2604_v57 = vld [vmem:[%s6320_s29 + $0x1280] sm:$0xff] }
 0x269   : > { %v3694_v33 = vadd.f32 %v3693_v18, %v3692_v53  ;;  %v3118_v31 = vadd.f32 %v2990_v39, %v2350_v6  ;;  %v7363_v22 = vmul.f32 %v2106_v10, %v7275_v63  ;;  %v7366_v18 = vmul.f32 %v2107_v21, %v7275_v63 }
 0x26a   : > { %v3244_v51 = vmax.f32 %v3116_v56, 0.0  ;;  %v2867_v59 = vmul.f32 %v7294_v58, %v2227_v44  ;;  %v2993_v25 = vadd.f32 %v2865_v60, %v2737_v27  ;;  %v3119_v47 = vadd.f32 %v2991_v36, %v2351_v4  ;;  %v2354_v27 = vld [vmem:[%s6320_s29 + $0xab0] sm:$0xff]  ;;  %v2355_v60 = vld [vmem:[%s6320_s29 + $0xab8] sm:$0xff]  ;;  %v2605_v36 = vld [vmem:[%s6320_s29 + $0x1288] sm:$0xff] }
 0x26b   : > { %v3696_v11 = vadd.f32 %v3695_v54, %v3694_v33  ;;  %v3245_v54 = vmax.f32 %v3117_v19, 0.0  ;;  %v2868_v38 = vmul.f32 %v7294_v58, %v2228_v32  ;;  %v2869_v63 = vmul.f32 %v7294_v58, %v2229_v28 }
 0x26c   : > { %v2870_v20 = vmul.f32 %v7294_v58, %v2230_v34  ;;  %v2871_v62 = vmul.f32 %v7294_v58, %v2231_v15  ;;  %v2994_v35 = vadd.f32 %v2866_v29, %v2738_v45  ;;  %v3120_v9 = vadd.f32 %v2992_v13, %v2352_v55  ;;  %v2356_v34 = vld [vmem:[%s6320_s29 + $0xac0] sm:$0xff]  ;;  %v2606_v13 = vld [vmem:[%s6320_s29 + $0x1290] sm:$0xff]  ;;  %v2359_v55 = vld [vmem:[%s6320_s29 + $0xad8] sm:$0xff] }
 0x26d   : > { %v3698_v5 = vadd.f32 %v3697_v49, %v3696_v11  ;;  %v3246_v37 = vmax.f32 %v3118_v31, 0.0  ;;  %v2872_v39 = vmul.f32 %v7294_v58, %v2232_v24  ;;  %v2873_v53 = vmul.f32 %v7294_v58, %v2233_v7  ;;  %v2480_v29 = vld [vmem:[%s6320_s29 + $0xea0] sm:$0xff] }
 0x26e   : > { %v3372_v23 = vmul.f32 %v3244_v51, %v2476_v46  ;;  %v2995_v6 = vadd.f32 %v2867_v59, %v2739_v1  ;;  %v3121_v56 = vadd.f32 %v2993_v25, %v2353_v30  ;;  %v3247_v10 = vmax.f32 %v3119_v47, 0.0  ;;  %v2481_v59 = vld [vmem:[%s6320_s29 + $0xea8] sm:$0xff]  ;;  %v2607_v25 = vld [vmem:[%s6320_s29 + $0x1298] sm:$0xff] }
 0x26f   : > { %v3700_v49 = vadd.f32 %v7320_v43, %v3698_v5  ;;  %v3373_v45 = vmul.f32 %v3245_v54, %v2477_v50  ;;  %v2479_v43 = vld [vmem:[%s6320_s29 + $0xe98] sm:$0xff]  ;;  %v2874_v19 = vmul.f32 %v7294_v58, %v2234_v40  ;;  %v2875_v33 = vmul.f32 %v7294_v58, %v2235_v14  ;;  %v2360_v5 = vld [vmem:[%s6320_s29 + $0xae0] sm:$0xff]  ;;  %v2361_v30 = vld [vmem:[%s6320_s29 + $0xae8] sm:$0xff] }
 0x270   : > { %v2996_v1 = vadd.f32 %v2868_v38, %v7340_v17  ;;  %v2997_v44 = vadd.f32 %v2869_v63, %v2741_v3  ;;  %v3122_v4 = vadd.f32 %v2994_v35, %v2354_v27  ;;  %v3248_v32 = vmax.f32 %v3120_v9, 0.0  ;;  %v2357_v17 = vld [vmem:[%s6320_s29 + $0xac8] sm:$0xff]  ;;  %v2358_v3 = vld [vmem:[%s6320_s29 + $0xad0] sm:$0xff] }
 0x271   : > { %v7387_v21 = vadd.f32 %v7323_v61, %v3700_v49  ;;  %v3374_v28 = vmul.f32 %v3246_v37, %v2478_v8  ;;  %v2998_v31 = vadd.f32 %v2870_v20, %v2742_v41  ;;  %v2999_v11 = vadd.f32 %v2871_v62, %v2743_v12  ;;  %v2362_v50 = vld [vmem:[%s6320_s29 + $0xaf0] sm:$0xff]  ;;  %v2608_v62 = vld [vmem:[%s6320_s29 + $0x12a0] sm:$0xff]  ;;  %v2483_v8 = vld [vmem:[%s6320_s29 + $0xeb8] sm:$0xff] }
 0x272   : > { %v3500_v15 = vadd.f32 %v3372_v23, %v2604_v57  ;;  %v3123_v51 = vadd.f32 %v2995_v6, %v2355_v60  ;;  %v3249_v24 = vmax.f32 %v3121_v56, 0.0  ;;  %v3375_v7 = vmul.f32 %v3247_v10, %v2479_v43  ;;  %v2482_v14 = vld [vmem:[%s6320_s29 + $0xeb0] sm:$0xff]  ;;  %v2484_v43 = vld [vmem:[%s6320_s29 + $0xec0] sm:$0xff] }
 0x273   : > { %v3808_v61 = vsel %vm1395_vm2, %v7387_v21, -inf  ;;  %v3501_v46 = vadd.f32 %v3373_v45, %v2605_v36  ;;  %v3000_v47 = vadd.f32 %v2872_v39, %v7351_v16  ;;  %v3001_v41 = vadd.f32 %v2873_v53, %v7357_v0  ;;  %v2609_v39 = vld [vmem:[%s6320_s29 + $0x12a8] sm:$0xff]  ;;  %v2610_v36 = vld [vmem:[%s6320_s29 + $0x12b0] sm:$0xff] }
 0x274   : > { %3809 = vmax.xlane.f32.xlu0 %v3808_v61  ;;  %v3002_v12 = vadd.f32 %v2874_v19, %v7363_v22  ;;  %v3003_v54 = vadd.f32 %v2875_v33, %v7366_v18  ;;  %v3124_v38 = vadd.f32 %v2996_v1, %v2356_v34  ;;  %v3250_v63 = vmax.f32 %v3122_v4, 0.0  ;;  %v2363_v22 = vld [vmem:[%s6320_s29 + $0xaf8] sm:$0xff]  ;;  %v2485_v61 = vld [vmem:[%s6320_s29 + $0xec8] sm:$0xff] }
 0x275   : > { %v3376_v20 = vmul.f32 %v3248_v32, %v2480_v29  ;;  %v3502_v40 = vadd.f32 %v3374_v28, %v2606_v13  ;;  %v3125_v35 = vadd.f32 %v2997_v44, %v2357_v17  ;;  %v3126_v16 = vadd.f32 %v2998_v31, %v2358_v3  ;;  %v2611_v34 = vld [vmem:[%s6320_s29 + $0x12b8] sm:$0xff]  ;;  %v2488_v3 = vld [vmem:[%s6320_s29 + $0xee0] sm:$0xff] }
 0x276   : > { %v3127_v9 = vadd.f32 %v2999_v11, %v2359_v55  ;;  %v3703_v0 = vsel %vm1395_vm2, %v3500_v15, 0.0  ;;  %v3251_v18 = vmax.f32 %v3123_v51, 0.0  ;;  %v3377_v37 = vmul.f32 %v3249_v24, %v2481_v59  ;;  %v2486_v15 = vld [vmem:[%s6320_s29 + $0xed0] sm:$0xff]  ;;  %v2487_v17 = vld [vmem:[%s6320_s29 + $0xed8] sm:$0xff] }
 0x277   : > { %v3503_v49 = vadd.f32 %v3375_v7, %v2607_v25  ;;  %v3704_v27 = vsel %vm1395_vm2, %v3501_v46, 0.0  ;;  %v3128_v53 = vadd.f32 %v3000_v47, %v2360_v5  ;;  %v3129_v23 = vadd.f32 %v3001_v41, %v2361_v30  ;;  %v7988_v46 = vld [vmem:[#allocation47_spill] sm:$0xff]  ;;  %v2490_v47 = vld [vmem:[%s6320_s29 + $0xef0] sm:$0xff]  ;;  %v2612_v41 = vld [vmem:[%s6320_s29 + $0x12c0] sm:$0xff] }
 0x278   : > { %v3130_v57 = vadd.f32 %v3002_v12, %v2362_v50  ;;  %v3705_v6 = vadd.f32 %v3704_v27, %v3703_v0  ;;  %v3252_v56 = vmax.f32 %v3124_v38, 0.0  ;;  %v3378_v10 = vmul.f32 %v3250_v63, %v2482_v14  ;;  %v2489_v25 = vld [vmem:[%s6320_s29 + $0xee8] sm:$0xff]  ;;  %v2491_v5 = vld [vmem:[%s6320_s29 + $0xef8] sm:$0xff]  ;;  %v2108_v63 = vld [vmem:[%s6320_s29 + $0x300] sm:$0xff] }
 0x279   : > { %v3504_v45 = vadd.f32 %v3376_v20, %v2608_v62  ;;  %v3706_v60 = vsel %vm1395_vm2, %v3502_v40, 0.0  ;;  %v3131_v19 = vadd.f32 %v3003_v54, %v2363_v22  ;;  %v3253_v33 = vmax.f32 %v3125_v35, 0.0  ;;  %v2236_v20 = vld [vmem:[%s6320_s29 + $0x700] sm:$0xff]  ;;  %v2613_v40 = vld [vmem:[%s6320_s29 + $0x12c8] sm:$0xff]  ;;  %v2614_v22 = vld [vmem:[%s6320_s29 + $0x12d0] sm:$0xff] }
 0x27a   : > { %v3707_v1 = vadd.f32 %v3706_v60, %v3705_v6  ;;  %v3254_v44 = vmax.f32 %v3126_v16, 0.0  ;;  %v3379_v4 = vmul.f32 %v3251_v18, %v2483_v8  ;;  %v3505_v32 = vadd.f32 %v3377_v37, %v2609_v39  ;;  %v2237_v0 = vld [vmem:[%s6320_s29 + $0x708] sm:$0xff]  ;;  %v2615_v18 = vld [vmem:[%s6320_s29 + $0x12d8] sm:$0xff]  ;;  %v2616_v37 = vld [vmem:[%s6320_s29 + $0x12e0] sm:$0xff] }
 0x27b   : > { %v3708_v28 = vsel %vm1395_vm2, %v3503_v49, 0.0  ;;  %v3255_v29 = vmax.f32 %v3127_v9, 0.0  ;;  %v3256_v13 = vmax.f32 %v3128_v53, 0.0  ;;  %v3257_v31 = vmax.f32 %v3129_v23, 0.0  ;;  %v2109_v9 = vld [vmem:[%s6320_s29 + $0x308] sm:$0xff]  ;;  %v2110_v6 = vld [vmem:[%s6320_s29 + $0x310] sm:$0xff] }
 0x27c   : > { %v3709_v11 = vadd.f32 %v3708_v28, %v3707_v1  ;;  %v3258_v55 = vmax.f32 %v3130_v57, 0.0  ;;  %v3380_v51 = vmul.f32 %v3252_v56, %v2484_v43  ;;  %v3506_v24 = vadd.f32 %v3378_v10, %v2610_v36  ;;  %v2617_v53 = vld [vmem:[%s6320_s29 + $0x12e8] sm:$0xff]  ;;  %v2238_v56 = vld [vmem:[%s6320_s29 + $0x710] sm:$0xff]  ;;  %v2619_v43 = vld [vmem:[%s6320_s29 + $0x12f8] sm:$0xff] }
 0x27d   : > { %v3710_v7 = vsel %vm1395_vm2, %v3504_v45, 0.0  ;;  %v7430_v59 = vmul.f32 0.35355338, %v7988_v46  ;;  %v3259_v12 = vmax.f32 %v3131_v19, 0.0  ;;  %v3381_v30 = vmul.f32 %v3253_v33, %v2485_v61  ;;  %v2618_v60 = vld [vmem:[%s6320_s29 + $0x12f0] sm:$0xff]  ;;  %v2111_v61 = vld [vmem:[%s6320_s29 + $0x318] sm:$0xff] }
 0x27e   : > { %v3711_v54 = vadd.f32 %v3710_v7, %v3709_v11  ;;  %v3507_v50 = vadd.f32 %v3379_v4, %v2611_v34  ;;  %v3712_v38 = vsel %vm1395_vm2, %v3505_v32, 0.0  ;;  %v3382_v14 = vmul.f32 %v3254_v44, %v2486_v15  ;;  %v2239_v34 = vld [vmem:[%s6320_s29 + $0x718] sm:$0xff]  ;;  %v2364_v46 = vld [vmem:[%s6320_s29 + $0xb00] sm:$0xff] }
 0x27f   : > { %v3383_v62 = vmul.f32 %v3255_v29, %v2487_v17  ;;  %v3384_v35 = vmul.f32 %v3256_v13, %v2488_v3  ;;  %v3385_v49 = vmul.f32 %v3257_v31, %v2489_v25  ;;  %v3386_v27 = vmul.f32 %v3258_v55, %v2490_v47  ;;  %v2112_v55 = vld [vmem:[%s6320_s29 + $0x320] sm:$0xff] }
 0x280   : > { %v3713_v16 = vadd.f32 %v3712_v38, %v3711_v54  ;;  %v3508_v8 = vadd.f32 %v3380_v51, %v2612_v41  ;;  %v3714_v39 = vsel %vm1395_vm2, %v3506_v24, 0.0  ;;  %v3387_v23 = vmul.f32 %v3259_v12, %v2491_v5  ;;  %v2240_v51 = vld [vmem:[%s6320_s29 + $0x720] sm:$0xff]  ;;  %v2241_v38 = vld [vmem:[%s6320_s29 + $0x728] sm:$0xff] }
 0x281   : > { %v2748_v10 = vmul.f32 %v2108_v63, %v7430_v59  ;;  %v2876_v45 = vmul.f32 %v7145_v52, %v2236_v20  ;;  %v3509_v36 = vadd.f32 %v3381_v30, %v2613_v40  ;;  %v3716_v19 = vsel %vm1395_vm2, %v3507_v50, 0.0  ;;  %v2113_v50 = vld [vmem:[%s6320_s29 + $0x328] sm:$0xff]  ;;  %v2114_v40 = vld [vmem:[%s6320_s29 + $0x330] sm:$0xff] }
 0x282   : > { %v3715_v57 = vadd.f32 %v3714_v39, %v3713_v16  ;;  %v2749_v33 = vmul.f32 %v2109_v9, %v7430_v59  ;;  %v2877_v1 = vmul.f32 %v7145_v52, %v2237_v0  ;;  %v3510_v44 = vadd.f32 %v3382_v14, %v2614_v22  ;;  %v2365_v63 = vld [vmem:[%s6320_s29 + $0xb08] sm:$0xff]  ;;  %v2115_v14 = vld [vmem:[%s6320_s29 + $0x338] sm:$0xff]  ;;  %v2118_v39 = vld [vmem:[%s6320_s29 + $0x350] sm:$0xff] }
 0x283   : > { %v3511_v4 = vadd.f32 %v3383_v62, %v2615_v18  ;;  %v3512_v32 = vadd.f32 %v3384_v35, %v2616_v37  ;;  %v3513_v29 = vadd.f32 %v3385_v49, %v2617_v53  ;;  %v3718_v13 = vsel %vm1395_vm2, %v3508_v8, 0.0  ;;  %v2116_v62 = vld [vmem:[%s6320_s29 + $0x340] sm:$0xff]  ;;  %v2117_v37 = vld [vmem:[%s6320_s29 + $0x348] sm:$0xff]  ;;  %v2242_v49 = vld [vmem:[%s6320_s29 + $0x730] sm:$0xff] }
 0x284   : > { %v3717_v28 = vadd.f32 %v3716_v19, %v3715_v57  ;;  %v2750_v31 = vmul.f32 %v2110_v6, %v7430_v59  ;;  %v2878_v11 = vmul.f32 %v7145_v52, %v2238_v56  ;;  %v3514_v15 = vadd.f32 %v3386_v27, %v2618_v60  ;;  %v2366_v27 = vld [vmem:[%s6320_s29 + $0xb10] sm:$0xff]  ;;  %v2119_v53 = vld [vmem:[%s6320_s29 + $0x358] sm:$0xff] }
 0x285   : > { %v3515_v17 = vadd.f32 %v3387_v23, %v2619_v43  ;;  %v3004_v24 = vadd.f32 %v2876_v45, %v2748_v10  ;;  %v3720_v7 = vsel %vm1395_vm2, %v3509_v36, 0.0  ;;  %v2751_v25 = vmul.f32 %v2111_v61, %v7430_v59  ;;  %v2243_v45 = vld [vmem:[%s6320_s29 + $0x738] sm:$0xff] }
 0x286   : > { %v3719_v3 = vadd.f32 %v3718_v13, %v3717_v28  ;;  %v2879_v47 = vmul.f32 %v7145_v52, %v2239_v34  ;;  %v3005_v41 = vadd.f32 %v2877_v1, %v2749_v33  ;;  %v3722_v54 = vsel %vm1395_vm2, %v3510_v44, 0.0  ;;  %v2367_v60 = vld [vmem:[%s6320_s29 + $0xb18] sm:$0xff]  ;;  %v2120_v33 = vld [vmem:[%s6320_s29 + $0x360] sm:$0xff]  ;;  %v2121_v1 = vld [vmem:[%s6320_s29 + $0x368] sm:$0xff] }
 0x287   : > { %v3724_v5 = vsel %vm1395_vm2, %v3511_v4, 0.0  ;;  %v3726_v30 = vsel %vm1395_vm2, %v3512_v32, 0.0  ;;  %v3728_v20 = vsel %vm1395_vm2, %v3513_v29, 0.0  ;;  %v2752_v35 = vmul.f32 %v2112_v55, %v7430_v59  ;;  %v2122_v44 = vld [vmem:[%s6320_s29 + $0x370] sm:$0xff]  ;;  %v2244_v29 = vld [vmem:[%s6320_s29 + $0x740] sm:$0xff] }
 0x288   : > { %v3721_v12 = vadd.f32 %v3720_v7, %v3719_v3  ;;  %v2880_v16 = vmul.f32 %v7145_v52, %v2240_v51  ;;  %v3006_v9 = vadd.f32 %v2878_v11, %v2750_v31  ;;  %v3730_v22 = vsel %vm1395_vm2, %v3514_v15, 0.0  ;;  %v2368_v13 = vld [vmem:[%s6320_s29 + $0xb20] sm:$0xff]  ;;  %v2245_v3 = vld [vmem:[%s6320_s29 + $0x748] sm:$0xff] }
 0x289   : > { %v7481_v18 = vsel %vm1395_vm2, %v3515_v17, 0.0  ;;  %v3132_v8 = vadd.f32 %v3004_v24, %v2364_v46  ;;  %v2753_v23 = vmul.f32 %v2113_v50, %v7430_v59  ;;  %v2881_v57 = vmul.f32 %v7145_v52, %v2241_v38  ;;  %v2123_v17 = vld [vmem:[%s6320_s29 + $0x378] sm:$0xff]  ;;  %v6075_v55 = vld [vmem:[%s6315_s25] sm:$0xff] }
 0x28a   : > { %v3723_v0 = vadd.f32 %v3722_v54, %v3721_v12  ;;  %v3007_v6 = vadd.f32 %v2879_v47, %v2751_v25  ;;  %v3133_v56 = vadd.f32 %v3005_v41, %v2365_v63  ;;  %v2754_v43 = vmul.f32 %v2114_v40, %v7430_v59  ;;  %v2369_v47 = vld [vmem:[%s6320_s29 + $0xb28] sm:$0xff]  ;;  %v2247_v50 = vld [vmem:[%s6320_s29 + $0x758] sm:$0xff]  ;;  %v2248_v38 = vld [vmem:[%s6320_s29 + $0x760] sm:$0xff] }
 0x28b   : > { %v2755_v36 = vmul.f32 %v2115_v14, %v7430_v59  ;;  %v2756_v19 = vmul.f32 %v2116_v62, %v7430_v59  ;;  %v2757_v4 = vmul.f32 %v2117_v37, %v7430_v59  ;;  %v2882_v32 = vmul.f32 %v7145_v52, %v2242_v49  ;;  %v2492_v52 = vld [vmem:[%s6320_s29 + $0xf00] sm:$0xff]  ;;  %v2493_v41 = vld [vmem:[%s6320_s29 + $0xf08] sm:$0xff] }
 0x28c   : > { %v3725_v10 = vadd.f32 %v3724_v5, %v3723_v0  ;;  %v3008_v28 = vadd.f32 %v2880_v16, %v2752_v35  ;;  %v3134_v61 = vadd.f32 %v3006_v9, %v2366_v27  ;;  %v7503_v31 = vmul.f32 %v2118_v39, %v7430_v59  ;;  %v2370_v35 = vld [vmem:[%s6320_s29 + $0xb30] sm:$0xff]  ;;  %v2249_v49 = vld [vmem:[%s6320_s29 + $0x768] sm:$0xff]  ;;  %v2620_v27 = vld [vmem:[%s6320_s29 + $0x1300] sm:$0xff] }
 0x28d   : > { %v7506_v11 = vmul.f32 %v2119_v53, %v7430_v59  ;;  %v3260_v15 = vmax.f32 %v3132_v8, 0.0  ;;  %v2883_v51 = vmul.f32 %v6075_v55, %v2243_v45  ;;  %v3009_v24 = vadd.f32 %v2881_v57, %v2753_v23  ;;  %v2494_v16 = vld [vmem:[%s6320_s29 + $0xf10] sm:$0xff] }
 0x28e   : > { %v3727_v34 = vadd.f32 %v3726_v30, %v3725_v10  ;;  %v3135_v7 = vadd.f32 %v3007_v6, %v2367_v60  ;;  %v3261_v46 = vmax.f32 %v3133_v56, 0.0  ;;  %v2760_v12 = vmul.f32 %v2120_v33, %v7430_v59  ;;  %v2246_v30 = vld [vmem:[%s6320_s29 + $0x750] sm:$0xff]  ;;  %v2495_v6 = vld [vmem:[%s6320_s29 + $0xf18] sm:$0xff]  ;;  %v2621_v56 = vld [vmem:[%s6320_s29 + $0x1308] sm:$0xff] }
 0x28f   : > { %v2761_v54 = vmul.f32 %v2121_v1, %v7430_v59  ;;  %v7517_v5 = vmul.f32 %v2122_v44, %v7430_v59  ;;  %v2884_v63 = vmul.f32 %v6075_v55, %v2244_v29  ;;  %v3010_v40 = vadd.f32 %v2882_v32, %v2754_v43  ;;  %v2250_v60 = vld [vmem:[%s6320_s29 + $0x770] sm:$0xff]  ;;  %v2251_v43 = vld [vmem:[%s6320_s29 + $0x778] sm:$0xff]  ;;  %v2372_v32 = vld [vmem:[%s6320_s29 + $0xb40] sm:$0xff] }
 0x290   : > { %v3729_v25 = vadd.f32 %v3728_v20, %v3727_v34  ;;  %v3136_v14 = vadd.f32 %v3008_v28, %v2368_v13  ;;  %v3262_v20 = vmax.f32 %v3134_v61, 0.0  ;;  %v2763_v9 = vmul.f32 %v2123_v17, %v7430_v59  ;;  %v2496_v28 = vld [vmem:[%s6320_s29 + $0xf20] sm:$0xff]  ;;  %v2622_v61 = vld [vmem:[%s6320_s29 + $0x1310] sm:$0xff] }
 0x291   : > { %v2885_v0 = vmul.f32 %v6075_v55, %v2245_v3  ;;  %v3388_v37 = vmul.f32 %v3260_v15, %v2492_v52  ;;  %v3011_v8 = vadd.f32 %v2883_v51, %v2755_v36  ;;  %v3137_v39 = vadd.f32 %v3009_v24, %v2369_v47  ;;  %v2373_v15 = vld [vmem:[%s6320_s29 + $0xb48] sm:$0xff]  ;;  %v2623_v24 = vld [vmem:[%s6320_s29 + $0x1318] sm:$0xff] }
 0x292   : > { %v3731_v62 = vadd.f32 %v3730_v22, %v3729_v25  ;;  %v3263_v53 = vmax.f32 %v3135_v7, 0.0  ;;  %v3389_v23 = vmul.f32 %v3261_v46, %v2493_v41  ;;  %v2371_v22 = vld [vmem:[%s6320_s29 + $0xb38] sm:$0xff]  ;;  %v2886_v59 = vmul.f32 %v6075_v55, %v2246_v30  ;;  %v2497_v51 = vld [vmem:[%s6320_s29 + $0xf28] sm:$0xff] }
 0x293   : > { %v2887_v10 = vmul.f32 %v6075_v55, %v2247_v50  ;;  %v2888_v45 = vmul.f32 %v6075_v55, %v2248_v38  ;;  %v3012_v33 = vadd.f32 %v2884_v63, %v2756_v19  ;;  %v3138_v36 = vadd.f32 %v3010_v40, %v2370_v35  ;;  %v2498_v63 = vld [vmem:[%s6320_s29 + $0xf30] sm:$0xff]  ;;  %v2624_v40 = vld [vmem:[%s6320_s29 + $0x1320] sm:$0xff] }
 0x294   : > { %v7528_v57 = vadd.f32 %v7481_v18, %v3731_v62  ;;  %v3264_v1 = vmax.f32 %v3136_v14, 0.0  ;;  %v3390_v44 = vmul.f32 %v3262_v20, %v2494_v16  ;;  %v2889_v34 = vmul.f32 %v6075_v55, %v2249_v49  ;;  %v2376_v35 = vld [vmem:[%s6320_s29 + $0xb60] sm:$0xff]  ;;  %v2499_v49 = vld [vmem:[%s6320_s29 + $0xf38] sm:$0xff] }
 0x295   : > { %v3013_v29 = vadd.f32 %v2885_v0, %v2757_v4  ;;  %v3516_v13 = vadd.f32 %v3388_v37, %v2620_v27  ;;  %v3139_v17 = vadd.f32 %v3011_v8, %v2371_v22  ;;  %v3265_v19 = vmax.f32 %v3137_v39, 0.0  ;;  %v2374_v4 = vld [vmem:[%s6320_s29 + $0xb50] sm:$0xff]  ;;  %v2625_v27 = vld [vmem:[%s6320_s29 + $0x1328] sm:$0xff]  ;;  %v2379_v22 = vld [vmem:[%s6320_s29 + $0xb78] sm:$0xff] }
 0x296   : > { %v3811_v18 = vsel %vm1395_vm2, %v7528_v57, -inf  ;;  %v3391_v3 = vmul.f32 %v3263_v53, %v2495_v6  ;;  %v3517_v52 = vadd.f32 %v3389_v23, %v2621_v56  ;;  %v2890_v7 = vmul.f32 %v6075_v55, %v2250_v60  ;;  %v2377_v53 = vld [vmem:[%s6320_s29 + $0xb68] sm:$0xff]  ;;  %v2378_v23 = vld [vmem:[%s6320_s29 + $0xb70] sm:$0xff] }
 0x297   : > { %3812 = vmax.xlane.f32.xlu1 %v3811_v18  ;;  %v2891_v46 = vmul.f32 %v6075_v55, %v2251_v43  ;;  %v3014_v25 = vadd.f32 %v2886_v59, %v7503_v31  ;;  %v3015_v47 = vadd.f32 %v2887_v10, %v7506_v11  ;;  %v3140_v41 = vadd.f32 %v3012_v33, %v2372_v32  ;;  %v2375_v31 = vld [vmem:[%s6320_s29 + $0xb58] sm:$0xff]  ;;  %v2626_v60 = vld [vmem:[%s6320_s29 + $0x1330] sm:$0xff]  ;;  %v2501_v18 = vld [vmem:[%s6320_s29 + $0xf48] sm:$0xff] }
 0x298   : > { %v3266_v30 = vmax.f32 %v3138_v36, 0.0  ;;  %v3392_v50 = vmul.f32 %v3264_v1, %v2496_v28  ;;  %v3518_v38 = vadd.f32 %v3390_v44, %v2622_v61  ;;  %v3016_v14 = vadd.f32 %v2888_v45, %v2760_v12  ;;  %v2500_v45 = vld [vmem:[%s6320_s29 + $0xf40] sm:$0xff]  ;;  %v2627_v32 = vld [vmem:[%s6320_s29 + $0x1338] sm:$0xff] }
 0x299   : > { %v3017_v20 = vadd.f32 %v2889_v34, %v2761_v54  ;;  %v3141_v62 = vadd.f32 %v3013_v29, %v2373_v15  ;;  %v3734_v55 = vsel %vm1395_vm2, %v3516_v13, 0.0  ;;  %v3267_v11 = vmax.f32 %v3139_v17, 0.0 }
 0x29a   : > { %v3393_v16 = vmul.f32 %v3265_v19, %v2497_v51  ;;  %v3519_v0 = vadd.f32 %v3391_v3, %v2623_v24  ;;  %v3735_v37 = vsel %vm1395_vm2, %v3517_v52, 0.0  ;;  %v3018_v12 = vadd.f32 %v2890_v7, %v7517_v5  ;;  %v7989_v3 = vld [vmem:[#allocation40_spill] sm:$0xff]  ;;  %v2628_v24 = vld [vmem:[%s6320_s29 + $0x1340] sm:$0xff] }
 0x29b   : > { %v3019_v8 = vadd.f32 %v2891_v46, %v2763_v9  ;;  %v3142_v54 = vadd.f32 %v3014_v25, %v2374_v4  ;;  %v3736_v39 = vadd.f32 %v3735_v37, %v3734_v55  ;;  %v3268_v6 = vmax.f32 %v3140_v41, 0.0  ;;  %v2502_v51 = vld [vmem:[%s6320_s29 + $0xf50] sm:$0xff]  ;;  %v2503_v25 = vld [vmem:[%s6320_s29 + $0xf58] sm:$0xff]  ;;  %v2253_v55 = vld [vmem:[%s6320_s29 + $0x788] sm:$0xff] }
 0x29c   : > { %v3394_v56 = vmul.f32 %v3266_v30, %v2498_v63  ;;  %v3520_v59 = vadd.f32 %v3392_v50, %v2624_v40  ;;  %v3737_v10 = vsel %vm1395_vm2, %v3518_v38, 0.0  ;;  %v3143_v43 = vadd.f32 %v3015_v47, %v2375_v31  ;;  %v2124_v30 = vld [vmem:[%s6320_s29 + $0x380] sm:$0xff]  ;;  %v2629_v38 = vld [vmem:[%s6320_s29 + $0x1348] sm:$0xff] }
 0x29d   : > { %v3144_v33 = vadd.f32 %v3016_v14, %v2376_v35  ;;  %v3738_v36 = vadd.f32 %v3737_v10, %v3736_v39  ;;  %v3269_v5 = vmax.f32 %v3141_v62, 0.0  ;;  %v3395_v9 = vmul.f32 %v3267_v11, %v2499_v49  ;;  %v2252_v50 = vld [vmem:[%s6320_s29 + $0x780] sm:$0xff]  ;;  %v2125_v62 = vld [vmem:[%s6320_s29 + $0x388] sm:$0xff]  ;;  %v2506_v11 = vld [vmem:[%s6320_s29 + $0xf70] sm:$0xff] }
 0x29e   : > { %v3521_v1 = vadd.f32 %v3393_v16, %v2625_v27  ;;  %v3739_v44 = vsel %vm1395_vm2, %v3519_v0, 0.0  ;;  %v3145_v28 = vadd.f32 %v3017_v20, %v2377_v53  ;;  %v3146_v61 = vadd.f32 %v3018_v12, %v2378_v23  ;;  %v2504_v31 = vld [vmem:[%s6320_s29 + $0xf60] sm:$0xff]  ;;  %v2505_v35 = vld [vmem:[%s6320_s29 + $0xf68] sm:$0xff]  ;;  %v2630_v27 = vld [vmem:[%s6320_s29 + $0x1350] sm:$0xff] }
 0x29f   : > { %v3147_v34 = vadd.f32 %v3019_v8, %v2379_v22  ;;  %v3740_v29 = vadd.f32 %v3739_v44, %v3738_v36  ;;  %v3270_v13 = vmax.f32 %v3142_v54, 0.0  ;;  %v3396_v15 = vmul.f32 %v3268_v6, %v2500_v45  ;;  %v2126_v54 = vld [vmem:[%s6320_s29 + $0x390] sm:$0xff]  ;;  %v2507_v22 = vld [vmem:[%s6320_s29 + $0xf78] sm:$0xff]  ;;  %v2633_v44 = vld [vmem:[%s6320_s29 + $0x1368] sm:$0xff] }
 0x2a0   : > { %v3522_v17 = vadd.f32 %v3394_v56, %v2626_v60  ;;  %v3741_v19 = vsel %vm1395_vm2, %v3520_v59, 0.0  ;;  %v7566_v52 = vmul.f32 0.35355338, %v7989_v3  ;;  %v3271_v7 = vmax.f32 %v3143_v43, 0.0  ;;  %v2254_v39 = vld [vmem:[%s6320_s29 + $0x790] sm:$0xff]  ;;  %v2631_v6 = vld [vmem:[%s6320_s29 + $0x1358] sm:$0xff] }
 0x2a1   : > { %v3742_v46 = vadd.f32 %v3741_v19, %v3740_v29  ;;  %v3397_v47 = vmul.f32 %v3269_v5, %v2501_v18  ;;  %v3523_v4 = vadd.f32 %v3395_v9, %v2627_v32  ;;  %v3743_v41 = vsel %vm1395_vm2, %v3521_v1, 0.0  ;;  %v2127_v5 = vld [vmem:[%s6320_s29 + $0x398] sm:$0xff]  ;;  %v2632_v1 = vld [vmem:[%s6320_s29 + $0x1360] sm:$0xff]  ;;  %v2634_v18 = vld [vmem:[%s6320_s29 + $0x1370] sm:$0xff] }
 0x2a2   : > { %v3272_v63 = vmax.f32 %v3144_v33, 0.0  ;;  %v3273_v40 = vmax.f32 %v3145_v28, 0.0  ;;  %v3274_v14 = vmax.f32 %v3146_v61, 0.0  ;;  %v3275_v16 = vmax.f32 %v3147_v34, 0.0  ;;  %v2255_v9 = vld [vmem:[%s6320_s29 + $0x798] sm:$0xff]  ;;  %v2256_v19 = vld [vmem:[%s6320_s29 + $0x7a0] sm:$0xff] }
 0x2a3   : > { %v3744_v20 = vadd.f32 %v3743_v41, %v3742_v46  ;;  %v3398_v0 = vmul.f32 %v3270_v13, %v2502_v51  ;;  %v3524_v37 = vadd.f32 %v3396_v15, %v2628_v24  ;;  %v3745_v49 = vsel %vm1395_vm2, %v3522_v17, 0.0  ;;  %v2128_v17 = vld [vmem:[%s6320_s29 + $0x3a0] sm:$0xff]  ;;  %v2635_v51 = vld [vmem:[%s6320_s29 + $0x1378] sm:$0xff] }
 0x2a4   : > { %v3399_v12 = vmul.f32 %v3271_v7, %v2503_v25  ;;  %v2764_v53 = vmul.f32 %v2124_v30, %v7566_v52  ;;  %v2892_v23 = vmul.f32 %v7294_v58, %v2252_v50  ;;  %v3525_v56 = vadd.f32 %v3397_v47, %v2629_v38  ;;  %v2380_v7 = vld [vmem:[%s6320_s29 + $0xb80] sm:$0xff]  ;;  %v2129_v38 = vld [vmem:[%s6320_s29 + $0x3a8] sm:$0xff] }
 0x2a5   : > { %v3746_v8 = vadd.f32 %v3745_v49, %v3744_v20  ;;  %v3747_v59 = vsel %vm1395_vm2, %v3523_v4, 0.0  ;;  %v2765_v10 = vmul.f32 %v2125_v62, %v7566_v52  ;;  %v2893_v45 = vmul.f32 %v7294_v58, %v2253_v55 }
 0x2a6   : > { %v3400_v60 = vmul.f32 %v3272_v63, %v2504_v31  ;;  %v3401_v43 = vmul.f32 %v3273_v40, %v2505_v35  ;;  %v3402_v33 = vmul.f32 %v3274_v14, %v2506_v11  ;;  %v3526_v32 = vadd.f32 %v3398_v0, %v2630_v27  ;;  %v2257_v63 = vld [vmem:[%s6320_s29 + $0x7a8] sm:$0xff]  ;;  %v2258_v0 = vld [vmem:[%s6320_s29 + $0x7b0] sm:$0xff]  ;;  %v2131_v27 = vld [vmem:[%s6320_s29 + $0x3b8] sm:$0xff] }
 0x2a7   : > { %v3748_v36 = vadd.f32 %v3747_v59, %v3746_v8  ;;  %v3749_v28 = vsel %vm1395_vm2, %v3524_v37, 0.0  ;;  %v2766_v61 = vmul.f32 %v2126_v54, %v7566_v52  ;;  %v2894_v34 = vmul.f32 %v7294_v58, %v2254_v39  ;;  %v2381_v40 = vld [vmem:[%s6320_s29 + $0xb88] sm:$0xff]  ;;  %v2382_v37 = vld [vmem:[%s6320_s29 + $0xb90] sm:$0xff]  ;;  %v2383_v59 = vld [vmem:[%s6320_s29 + $0xb98] sm:$0xff] }
 0x2a8   : > { %v3403_v29 = vmul.f32 %v3275_v16, %v2507_v22  ;;  %v3527_v13 = vadd.f32 %v3399_v12, %v2631_v6  ;;  %v3020_v3 = vadd.f32 %v2892_v23, %v2764_v53  ;;  %v3751_v24 = vsel %vm1395_vm2, %v3525_v56, 0.0  ;;  %v2130_v16 = vld [vmem:[%s6320_s29 + $0x3b0] sm:$0xff]  ;;  %v2259_v56 = vld [vmem:[%s6320_s29 + $0x7b8] sm:$0xff] }
 0x2a9   : > { %v3750_v15 = vadd.f32 %v3749_v28, %v3748_v36  ;;  %v2767_v46 = vmul.f32 %v2127_v5, %v7566_v52  ;;  %v2895_v25 = vmul.f32 %v7294_v58, %v2255_v9  ;;  %v3021_v47 = vadd.f32 %v2893_v45, %v2765_v10  ;;  %v2132_v10 = vld [vmem:[%s6320_s29 + $0x3c0] sm:$0xff]  ;;  %v2133_v45 = vld [vmem:[%s6320_s29 + $0x3c8] sm:$0xff] }
 0x2aa   : > { %v3528_v4 = vadd.f32 %v3400_v60, %v2632_v1  ;;  %v3529_v41 = vadd.f32 %v3401_v43, %v2633_v44  ;;  %v3530_v30 = vadd.f32 %v3402_v33, %v2634_v18  ;;  %v3753_v14 = vsel %vm1395_vm2, %v3526_v32, 0.0  ;;  %v2134_v60 = vld [vmem:[%s6320_s29 + $0x3d0] sm:$0xff]  ;;  %v2260_v44 = vld [vmem:[%s6320_s29 + $0x7c0] sm:$0xff] }
 0x2ab   : > { %v3752_v50 = vadd.f32 %v3751_v24, %v3750_v15  ;;  %v2768_v20 = vmul.f32 %v2128_v17, %v7566_v52  ;;  %v2896_v62 = vmul.f32 %v7294_v58, %v2256_v19  ;;  %v3022_v55 = vadd.f32 %v2894_v34, %v2766_v61  ;;  %v2384_v18 = vld [vmem:[%s6320_s29 + $0xba0] sm:$0xff]  ;;  %v2135_v61 = vld [vmem:[%s6320_s29 + $0x3d8] sm:$0xff]  ;;  %v2261_v34 = vld [vmem:[%s6320_s29 + $0x7c8] sm:$0xff] }
 0x2ac   : > { %v3531_v31 = vadd.f32 %v3403_v29, %v2635_v51  ;;  %v3755_v11 = vsel %vm1395_vm2, %v3527_v13, 0.0  ;;  %v3148_v49 = vadd.f32 %v3020_v3, %v2380_v7  ;;  %v2769_v12 = vmul.f32 %v2129_v38, %v7566_v52  ;;  %v2508_v29 = vld [vmem:[%s6320_s29 + $0xf80] sm:$0xff]  ;;  %v7637_v13 = vld [vmem:[%s6315_s25 + $0x8] sm:$0xff]  ;;  %s417_s25 = scalar_lea.vmem %s7900_s7, %s5531_s21 }
 0x2ad   : > { %v3754_v35 = vadd.f32 %v3753_v14, %v3752_v50  ;;  %v2897_v8 = vmul.f32 %v7294_v58, %v2257_v63  ;;  %v3023_v54 = vadd.f32 %v2895_v25, %v2767_v46  ;;  %v3149_v39 = vadd.f32 %v3021_v47, %v2381_v40  ;;  %v2385_v51 = vld [vmem:[%s6320_s29 + $0xba8] sm:$0xff]  ;;  %v2136_v47 = vld [vmem:[%s6320_s29 + $0x3e0] sm:$0xff]  ;;  %v2386_v14 = vld [vmem:[%s6320_s29 + $0xbb0] sm:$0xff] }
 0x2ae   : > { %v3757_v23 = vsel %vm1395_vm2, %v3528_v4, 0.0  ;;  %v3759_v22 = vsel %vm1395_vm2, %v3529_v41, 0.0  ;;  %v3761_v6 = vsel %vm1395_vm2, %v3530_v30, 0.0  ;;  %v2770_v43 = vmul.f32 %v2130_v16, %v7566_v52  ;;  %v2509_v24 = vld [vmem:[%s6320_s29 + $0xf88] sm:$0xff]  ;;  %v2262_v41 = vld [vmem:[%s6320_s29 + $0x7d0] sm:$0xff] }
 0x2af   : > { %v3756_v53 = vadd.f32 %v3755_v11, %v3754_v35  ;;  %v2898_v33 = vmul.f32 %v7294_v58, %v2258_v0  ;;  %v3024_v36 = vadd.f32 %v2896_v62, %v2768_v20  ;;  %v3150_v5 = vadd.f32 %v3022_v55, %v2382_v37  ;;  %v2137_v4 = vld [vmem:[%s6320_s29 + $0x3e8] sm:$0xff]  ;;  %v2510_v20 = vld [vmem:[%s6320_s29 + $0xf90] sm:$0xff]  ;;  %v2263_v35 = vld [vmem:[%s6320_s29 + $0x7d8] sm:$0xff] }
 0x2b0   : > { %v3763_v1 = vsel %vm1395_vm2, %v3531_v31, 0.0  ;;  %v2771_v32 = vmul.f32 %v2131_v27, %v7566_v52  ;;  %v3276_v28 = vmax.f32 %v3148_v49, 0.0  ;;  %v2899_v58 = vmul.f32 %v7637_v13, %v2259_v56  ;;  %v2636_v11 = vld [vmem:[%s6320_s29 + $0x1380] sm:$0xff] }
 0x2b1   : > { %v3758_v9 = vadd.f32 %v3757_v23, %v3756_v53  ;;  %v3025_v15 = vadd.f32 %v2897_v8, %v2769_v12  ;;  %v3151_v17 = vadd.f32 %v3023_v54, %v2383_v59  ;;  %v3277_v19 = vmax.f32 %v3149_v39, 0.0  ;;  %v2387_v12 = vld [vmem:[%s6320_s29 + $0xbb8] sm:$0xff]  ;;  %v2637_v54 = vld [vmem:[%s6320_s29 + $0x1388] sm:$0xff]  ;;  %v2264_v56 = vld [vmem:[%s6320_s29 + $0x7e0] sm:$0xff] }
 0x2b2   : > { %v2772_v7 = vmul.f32 %v2132_v10, %v7566_v52  ;;  %v2773_v46 = vmul.f32 %v2133_v45, %v7566_v52  ;;  %v2774_v25 = vmul.f32 %v2134_v60, %v7566_v52  ;;  %v2900_v30 = vmul.f32 %v7637_v13, %v2260_v44  ;;  %v2511_v8 = vld [vmem:[%s6320_s29 + $0xf98] sm:$0xff] }
 0x2b3   : > { %v3760_v3 = vadd.f32 %v3759_v22, %v3758_v9  ;;  %v3026_v50 = vadd.f32 %v2898_v33, %v2770_v43  ;;  %v3152_v38 = vadd.f32 %v3024_v36, %v2384_v18  ;;  %v3278_v63 = vmax.f32 %v3150_v5, 0.0  ;;  %v2138_v22 = vld [vmem:[%s6320_s29 + $0x3f0] sm:$0xff]  ;;  %v2388_v33 = vld [vmem:[%s6320_s29 + $0xbc0] sm:$0xff]  ;;  %v2265_v18 = vld [vmem:[%s6320_s29 + $0x7e8] sm:$0xff] }
 0x2b4   : > { %v2775_v62 = vmul.f32 %v2135_v61, %v7566_v52  ;;  %v2901_v55 = vmul.f32 %v7637_v13, %v2261_v34  ;;  %v3404_v31 = vmul.f32 %v3276_v28, %v2508_v29  ;;  %v3027_v16 = vadd.f32 %v2899_v58, %v2771_v32  ;;  %v2512_v36 = vld [vmem:[%s6320_s29 + $0xfa0] sm:$0xff]  ;;  %v2638_v5 = vld [vmem:[%s6320_s29 + $0x1390] sm:$0xff]  ;;  %v2389_v32 = vld [vmem:[%s6320_s29 + $0xbc8] sm:$0xff] }
 0x2b5   : > { %v3762_v40 = vadd.f32 %v3761_v6, %v3760_v3  ;;  %v3153_v0 = vadd.f32 %v3025_v15, %v2385_v51  ;;  %v3279_v37 = vmax.f32 %v3151_v17, 0.0  ;;  %v3405_v49 = vmul.f32 %v3277_v19, %v2509_v24  ;;  %v2139_v6 = vld [vmem:[%s6320_s29 + $0x3f8] sm:$0xff]  ;;  %v2513_v58 = vld [vmem:[%s6320_s29 + $0xfa8] sm:$0xff]  ;;  %v2266_v24 = vld [vmem:[%s6320_s29 + $0x7f0] sm:$0xff] }
 0x2b6   : > { %v2776_v39 = vmul.f32 %v2136_v47, %v7566_v52  ;;  %v2777_v53 = vmul.f32 %v2137_v4, %v7566_v52  ;;  %v2902_v23 = vmul.f32 %v7637_v13, %v2262_v41  ;;  %v3028_v59 = vadd.f32 %v2900_v30, %v2772_v7  ;;  %v2639_v15 = vld [vmem:[%s6320_s29 + $0x1398] sm:$0xff]  ;;  %v2390_v7 = vld [vmem:[%s6320_s29 + $0xbd0] sm:$0xff] }
 0x2b7   : > { %v7655_v27 = vadd.f32 %v3763_v1, %v3762_v40  ;;  %v3154_v10 = vadd.f32 %v3026_v50, %v2386_v14  ;;  %v3280_v45 = vmax.f32 %v3152_v38, 0.0  ;;  %v3406_v60 = vmul.f32 %v3278_v63, %v2510_v20  ;;  %v2514_v30 = vld [vmem:[%s6320_s29 + $0xfb0] sm:$0xff]  ;;  %v2640_v50 = vld [vmem:[%s6320_s29 + $0x13a0] sm:$0xff]  ;;  %v2267_v14 = vld [vmem:[%s6320_s29 + $0x7f8] sm:$0xff] }
 0x2b8   : > { %v2903_v9 = vmul.f32 %v7637_v13, %v2263_v35  ;;  %v3029_v1 = vadd.f32 %v2901_v55, %v2773_v46  ;;  %v3532_v44 = vadd.f32 %v3404_v31, %v2636_v11  ;;  %v3155_v28 = vadd.f32 %v3027_v16, %v2387_v12  ;;  %v2391_v20 = vld [vmem:[%s6320_s29 + $0xbd8] sm:$0xff]  ;;  %v2641_v16 = vld [vmem:[%s6320_s29 + $0x13a8] sm:$0xff]  ;;  %v2392_v12 = vld [vmem:[%s6320_s29 + $0xbe0] sm:$0xff] }
 0x2b9   : > { %v3814_v43 = vsel %vm1395_vm2, %v7655_v27, -inf  ;;  %v3281_v61 = vmax.f32 %v3153_v0, 0.0  ;;  %v3407_v34 = vmul.f32 %v3279_v37, %v2511_v8  ;;  %v3533_v29 = vadd.f32 %v3405_v49, %v2637_v54  ;;  %v2515_v11 = vld [vmem:[%s6320_s29 + $0xfb8] sm:$0xff] }
 0x2ba   : > { %3815 = vmax.xlane.f32.xlu0 %v3814_v43  ;;  %v2778_v17 = vmul.f32 %v2138_v22, %v7566_v52  ;;  %v2779_v19 = vmul.f32 %v2139_v6, %v7566_v52  ;;  %v2904_v3 = vmul.f32 %v7637_v13, %v2264_v56  ;;  %v3030_v51 = vadd.f32 %v2902_v23, %v2774_v25  ;;  %v2516_v6 = vld [vmem:[%s6320_s29 + $0xfc0] sm:$0xff]  ;;  %v2642_v56 = vld [vmem:[%s6320_s29 + $0x13b0] sm:$0xff] }
 0x2bb   : > { %v3156_v46 = vadd.f32 %v3028_v59, %v2388_v33  ;;  %v3282_v47 = vmax.f32 %v3154_v10, 0.0  ;;  %v3408_v4 = vmul.f32 %v3280_v45, %v2512_v36  ;;  %v3534_v41 = vadd.f32 %v3406_v60, %v2638_v5 }
 0x2bc   : > { %v2905_v38 = vmul.f32 %v7637_v13, %v2265_v18  ;;  %v3031_v63 = vadd.f32 %v2903_v9, %v2775_v62  ;;  %v3157_v40 = vadd.f32 %v3029_v1, %v2389_v32  ;;  %v3765_v52 = vsel %vm1395_vm2, %v3532_v44, 0.0  ;;  %v2517_v9 = vld [vmem:[%s6320_s29 + $0xfc8] sm:$0xff]  ;;  %v2643_v1 = vld [vmem:[%s6320_s29 + $0x13b8] sm:$0xff] }
 0x2bd   : > { %v3283_v25 = vmax.f32 %v3155_v28, 0.0  ;;  %v3409_v55 = vmul.f32 %v3281_v61, %v2513_v58  ;;  %v3535_v31 = vadd.f32 %v3407_v34, %v2639_v15  ;;  %v3766_v35 = vsel %vm1395_vm2, %v3533_v29, 0.0  ;;  %v2394_v28 = vld [vmem:[%s6320_s29 + $0xbf0] sm:$0xff]  ;;  %v2644_v58 = vld [vmem:[%s6320_s29 + $0x13c0] sm:$0xff] }
 0x2be   : > { %v2906_v0 = vmul.f32 %v7637_v13, %v2266_v24  ;;  %v3032_v37 = vadd.f32 %v2904_v3, %v2776_v39  ;;  %v3158_v49 = vadd.f32 %v3030_v51, %v2390_v7  ;;  %v3767_v62 = vadd.f32 %v3766_v35, %v3765_v52  ;;  %v2393_v39 = vld [vmem:[%s6320_s29 + $0xbe8] sm:$0xff]  ;;  %v2518_v29 = vld [vmem:[%s6320_s29 + $0xfd0] sm:$0xff]  ;;  %v2395_v24 = vld [vmem:[%s6320_s29 + $0xbf8] sm:$0xff] }
 0x2bf   : > { %v3284_v8 = vmax.f32 %v3156_v46, 0.0  ;;  %v3410_v54 = vmul.f32 %v3282_v47, %v2514_v30  ;;  %v3536_v23 = vadd.f32 %v3408_v4, %v2640_v50  ;;  %v3768_v22 = vsel %vm1395_vm2, %v3534_v41, 0.0  ;;  %v2519_v4 = vld [vmem:[%s6320_s29 + $0xfd8] sm:$0xff]  ;;  %v2645_v41 = vld [vmem:[%s6320_s29 + $0x13c8] sm:$0xff]  ;;  %v2520_v52 = vld [vmem:[%s6320_s29 + $0xfe0] sm:$0xff] }
 0x2c0   : > { %v2907_v59 = vmul.f32 %v7637_v13, %v2267_v14  ;;  %v3033_v10 = vadd.f32 %v2905_v38, %v2777_v53  ;;  %v3159_v45 = vadd.f32 %v3031_v63, %v2391_v20  ;;  %v3769_v60 = vadd.f32 %v3768_v22, %v3767_v62  ;;  %v2646_v14 = vld [vmem:[%s6320_s29 + $0x13d0] sm:$0xff]  ;;  %v2648_v22 = vld [vmem:[%s6320_s29 + $0x13e0] sm:$0xff] }
 0x2c1   : > { %v3285_v43 = vmax.f32 %v3157_v40, 0.0  ;;  %v3411_v33 = vmul.f32 %v3283_v25, %v2515_v11  ;;  %v3537_v36 = vadd.f32 %v3409_v55, %v2641_v16  ;;  %v3770_v5 = vsel %vm1395_vm2, %v3535_v31, 0.0  ;;  %v2521_v16 = vld [vmem:[%s6320_s29 + $0xfe8] sm:$0xff] }
 0x2c2   : > { %v3034_v44 = vadd.f32 %v2906_v0, %v2778_v17  ;;  %v3160_v18 = vadd.f32 %v3032_v37, %v2392_v12  ;;  %v3771_v32 = vadd.f32 %v3770_v5, %v3769_v60  ;;  %v3286_v13 = vmax.f32 %v3158_v49, 0.0  ;;  %v2647_v0 = vld [vmem:[%s6320_s29 + $0x13d8] sm:$0xff]  ;;  %v3798_v49 = vpop.xlane.xlu0 %3797 }
 0x2c3   : > { %v3412_v53 = vmul.f32 %v3284_v8, %v2516_v6  ;;  %v3538_v61 = vadd.f32 %v3410_v54, %v2642_v56  ;;  %v3772_v34 = vsel %vm1395_vm2, %v3536_v23, 0.0  ;;  %v3035_v15 = vadd.f32 %v2907_v59, %v2779_v19  ;;  %v2522_v23 = vld [vmem:[%s6320_s29 + $0xff0] sm:$0xff]  ;;  %v2523_v60 = vld [vmem:[%s6320_s29 + $0xff8] sm:$0xff] }
 0x2c4   : > { %v3161_v3 = vadd.f32 %v3033_v10, %v2393_v39  ;;  %v3773_v51 = vadd.f32 %v3772_v34, %v3771_v32  ;;  %v3287_v7 = vmax.f32 %v3159_v45, 0.0  ;;  %v3413_v17 = vmul.f32 %v3285_v43, %v2517_v9  ;;  %v2649_v39 = vld [vmem:[%s6320_s29 + $0x13e8] sm:$0xff]  ;;  %v3804_v9 = vpop.xlane.xlu1 %3803 }
 0x2c5   : > { %v3539_v46 = vadd.f32 %v3411_v33, %v2643_v1  ;;  %v3774_v47 = vsel %vm1395_vm2, %v3537_v36, 0.0  ;;  %v3162_v30 = vadd.f32 %v3034_v44, %v2394_v28  ;;  %v3288_v38 = vmax.f32 %v3160_v18, 0.0  ;;  %v2650_v1 = vld [vmem:[%s6320_s29 + $0x13f0] sm:$0xff] }
 0x2c6   : > { %v3775_v50 = vadd.f32 %v3774_v47, %v3773_v51  ;;  %v3414_v63 = vmul.f32 %v3286_v13, %v2518_v29  ;;  %v3540_v40 = vadd.f32 %v3412_v53, %v2644_v58  ;;  %v3776_v19 = vsel %vm1395_vm2, %v3538_v61, 0.0  ;;  %v3801_v18 = vpop.xlane.xlu0 %3800  ;;  %v2651_v53 = vld [vmem:[%s6320_s29 + $0x13f8] sm:$0xff] }
 0x2c7   : > { %v3163_v20 = vadd.f32 %v3035_v15, %v2395_v24  ;;  %v3289_v55 = vmax.f32 %v3161_v3, 0.0  ;;  %v3415_v31 = vmul.f32 %v3287_v7, %v2519_v4  ;;  %v3541_v35 = vadd.f32 %v3413_v17, %v2645_v41 }
 0x2c8   : > { %v3777_v25 = vadd.f32 %v3776_v19, %v3775_v50  ;;  %v3778_v11 = vsel %vm1395_vm2, %v3539_v46, 0.0  ;;  %v3290_v62 = vmax.f32 %v3162_v30, 0.0  ;;  %v3416_v12 = vmul.f32 %v3288_v38, %v2520_v52 }
 0x2c9   : > { %v3542_v8 = vadd.f32 %v3414_v63, %v2646_v14  ;;  %v3780_v54 = vsel %vm1395_vm2, %v3540_v40, 0.0  ;;  %v3291_v56 = vmax.f32 %v3163_v20, 0.0  ;;  %v3417_v59 = vmul.f32 %v3289_v55, %v2521_v16 }
 0x2ca   : > { %v3779_v37 = vadd.f32 %v3778_v11, %v3777_v25  ;;  %v3543_v10 = vadd.f32 %v3415_v31, %v2647_v0  ;;  %v3782_v45 = vsel %vm1395_vm2, %v3541_v35, 0.0  ;;  %v3418_v33 = vmul.f32 %v3290_v62, %v2522_v23 }
 0x2cb   : > { %v3544_v36 = vadd.f32 %v3416_v12, %v2648_v22  ;;  %v3784_v5 = vsel %vm1395_vm2, %v3542_v8, 0.0  ;;  %v3419_v32 = vmul.f32 %v3291_v56, %v2523_v60  ;;  %v3545_v28 = vadd.f32 %v3417_v59, %v2649_v39 }
 0x2cc   : > { %v3781_v6 = vadd.f32 %v3780_v54, %v3779_v37  ;;  %v3786_v13 = vsel %vm1395_vm2, %v3543_v10, 0.0  ;;  %v3820_v34 = vsub.f32 %v6830_v26, %v3798_v49  ;;  %v3546_v29 = vadd.f32 %v3418_v33, %v2650_v1 }
 0x2cd   : > { %v3788_v58 = vsel %vm1395_vm2, %v3544_v36, 0.0  ;;  %v3821_v15 = vsub.f32 %v6968_v48, %v3801_v18  ;;  %v3822_v51 = vsub.f32 %v7099_v42, %v3804_v9  ;;  %v3547_v24 = vadd.f32 %v3419_v32, %v2651_v53  ;;  %v7991_v32 = vld [vmem:[#allocation2_spill] sm:$0xff] }
 0x2ce   : > { %v3783_v43 = vadd.f32 %v3782_v45, %v3781_v6  ;;  %v3790_v7 = vsel %vm1395_vm2, %v3545_v28, 0.0  ;;  %v3828_v47 = vmul.f32 1.442695, %v3820_v34  ;;  %v3792_v41 = vsel %vm1395_vm2, %v3546_v29, 0.0  ;;  %v7994_v34 = vld [vmem:[#allocation5_spill] sm:$0xff] }
 0x2cf   : > { %v3830_v30 = vmul.f32 1.442695, %v3821_v15  ;;  %v3832_v50 = vmul.f32 1.442695, %v3822_v51  ;;  %v3794_v38 = vsel %vm1395_vm2, %v3547_v24, 0.0  ;;  %v7992_v28 = vmov 0.0  }
 0x2d0   : > { %v3785_v44 = vadd.f32 %v3784_v5, %v3783_v43  ;;  %6033 = vpow2.f32 %v3828_v47 }
 0x2d1   : > { %6035 = vpow2.f32 %v3830_v30 }
 0x2d2   : > { %v3787_v61 = vadd.f32 %v3786_v13, %v3785_v44  ;;  %6037 = vpow2.f32 %v3832_v50  ;;  %v7990_v44 = vld [vmem:[#allocation3_spill] sm:$0xff] }
 0x2d4   : > { %v3789_v3 = vadd.f32 %v3788_v58, %v3787_v61  ;;  %v7993_v61 = vld [vmem:[#allocation7_spill] sm:$0xff] }
 0x2d6   : > { %v3791_v46 = vadd.f32 %v3790_v7, %v3789_v3  ;;  %v7995_v3 = vld [vmem:[#allocation6_spill] sm:$0xff] }
 0x2d8   : > { %v3793_v26 = vadd.f32 %v3792_v41, %v3791_v46  ;;  %v4468_v41 = vld [vmem:[%s7783_s13] sm:$0xff] }
 0x2d9   : > { %v3807_v17 = vpop.xlane.xlu1 %3806 }
 0x2da   : > { %v3823_v4 = vsub.f32 %v7233_v2, %v3807_v17  ;;  %v3795_v48 = vadd.f32 %v3794_v38, %v3793_v26  ;;  %v7996_v17 = vld [vmem:[#allocation4_spill] sm:$0xff]  ;;  %v4469_v38 = vld [vmem:[%s7783_s13 + $0x8] sm:$0xff] }
 0x2dc   : > { %v3834_v63 = vmul.f32 1.442695, %v3823_v4  ;;  %v3817_v42 = vsel %vm1395_vm2, %v3795_v48, -inf }
 0x2dd   : > { %3818 = vmax.xlane.f32.xlu1 %v3817_v42  ;;  %v6034_v40 = vpop.eup %6033 }
 0x2de   : > { %6039 = vpow2.f32 %v3834_v63  ;;  %v6036_v19 = vpop.eup %6035  ;;  %v3844_v14 = vsel %vm1395_vm2, %v6034_v40, 0.0 }
 0x2df   : > { %v6038_v52 = vpop.eup %6037  ;;  %v3847_v20 = vsel %vm1395_vm2, %v6036_v19, 0.0  ;;  %3845 = vadd.xlane.f32.xlu0 %v3844_v14 }
 0x2e0   : > { %v3850_v25 = vsel %vm1395_vm2, %v6038_v52, 0.0 }
 0x2e1   : > { %3848 = vadd.xlane.f32.xlu1 %v3847_v20 }
 0x2e3   : > { %3851 = vadd.xlane.f32.xlu0 %v3850_v25  ;;  %v4471_v25 = vld [vmem:[%s7783_s13 + $0x18] sm:$0xff] }
 0x2eb   : > { %v6040_v2 = vpop.eup %6039 }
 0x2ec   : > { %v3853_v55 = vsel %vm1395_vm2, %v6040_v2, 0.0 }
 0x2ed   : > { %3854 = vadd.xlane.f32.xlu1 %v3853_v55 }
 0x2fd   : > { %v3810_v31 = vpop.xlane.xlu0 %3809 }
 0x2fe   : > { %v3824_v35 = vsub.f32 %v7387_v21, %v3810_v31 }
 0x300   : > { %v3836_v11 = vmul.f32 1.442695, %v3824_v35 }
 0x302   : > { %6041 = vpow2.f32 %v3836_v11 }
 0x30f   : > { %v6042_v16 = vpop.eup %6041 }
 0x310   : > { %v3856_v0 = vsel %vm1395_vm2, %v6042_v16, 0.0 }
 0x311   : > { %3857 = vadd.xlane.f32.xlu0 %v3856_v0 }
 0x320   : > { %v3813_v37 = vpop.xlane.xlu1 %3812 }
 0x321   : > { %v3825_v49 = vsub.f32 %v7528_v57, %v3813_v37 }
 0x323   : > { %v3838_v62 = vmul.f32 1.442695, %v3825_v49 }
 0x325   : > { %6043 = vpow2.f32 %v3838_v62 }
 0x332   : > { %v6044_v12 = vpop.eup %6043 }
 0x333   : > { %v3859_v8 = vsel %vm1395_vm2, %v6044_v12, 0.0 }
 0x334   : > { %3860 = vadd.xlane.f32.xlu1 %v3859_v8 }
 0x343   : > { %v3816_v54 = vpop.xlane.xlu0 %3815 }
 0x344   : > { %v3826_v23 = vsub.f32 %v7655_v27, %v3816_v54 }
 0x346   : > { %v3840_v22 = vmul.f32 1.442695, %v3826_v23 }
 0x348   : > { %6045 = vpow2.f32 %v3840_v22 }
 0x355   : > { %v7742_v21 = vpop.eup %6045 }
 0x356   : > { %v3862_v6 = vsel %vm1395_vm2, %v7742_v21, 0.0 }
 0x357   : > { %3863 = vadd.xlane.f32.xlu0 %v3862_v6 }
 0x366   : > { %v3819_v56 = vpop.xlane.xlu1 %3818 }
 0x367   : > { %v3827_v59 = vsub.f32 %v3795_v48, %v3819_v56 }
 0x368   : > { %v3846_v10 = vpop.xlane.xlu0 %3845 }
 0x369   : > { %v3842_v57 = vmul.f32 1.442695, %v3827_v59 }
 0x36a   : > { %v3849_v45 = vpop.xlane.xlu1 %3848 }
 0x36b   : > { %6047 = vpow2.f32 %v3842_v57 }
 0x36c   : > { %6049 = vrcp.f32 %v3846_v10  ;;  %v3852_v27 = vpop.xlane.xlu0 %3851 }
 0x36d   : > { %6051 = vrcp.f32 %v3849_v45 }
 0x36e   : > { %6053 = vrcp.f32 %v3852_v27 }
 0x376   : > { %v3855_v43 = vpop.xlane.xlu1 %3854 }
 0x377   : > { %6055 = vrcp.f32 %v3855_v43 }
 0x378   : > { %v6048_v60 = vpop.eup %6047 }
 0x379   : > { %v3865_v39 = vsel %vm1395_vm2, %v6048_v60, 0.0  ;;  %v6050_v33 = vpop.eup %6049 }
 0x37a   : > { %3866 = vadd.xlane.f32.xlu1 %v3865_v39  ;;  %v6052_v36 = vpop.eup %6051  ;;  %v3876_v5 = vmul.f32 %v6050_v33, %v6034_v40 }
 0x37b   : > { %v3877_v9 = vmul.f32 %v6052_v36, %v6036_v19  ;;  %v6054_v1 = vpop.eup %6053  ;;  %v4470_v19 = vld [vmem:[%s7783_s13 + $0x10] sm:$0xff]  ;;  %v5141_v36 = vld [vmem:[%s408_s16 + $0x18] sm:$0xff] }
 0x37c   : > { %5914 = vmatmul.mubr.msk.f32.vlgmr.msra.gmra.mxu0 %vm1395_vm2, %v3876_v5  ;;  %v3878_v13 = vmul.f32 %v6054_v1, %v6038_v52  ;;  %v5140_v5 = vld [vmem:[%s408_s16 + $0x10] sm:$0xff]  ;;  %v5138_v1 = vld [vmem:[%s408_s16] sm:$0xff] }
 0x37d   : > { %5922 = vmatpush3.msra.mxu0 %v7990_v44  ;;  %5919 = vmatmul.mubr.msk.f32.vlgmr.msra.gmra.mxu1 %vm1395_vm2, %v3877_v9  ;;  %v5139_v9 = vld [vmem:[%s408_s16 + $0x8] sm:$0xff]  ;;  %v5236_v44 = vld [vmem:[%s7836_s20 + $0x38] sm:$0xff] }
 0x37e   : > { %5927 = vmatpush3.msra.mxu1 %v7991_v32  ;;  %5923 = vmatprep.mubr.msk.f32.mxu0 %vm6088_vm1, %v7992_v28  ;;  %v5234_v32 = vld [vmem:[%s7836_s20 + $0x28] sm:$0xff] }
 0x37f   : > { %5931 = vmatprep.subr.mxu0 %v7992_v28  ;;  %5928 = vmatprep.mubr.msk.f32.mxu1 %vm6088_vm1, %v7992_v28 }
 0x380   : > { %5924 = vmatmul.mubr.msk.f32.vlgmr.msra.gmra.mxu0 %vm1395_vm2, %v3878_v13  ;;  %5936 = vmatprep.subr.mxu1 %v7992_v28 }
 0x381   : > { %5932 = vmatpush3.msra.mxu0 %v7993_v61  ;;  %5933 = vmatprep.mubr.msk.f32.mxu0 %vm6088_vm1, %v7992_v28 }
 0x382   : > { %5941 = vmatprep.subr.mxu0 %v7992_v28 }
 0x384   : > { %v6056_v18 = vpop.eup %6055 }
 0x385   : > { %v3879_v53 = vmul.f32 %v6056_v18, %v6040_v2  ;;  %v5235_v18 = vld [vmem:[%s7836_s20 + $0x30] sm:$0xff] }
 0x387   : > { %5929 = vmatmul.mubr.msk.f32.vlgmr.msra.gmra.mxu1 %vm1395_vm2, %v3879_v53 }
 0x388   : > { %5937 = vmatpush3.msra.mxu1 %v7994_v34  ;;  %5938 = vmatprep.mubr.msk.f32.mxu1 %vm6088_vm1, %v7992_v28 }
 0x389   : > { %5946 = vmatprep.subr.mxu1 %v7992_v28 }
 0x39a   : > { %v3858_v29 = vpop.xlane.xlu0 %3857 }
 0x39b   : > { %6057 = vrcp.f32 %v3858_v29  ;;  %v5071_v29 = vlaneseq }
 0x3a8   : > { %v6058_v58 = vpop.eup %6057 }
 0x3a9   : > { %v3880_v15 = vmul.f32 %v6058_v58, %v6042_v16  ;;  %v7844_v58 = vshrl.u32 %v5071_v29, 7 }
 0x3ab   : > { %5934 = vmatmul.mubr.msk.f32.vlgmr.msra.gmra.mxu0 %vm1395_vm2, %v3880_v15  ;;  %v5073_v15 = vsub.s32 0, %v7844_v58 }
 0x3ac   : > { %5942 = vmatpush3.msra.mxu0 %v7995_v3  ;;  %5943 = vmatprep.mubr.msk.f32.mxu0 %vm6088_vm1, %v7992_v28  ;;  %v7850_v3 = vld [vmem:[%s417_s25] sm:$0xff] }
 0x3ad   : > { %5951 = vmatprep.subr.mxu0 %v7992_v28 }
 0x3bd   : > { %v3861_v51 = vpop.xlane.xlu1 %3860 }
 0x3be   : > { %6059 = vrcp.f32 %v3861_v51 }
 0x3cb   : > { %v6060_v24 = vpop.eup %6059 }
 0x3cc   : > { %v3881_v7 = vmul.f32 %v6060_v24, %v6044_v12  ;;  %v5074_v24 = vrot.slane %v7850_v3, %v5073_v15 }
 0x3ce   : > { %5939 = vmatmul.mubr.msk.f32.vlgmr.msra.gmra.mxu1 %vm1395_vm2, %v3881_v7 }
 0x3cf   : > { %5947 = vmatpush3.msra.mxu1 %v7996_v17  ;;  %5948 = vmatprep.mubr.msk.f32.mxu1 %vm6088_vm1, %v7992_v28 }
 0x3d0   : > { %5956 = vmatprep.subr.mxu1 %v7992_v28 }
 0x3e0   : > { %v3864_v46 = vpop.xlane.xlu0 %3863 }
 0x3e1   : > { %6061 = vrcp.f32 %v3864_v46 }
 0x3ee   : > { %v6062_v47 = vpop.eup %6061 }
 0x3ef   : > { %v3882_v4 = vmul.f32 %v6062_v47, %v7742_v21 }
 0x3f1   : > { %5944 = vmatmul.mubr.msk.f32.vlgmr.msra.gmra.mxu0 %vm1395_vm2, %v3882_v4  ;;  %v6077_v4 = vld [vmem:[%s6149_s10] sm:$0xff] }
 0x3f2   : > { %5952 = vmatpush3.msra.mxu0 %v4468_v41  ;;  %5953 = vmatprep.mubr.msk.f32.mxu0 %vm6088_vm1, %v7992_v28 }
 0x3f3   : > { %5961 = vmatprep.subr.mxu0 %v7992_v28 }
 0x403   : > { %v3867_v30 = vpop.xlane.xlu1 %3866 }
 0x404   : > { %6063 = vrcp.f32 %v3867_v30 }
 0x411   : > { %v6064_v26 = vpop.eup %6063 }
 0x412   : > { %v3883_v50 = vmul.f32 %v6064_v26, %v6048_v60 }
 0x414   : > { %5949 = vmatmul.mubr.msk.f32.vlgmr.msra.gmra.mxu1 %vm1395_vm2, %v3883_v50 }
 0x415   : > { %5957 = vmatpush3.msra.mxu1 %v4468_v41  ;;  %5958 = vmatprep.mubr.msk.f32.mxu1 %vm6088_vm1, %v7992_v28 }
 0x416   : > { %5966 = vmatprep.subr.mxu1 %v7992_v28 }
 0x43c   : > { %v3953_v63 = vpop.f32.mrf.mxu0 }
 0x43d   : > { %5954 = vmatmul.mubr.msk.f32.vlgmr.msra.gmra.mxu0 %vm1395_vm2, %v3953_v63  ;;  %v4026_v48 = vpop.f32.mrf.mxu1 }
 0x43e   : > { %v5915_v42 = vpop.f32.mrf.mxu0  ;;  %5959 = vmatmul.mubr.msk.f32.vlgmr.msra.gmra.mxu1 %vm1395_vm2, %v4026_v48  ;;  %5962 = vmatpush3.msra.mxu0 %v4469_v38 }
 0x43f   : > { %v5920_v40 = vpop.f32.mrf.mxu1  ;;  %5963 = vmatprep.mubr.msk.f32.mxu0 %vm6088_vm1, %v7992_v28  ;;  %5967 = vmatpush3.msra.mxu1 %v4469_v38 }
 0x440   : > { %v4099_v52 = vpop.f32.mrf.mxu0  ;;  %5971 = vmatprep.subr.mxu0 %v7992_v28  ;;  %5968 = vmatprep.mubr.msk.f32.mxu1 %vm6088_vm1, %v7992_v28 }
 0x441   : > { %5964 = vmatmul.mubr.msk.f32.vlgmr.msra.gmra.mxu0 %vm1395_vm2, %v4099_v52  ;;  %5976 = vmatprep.subr.mxu1 %v7992_v28 }
 0x442   : > { %v5925_v2 = vpop.f32.mrf.mxu0  ;;  %5972 = vmatpush3.msra.mxu0 %v4470_v19  ;;  %5973 = vmatprep.mubr.msk.f32.mxu0 %vm6088_vm1, %v7992_v28 }
 0x443   : > { %5981 = vmatprep.subr.mxu0 %v7992_v28 }
 0x447   : > { %v4172_v14 = vpop.f32.mrf.mxu1 }
 0x448   : > { %5969 = vmatmul.mubr.msk.f32.vlgmr.msra.gmra.mxu1 %vm1395_vm2, %v4172_v14 }
 0x449   : > { %v5930_v20 = vpop.f32.mrf.mxu1  ;;  %5977 = vmatpush3.msra.mxu1 %v4470_v19  ;;  %5978 = vmatprep.mubr.msk.f32.mxu1 %vm6088_vm1, %v7992_v28 }
 0x44a   : > { %5986 = vmatprep.subr.mxu1 %v7992_v28 }
 0x46b   : > { %v4245_v55 = vpop.f32.mrf.mxu0 }
 0x46c   : > { %5974 = vmatmul.mubr.msk.f32.vlgmr.msra.gmra.mxu0 %vm1395_vm2, %v4245_v55 }
 0x46d   : > { %v5935_v31 = vpop.f32.mrf.mxu0  ;;  %5982 = vmatpush3.msra.mxu0 %v4471_v25  ;;  %5983 = vmatprep.mubr.msk.f32.mxu0 %vm6088_vm1, %v7992_v28 }
 0x46e   : > { %5991 = vmatprep.subr.mxu0 %v5141_v36 }
 0x48e   : > { %v4318_v35 = vpop.f32.mrf.mxu1 }
 0x48f   : > { %5979 = vmatmul.mubr.msk.f32.vlgmr.msra.gmra.mxu1 %vm1395_vm2, %v4318_v35 }
 0x490   : > { %v5940_v11 = vpop.f32.mrf.mxu1  ;;  %5987 = vmatpush3.msra.mxu1 %v4471_v25  ;;  %5988 = vmatprep.mubr.msk.f32.mxu1 %vm6088_vm1, %v7992_v28  ;;  %v5233_v28 = vld [vmem:[%s7836_s20 + $0x20] sm:$0xff] }
 0x491   : > { %6002 = vmatprep.subr.mxu1 %v5236_v44 }
 0x4b1   : > { %v4391_v16 = vpop.f32.mrf.mxu0 }
 0x4b2   : > { %5984 = vmatmul.mubr.msk.f32.vlgmr.msra.gmra.mxu0 %vm1395_vm2, %v4391_v16 }
 0x4b3   : > { %v5945_v0 = vpop.f32.mrf.mxu0  ;;  %5992 = vmatpush3.msra.mxu0 %v5141_v36 }
 0x4b4   : > { %5993 = vmatprep.subr.mxu0 %v5140_v5 }
 0x4b5   : > { %5994 = vmatpush3.msra.mxu0 %v5140_v5 }
 0x4b6   : > { %5995 = vmatprep.subr.mxu0 %v5139_v9 }
 0x4b7   : > { %5996 = vmatpush3.msra.mxu0 %v5139_v9 }
 0x4b8   : > { %5997 = vmatprep.subr.mxu0 %v5138_v1 }
 0x4b9   : > { %5998 = vmatpush3.msra.mxu0 %v5138_v1 }
 0x4d4   : > { %v4464_v37 = vpop.f32.mrf.mxu1 }
 0x4d5   : > { %5989 = vmatmul.mubr.msk.f32.vlgmr.msra.gmra.mxu1 %vm1395_vm2, %v4464_v37 }
 0x4d6   : > { %v5950_v49 = vpop.f32.mrf.mxu1  ;;  %6003 = vmatpush3.msra.mxu1 %v5236_v44 }
 0x4d7   : > { %6004 = vmatprep.subr.mxu1 %v5235_v18 }
 0x4d8   : > { %6005 = vmatpush3.msra.mxu1 %v5235_v18 }
 0x4d9   : > { %6006 = vmatprep.subr.mxu1 %v5234_v32 }
 0x4da   : > { %6007 = vmatpush3.msra.mxu1 %v5234_v32 }
 0x4db   : > { %6008 = vmatprep.subr.mxu1 %v5233_v28 }
 0x4dc   : > { %6009 = vmatpush3.msra.mxu1 %v5233_v28 }
 0x4fd   : > { %v4541_v62 = vpop.f32.mrf.mxu0 }
 0x4fe   : > { %v4614_v12 = vpop.f32.mrf.mxu1  ;;  %v5057_v22 = vsel %vm482_vm0, %v4541_v62, 0.0  ;;  %v5128_v62 = vsub.s32 1, %v7844_v58 }
 0x4ff   : > { %v5955_v8 = vpop.f32.mrf.mxu0  ;;  %v5064_v57 = vsel %vm482_vm0, %v4614_v12, 0.0 }
 0x500   : > { %v5960_v54 = vpop.f32.mrf.mxu1 }
 0x501   : > { %v4687_v23 = vpop.f32.mrf.mxu0  ;;  %v5134_v54 = vsub.s32 2, %v7844_v58 }
 0x502   : > { %v5058_v21 = vsel %vm482_vm0, %v4687_v23, 0.0 }
 0x503   : > { %v5059_v6 = vadd.f32 %v5058_v21, %v5057_v22  ;;  %v5965_v56 = vpop.f32.mrf.mxu0  ;;  %v5129_v21 = vrot.slane %v7850_v3, %v5128_v62 }
 0x504   : > { %v6078_v56 = vld [vmem:[%s6149_s10 + $0x8] sm:$0xff] }
 0x508   : > { %v4760_v59 = vpop.f32.mrf.mxu1 }
 0x509   : > { %v5065_v10 = vsel %vm482_vm0, %v4760_v59, 0.0 }
 0x50a   : > { %v5066_v45 = vadd.f32 %v5065_v10, %v5064_v57  ;;  %v5970_v60 = vpop.f32.mrf.mxu1  ;;  %v5135_v10 = vrot.slane %v7850_v3, %v5134_v54 }
 0x52c   : > { %v4833_v39 = vpop.f32.mrf.mxu0 }
 0x52d   : > { %v5060_v27 = vsel %vm482_vm0, %v4833_v39, 0.0 }
 0x52e   : > { %v5061_v43 = vadd.f32 %v5060_v27, %v5059_v6  ;;  %v5975_v33 = vpop.f32.mrf.mxu0 }
 0x54f   : > { %v4906_v13 = vpop.f32.mrf.mxu1 }
 0x550   : > { %v5067_v53 = vsel %vm482_vm0, %v4906_v13, 0.0 }
 0x551   : > { %v5068_v61 = vadd.f32 %v5067_v53, %v5066_v45  ;;  %v5980_v34 = vpop.f32.mrf.mxu1 }
 0x572   : > { %v4979_v51 = vpop.f32.mrf.mxu0 }
 0x573   : > { %v5062_v7 = vsel %vm482_vm0, %v4979_v51, 0.0 }
 0x574   : > { %v5063_v17 = vadd.f32 %v5062_v7, %v5061_v43  ;;  %v5985_v46 = vpop.f32.mrf.mxu0 }
 0x576   : > { %v5075_v47 = vadd.f32 %v5074_v24, %v5063_v17 }
 0x578   : > { %v5077_v41 = vadd.f32 %v6077_v4, %v5075_v47 }
 0x57a   : > { %v5079_v30 = vsel %vm482_vm0, %v5077_v41, 0.0  ;;  %v5096_v26 = vmul.f32 %v5077_v41, %v5077_v41 }
 0x57b   : > { %v5080_v50 = vrot.slane %v5079_v30, 4 }
 0x57c   : > { %v5098_v38 = vsel %vm482_vm0, %v5096_v26, 0.0  ;;  %v5230_v26 = vld [vmem:[%s7836_s20 + $0x8] sm:$0xff] }
 0x57d   : > { %v5081_v63 = vadd.f32 %v5080_v50, %v5079_v30  ;;  %v5099_v48 = vrot.slane %v5098_v38, 4  ;;  %v5231_v30 = vld [vmem:[%s7836_s20 + $0x10] sm:$0xff]  ;;  %v5229_v50 = vld [vmem:[%s7836_s20] sm:$0xff] }
 0x57f   : > { %v5082_v42 = vrot.slane %v5081_v63, 2  ;;  %v5100_v40 = vadd.f32 %v5099_v48, %v5098_v38  ;;  %v5144_v38 = vsub.s32 3, %v7844_v58 }
 0x581   : > { %v5083_v19 = vadd.f32 %v5082_v42, %v5081_v63  ;;  %v5101_v52 = vrot.slane %v5100_v40, 2  ;;  %v5145_v63 = vrot.slane %v7850_v3, %v5144_v38 }
 0x583   : > { %v5084_v2 = vrot.slane %v5083_v19, 1  ;;  %v5102_v14 = vadd.f32 %v5101_v52, %v5100_v40 }
 0x585   : > { %v5085_v20 = vadd.f32 %v5084_v2, %v5083_v19  ;;  %v5103_v25 = vrot.slane %v5102_v14, 1 }
 0x587   : > { %v5094_v55 = vmul.f32 0.125, %v5085_v20  ;;  %v5104_v31 = vadd.f32 %v5103_v25, %v5102_v14  ;;  %v5239_v14 = vsub.s32 4, %v7844_v58 }
 0x589   : > { %v5112_v35 = vmul.f32 0.125, %v5104_v31  ;;  %v5114_v11 = vmul.f32 %v5094_v55, %v5094_v55  ;;  %v5118_v22 = vsub.f32 %v5077_v41, %v5094_v55  ;;  %v5232_v41 = vld [vmem:[%s7836_s20 + $0x18] sm:$0xff]  ;;  %v5240_v20 = vrot.slane %v7850_v3, %v5239_v14 }
 0x58a   : > { %6010 = vmatprep.subr.mxu1 %v5232_v41 }
 0x58b   : > { %v5116_v16 = vsub.f32 %v5112_v35, %v5114_v11  ;;  %6011 = vmatpush3.msra.mxu1 %v5232_v41 }
 0x58c   : > { %6012 = vmatprep.subr.mxu1 %v5231_v30 }
 0x58d   : > { %v5120_v0 = vadd.f32 1e-05, %v5116_v16  ;;  %6013 = vmatpush3.msra.mxu1 %v5231_v30 }
 0x58e   : > { %6014 = vmatprep.subr.mxu1 %v5230_v26 }
 0x58f   : > { %6065 = vrsqrt.f32 %v5120_v0  ;;  %6015 = vmatpush3.msra.mxu1 %v5230_v26 }
 0x590   : > { %6016 = vmatprep.subr.mxu1 %v5229_v50 }
 0x591   : > { %6017 = vmatpush3.msra.mxu1 %v5229_v50 }
 0x595   : > { %v5052_v37 = vpop.f32.mrf.mxu1 }
 0x596   : > { %v5069_v49 = vsel %vm482_vm0, %v5052_v37, 0.0 }
 0x597   : > { %v5070_v12 = vadd.f32 %v5069_v49, %v5068_v61  ;;  %v5990_v8 = vpop.f32.mrf.mxu1 }
 0x599   : > { %v5076_v23 = vadd.f32 %v5074_v24, %v5070_v12 }
 0x59b   : > { %v5078_v59 = vadd.f32 %v6078_v56, %v5076_v23 }
 0x59c   : > { %v6066_v6 = vpop.eup %6065 }
 0x59d   : > { %v5124_v57 = vmul.f32 %v6066_v6, %v5118_v22  ;;  %v5086_v45 = vsel %vm482_vm0, %v5078_v59, 0.0  ;;  %v5097_v60 = vmul.f32 %v5078_v59, %v5078_v59 }
 0x59e   : > { %v5087_v39 = vrot.slane %v5086_v45, 4 }
 0x59f   : > { %v5130_v27 = vmul.f32 %v5129_v21, %v5124_v57  ;;  %v5105_v43 = vsel %vm482_vm0, %v5097_v60, 0.0 }
 0x5a0   : > { %v5088_v33 = vadd.f32 %v5087_v39, %v5086_v45  ;;  %v5106_v36 = vrot.slane %v5105_v43, 4 }
 0x5a1   : > { %v5136_v5 = vadd.f32 %v5135_v10, %v5130_v27 }
 0x5a2   : > { %v5089_v9 = vrot.slane %v5088_v33, 2  ;;  %v5107_v1 = vadd.f32 %v5106_v36, %v5105_v43 }
 0x5a3   : > { %5999 = vmatprep.mubr.msk.f32.mxu0 %vm482_vm0, %v5136_v5 }
 0x5a4   : > { %v5090_v44 = vadd.f32 %v5089_v9, %v5088_v33  ;;  %v5108_v18 = vrot.slane %v5107_v1, 2 }
 0x5a6   : > { %v5091_v32 = vrot.slane %v5090_v44, 1  ;;  %v5109_v28 = vadd.f32 %v5108_v18, %v5107_v1 }
 0x5a8   : > { %v5092_v13 = vadd.f32 %v5091_v32, %v5090_v44  ;;  %v5110_v53 = vrot.slane %v5109_v28, 1 }
 0x5aa   : > { %v5095_v61 = vmul.f32 0.125, %v5092_v13  ;;  %v5111_v34 = vadd.f32 %v5110_v53, %v5109_v28 }
 0x5ac   : > { %v5113_v29 = vmul.f32 0.125, %v5111_v34  ;;  %v5115_v15 = vmul.f32 %v5095_v61, %v5095_v61  ;;  %v5119_v7 = vsub.f32 %v5078_v59, %v5095_v61 }
 0x5ae   : > { %v5117_v51 = vsub.f32 %v5113_v29, %v5115_v15 }
 0x5b0   : > { %v5121_v24 = vadd.f32 1e-05, %v5117_v51 }
 0x5b2   : > { %6067 = vrsqrt.f32 %v5121_v24 }
 0x5bf   : > { %v6068_v17 = vpop.eup %6067 }
 0x5c0   : > { %v5125_v46 = vmul.f32 %v6068_v17, %v5119_v7 }
 0x5c2   : > { %v5131_v47 = vmul.f32 %v5129_v21, %v5125_v46 }
 0x5c4   : > { %v5137_v4 = vadd.f32 %v5135_v10, %v5131_v47  ;;  %v5373_v47 = vsub.s32 5, %v7844_v58 }
 0x5c6   : > { %6000 = vmatmul.mubr.msk.f32.vlgmr.msra.gmra.mxu0 %vm482_vm0, %v5137_v4  ;;  %v5374_v30 = vrot.slane %v7850_v3, %v5373_v47 }
 0x686   : > { %v6001_v48 = vpop.f32.mrf.mxu0 }
 0x687   : > { %v5224_v42 = vadd.f32 %v6001_v48, %v5145_v63 }
 0x688   : > { %v5218_v40 = vpop.f32.mrf.mxu0 }
 0x689   : > { %v5219_v19 = vadd.f32 %v5218_v40, %v5145_v63  ;;  %v5228_v2 = vmax.f32 %v5224_v42, 0.0 }
 0x68b   : > { %v5227_v52 = vmax.f32 %v5219_v19, 0.0 }
 0x68d   : > { %6018 = vmatprep.mubr.msk.f32.mxu1 %vm5241_vm3, %v5227_v52 }
 0x68e   : > { %6019 = vmatmul.mubr.msk.f32.vlgmr.msra.gmra.mxu1 %vm5241_vm3, %v5228_v2 }
 0x74e   : > { %v6020_v25 = vpop.f32.mrf.mxu1 }
 0x74f   : > { %v5320_v55 = vadd.f32 %v6020_v25, %v5240_v20 }
 0x750   : > { %v5314_v31 = vpop.f32.mrf.mxu1 }
 0x751   : > { %v5324_v35 = vadd.f32 %v5320_v55, %v5137_v4  ;;  %v5315_v11 = vadd.f32 %v5314_v31, %v5240_v20  ;;  %v5379_v4 = vsub.s32 6, %v7844_v58 }
 0x753   : > { %v5332_v16 = vsel %vm482_vm0, %v5324_v35, 0.0  ;;  %v5342_v0 = vmul.f32 %v5324_v35, %v5324_v35  ;;  %v5323_v37 = vadd.f32 %v5315_v11, %v5136_v5  ;;  %v5380_v38 = vrot.slane %v7850_v3, %v5379_v4 }
 0x754   : > { %v5333_v49 = vrot.slane %v5332_v16, 4 }
 0x755   : > { %v5350_v62 = vsel %vm482_vm0, %v5342_v0, 0.0  ;;  %v5325_v12 = vsel %vm482_vm0, %v5323_v37, 0.0  ;;  %v5341_v8 = vmul.f32 %v5323_v37, %v5323_v37 }
 0x756   : > { %v5334_v54 = vadd.f32 %v5333_v49, %v5332_v16  ;;  %v5351_v23 = vrot.slane %v5350_v62, 4  ;;  %v5326_v22 = vrot.slane %v5325_v12, 4 }
 0x757   : > { %v5343_v21 = vsel %vm482_vm0, %v5341_v8, 0.0 }
 0x758   : > { %v5335_v6 = vrot.slane %v5334_v54, 2  ;;  %v5352_v56 = vadd.f32 %v5351_v23, %v5350_v62  ;;  %v5327_v59 = vadd.f32 %v5326_v22, %v5325_v12  ;;  %v5344_v57 = vrot.slane %v5343_v21, 4 }
 0x75a   : > { %v5336_v10 = vadd.f32 %v5335_v6, %v5334_v54  ;;  %v5353_v45 = vrot.slane %v5352_v56, 2  ;;  %v5328_v60 = vrot.slane %v5327_v59, 2  ;;  %v5345_v39 = vadd.f32 %v5344_v57, %v5343_v21 }
 0x75c   : > { %v5337_v27 = vrot.slane %v5336_v10, 1  ;;  %v5354_v43 = vadd.f32 %v5353_v45, %v5352_v56  ;;  %v5329_v33 = vadd.f32 %v5328_v60, %v5327_v59  ;;  %v5346_v36 = vrot.slane %v5345_v39, 2 }
 0x75e   : > { %v5338_v5 = vadd.f32 %v5337_v27, %v5336_v10  ;;  %v5355_v9 = vrot.slane %v5354_v43, 1  ;;  %v5330_v1 = vrot.slane %v5329_v33, 1  ;;  %v5347_v44 = vadd.f32 %v5346_v36, %v5345_v39 }
 0x760   : > { %v5340_v18 = vmul.f32 0.125, %v5338_v5  ;;  %v5356_v32 = vadd.f32 %v5355_v9, %v5354_v43  ;;  %v5331_v28 = vadd.f32 %v5330_v1, %v5329_v33  ;;  %v5348_v13 = vrot.slane %v5347_v44, 1 }
 0x762   : > { %v5358_v53 = vmul.f32 0.125, %v5356_v32  ;;  %v5360_v61 = vmul.f32 %v5340_v18, %v5340_v18  ;;  %v5339_v34 = vmul.f32 0.125, %v5331_v28  ;;  %v5349_v29 = vadd.f32 %v5348_v13, %v5347_v44 }
 0x763   : > { %v5364_v41 = vsub.f32 %v5324_v35, %v5340_v18 }
 0x764   : > { %v5362_v15 = vsub.f32 %v5358_v53, %v5360_v61  ;;  %v5359_v51 = vmul.f32 %v5339_v34, %v5339_v34  ;;  %v5357_v24 = vmul.f32 0.125, %v5349_v29  ;;  %v5363_v63 = vsub.f32 %v5323_v37, %v5339_v34 }
 0x766   : > { %v5366_v7 = vadd.f32 1e-05, %v5362_v15  ;;  %v5361_v17 = vsub.f32 %v5357_v24, %v5359_v51 }
 0x768   : > { %6069 = vrsqrt.f32 %v5366_v7  ;;  %v5365_v46 = vadd.f32 1e-05, %v5361_v17 }
 0x76a   : > { %6071 = vrsqrt.f32 %v5365_v46 }
 0x775   : > { %v6070_v26 = vpop.eup %6069 }
 0x776   : > { %v5370_v50 = vmul.f32 %v6070_v26, %v5364_v41 }
 0x777   : > { %v6072_v48 = vpop.eup %6071 }
 0x778   : > { %v5376_v42 = vmul.f32 %v5374_v30, %v5370_v50  ;;  %v5369_v40 = vmul.f32 %v6072_v48, %v5363_v63 }
 0x77a   : > { %v5382_v19 = vadd.f32 %v5380_v38, %v5376_v42  ;;  %v5375_v52 = vmul.f32 %v5374_v30, %v5369_v40 }
 0x77c   : > { %5384 = vst.msk [vmem:[%s422_s28 + $0x8] sm:$0xff] %vm482_vm0, %v5382_v19  ;;  %v5381_v58 = vadd.f32 %v5380_v38, %v5375_v52 }
 0x77e   : > { %5383 = vst.msk [vmem:[%s422_s28] sm:$0xff] %vm482_vm0, %v5381_v58 }
 0x77f PF: > { %s18_s27 = sadd.s32 1, %s6085_s27  }
 0x780   : > { %p15_p4 = scmp.ge.s32.totalorder %s18_s27, 4  }
 0x782   :  { %17 = sbr.rel (!%p15_p4) target bundleno = 1 (0x1), region = 102 }

</bundles_post_ra>
